<compile_context>
chip_gen: v5e
topology: v5e:2x2
jax: 0.10.0
libtpu: 0.0.40
codegen_flags: <defaults>
</compile_context>

<pallas_src>
import jax
import jax.numpy as jnp
from jax.experimental import pallas as pl
from jax.experimental.pallas import tpu as pltpu

NUM_CHANNELS = 100            # torch model's conv out_channels
KERNEL_SIZES = (3, 4, 5)
MAX_SEN_LEN = 50
KMAX = KERNEL_SIZES[-1]                      # 5
LOUT = MAX_SEN_LEN - KERNEL_SIZES[0] + 1     # 48 (longest conv output; multiple of 8)
CH_PAD = 128                                 # channels padded to a full lane group


def _round_up(x, m):
    return ((x + m - 1) // m) * m


def textcnn_kernel(emb_ref, wc_ref, bc_ref, mask_ref, fcw_ref, fcb_ref, out_ref):
    # emb_ref:  (Bt, L_PAD, E) bf16
    # wc_ref:   (KMAX*E, 3*CH_PAD) bf16   merged, tap-padded conv weight
    # bc_ref:   (1, 3*CH_PAD) f32         merged conv bias
    # mask_ref: (LOUT, 3*CH_PAD) f32      1.0 where the time step is valid for the
    #                                     conv group owning that channel, else 0.0
    # fcw_ref:  (3*CH_PAD, CLS_PAD) bf16
    # fcb_ref:  (1, CLS_PAD) f32          pad entries = -1e30
    # out_ref:  (Bt, CLS_PAD) f32
    e = emb_ref[...]                                   # (Bt, L_PAD, E) bf16
    bt = e.shape[0]

    # im2col: row t holds [e[t], e[t+1], ..., e[t+KMAX-1]] along the lane dim.
    x = jnp.concatenate([e[:, t:t + LOUT, :] for t in range(KMAX)], axis=-1)
    x2 = x.reshape(bt * LOUT, KMAX * e.shape[2])       # (Bt*LOUT, KMAX*E)

    # Single merged conv matmul for all 3 kernel sizes, bias folded in, then ReLU.
    ncol = 3 * CH_PAD
    acts = jnp.maximum(
        jnp.dot(x2, wc_ref[...], preferred_element_type=jnp.float32) + bc_ref[...],
        0.0)                                           # (Bt*LOUT, 3*CH_PAD) f32
    acts = acts.reshape(bt, LOUT, ncol)

    # Zero the out-of-range time steps of the k=4 / k=5 conv groups (ReLU >= 0, so a
    # 0/1 multiply preserves the subsequent max-over-time).  Mask is precomputed on
    # the host side and broadcast over the batch dim.
    acts = acts * mask_ref[...]

    feat = jnp.max(acts, axis=1)                       # (Bt, 3*CH_PAD) max-over-time

    # Dropout is identity at inference.  FC + softmax over padded classes
    # (pad logits = -1e30 via the padded bias -> exp == 0).
    logits = jnp.dot(feat.astype(fcw_ref.dtype), fcw_ref[...],
                     preferred_element_type=jnp.float32) + fcb_ref[...]
    m = jnp.max(logits, axis=1, keepdims=True)
    p = jnp.exp(logits - m)
    out_ref[...] = (p / jnp.sum(p, axis=1, keepdims=True)).astype(out_ref.dtype)


def _pack_params(params, cls_pad):
    """Merge conv/fc weights into lane-dense, tap-padded, channel-padded blocks."""
    e_dim = params["w1"].shape[1]

    def pack_conv_w(w):
        k, _, c = w.shape
        wp = jnp.zeros((KMAX, e_dim, CH_PAD), jnp.float32)
        wp = wp.at[:k, :, :c].set(w.astype(jnp.float32))
        return wp.reshape(KMAX * e_dim, CH_PAD)

    def pack_conv_b(b):
        c = b.shape[-1]
        return jnp.zeros((1, CH_PAD), jnp.float32).at[:, :c].set(b.reshape(1, c))

    w_cat = jnp.concatenate(
        [pack_conv_w(params["w1"]), pack_conv_w(params["w2"]),
         pack_conv_w(params["w3"])], axis=1).astype(jnp.bfloat16)   # (KMAX*E, 3*CH_PAD)
    b_cat = jnp.concatenate(
        [pack_conv_b(params["b1"]), pack_conv_b(params["b2"]),
         pack_conv_b(params["b3"])], axis=1)                        # (1, 3*CH_PAD) f32

    # Validity mask: conv group g (kernel size 3+g) has LOUT - g valid time steps.
    t_idx = jnp.arange(LOUT)[:, None]                               # (LOUT, 1)
    g_idx = jnp.arange(3 * CH_PAD)[None, :] // CH_PAD               # (1, 3*CH_PAD)
    mask = (t_idx < (LOUT - g_idx)).astype(jnp.float32)             # (LOUT, 3*CH_PAD)

    fc_w = params["fc_w"].astype(jnp.float32)          # (3*NUM_CHANNELS, n_classes)
    fc_b = params["fc_b"].astype(jnp.float32)          # (1, n_classes)
    n_classes = fc_w.shape[-1]
    fcw_p = jnp.zeros((3 * CH_PAD, cls_pad), jnp.float32)
    for g in range(3):
        fcw_p = fcw_p.at[g * CH_PAD:g * CH_PAD + NUM_CHANNELS, :n_classes].set(
            fc_w[g * NUM_CHANNELS:(g + 1) * NUM_CHANNELS, :])
    fcw_p = fcw_p.astype(jnp.bfloat16)
    fcb_p = jnp.full((1, cls_pad), -1e30, jnp.float32)
    fcb_p = fcb_p.at[:, :n_classes].set(fc_b.reshape(1, n_classes))
    return w_cat, b_cat, mask, fcw_p, fcb_p


def textcnn_forward(token_ids, params, block_batch=64):
    emb_table = params["embedding"]
    n_classes = params["fc_b"].shape[-1]
    B, L = token_ids.shape
    E = emb_table.shape[1]
    assert L == MAX_SEN_LEN, "TextCNN is built for max_sen_len=50 inputs"

    # Embedding gather stays in JAX (glue); bf16 halves HBM traffic into the kernel.
    emb = emb_table[token_ids].astype(jnp.bfloat16)            # (B, L, E)

    # Pad the sequence dim so KMAX-wide im2col windows stay in-bounds (and to 8k).
    l_pad = _round_up(MAX_SEN_LEN + KMAX - 1, 8)               # 56
    emb = jnp.pad(emb, ((0, 0), (0, l_pad - L), (0, 0)))

    # Batch blocking: Bt batch elements per grid step (multiple of 8).
    bt = min(_round_up(block_batch, 8), _round_up(B, 8))
    nb = pl.cdiv(B, bt)
    b_pad = nb * bt
    if b_pad != B:
        emb = jnp.pad(emb, ((0, b_pad - B), (0, 0), (0, 0)))

    cls_pad = _round_up(max(n_classes, 128), 128)
    w_cat, b_cat, mask, fcw_p, fcb_p = _pack_params(params, cls_pad)

    out = pl.pallas_call(
        textcnn_kernel,
        out_shape=jax.ShapeDtypeStruct((b_pad, cls_pad), jnp.float32),
        grid=(nb,),
        in_specs=[
            pl.BlockSpec((bt, l_pad, E), lambda b: (b, 0, 0)),        # emb (batch-blocked)
            pl.BlockSpec((KMAX * E, 3 * CH_PAD), lambda b: (0, 0)),    # merged conv W
            pl.BlockSpec((1, 3 * CH_PAD), lambda b: (0, 0)),           # merged conv bias
            pl.BlockSpec((LOUT, 3 * CH_PAD), lambda b: (0, 0)),        # validity mask
            pl.BlockSpec((3 * CH_PAD, cls_pad), lambda b: (0, 0)),     # fc W (padded)
            pl.BlockSpec((1, cls_pad), lambda b: (0, 0)),              # fc bias (padded)
        ],
        out_specs=pl.BlockSpec((bt, cls_pad), lambda b: (b, 0)),
        compiler_params=pltpu.CompilerParams(
            dimension_semantics=("parallel",)),
    )(emb, w_cat, b_cat, mask, fcw_p, fcb_p)

    return out[:B, :n_classes]


def textcnn_reference(token_ids, params):
    """Plain-JAX f32 reference mirroring the PyTorch forward (eval mode)."""
    emb = params["embedding"][token_ids].astype(jnp.float32)   # (B, L, E)
    B, L, _ = emb.shape
    feats = []
    for wn, bn, k in (("w1", "b1", 3), ("w2", "b2", 4), ("w3", "b3", 5)):
        w, b = params[wn], params[bn]
        lout = L - k + 1
        acc = jnp.zeros((B, lout, NUM_CHANNELS), jnp.float32)
        for t in range(k):
            acc = acc + jnp.einsum("ble,ec->blc", emb[:, t:t + lout, :], w[t])
        acc = jax.nn.relu(acc + b[0])
        feats.append(jnp.max(acc, axis=1))
    feat = jnp.concatenate(feats, axis=1)
    logits = feat @ params["fc_w"] + params["fc_b"][0]
    return jax.nn.softmax(logits, axis=1)


def init_params(key, n_vocab, embed_dim, n_classes):
    ks = jax.random.split(key, 9)
    return {
        "embedding": jax.random.normal(ks[0], (n_vocab, embed_dim), jnp.float32) * 0.1,
        "w1": jax.random.normal(ks[1], (3, embed_dim, NUM_CHANNELS), jnp.float32) * 0.05,
        "b1": jax.random.normal(ks[2], (1, NUM_CHANNELS), jnp.float32) * 0.05,
        "w2": jax.random.normal(ks[3], (4, embed_dim, NUM_CHANNELS), jnp.float32) * 0.05,
        "b2": jax.random.normal(ks[4], (1, NUM_CHANNELS), jnp.float32) * 0.05,
        "w3": jax.random.normal(ks[5], (5, embed_dim, NUM_CHANNELS), jnp.float32) * 0.05,
        "b3": jax.random.normal(ks[6], (1, NUM_CHANNELS), jnp.float32) * 0.05,
        "fc_w": jax.random.normal(ks[7], (NUM_CHANNELS * 3, n_classes), jnp.float32) * 0.05,
        "fc_b": jax.random.normal(ks[8], (1, n_classes), jnp.float32) * 0.05,
    }


if __name__ == "__main__":
    key = jax.random.PRNGKey(0)
    k_tok, k_par = jax.random.split(key)

    B = 12                   # small demo batch; exercises padding + 2 grid blocks
    L = MAX_SEN_LEN          # 50; required by MaxPool1d(max_sen_len - k + 1)
    E = 32                   # embed_dim
    N_VOCAB = 200
    N_CLASSES = 4

    params = init_params(k_par, N_VOCAB, E, N_CLASSES)
    token_ids = jax.random.randint(k_tok, (B, L), 0, N_VOCAB, dtype=jnp.int32)

    out = jax.block_until_ready(textcnn_forward(token_ids, params, block_batch=8))
    ref = jax.block_until_ready(textcnn_reference(token_ids, params))

    assert out.shape == (B, N_CLASSES), out.shape
    # bf16 inputs with f32 accumulation: loosened tolerance vs. the f32 reference.
    assert jnp.allclose(out, ref, atol=5e-3, rtol=0.0), (out, ref)
    assert jnp.allclose(jnp.sum(out, axis=1), 1.0, atol=1e-3)
    print("KERNEL_OK")
</pallas_src>

<mosaic_0001>
module attributes {stable_mosaic.version = 11 : i64} {
  func.func @textcnn_kernel(%arg0: i32, %arg1: memref<8x56x32xbf16, #tpu.memory_space<vmem>>, %arg2: memref<160x384xbf16, #tpu.memory_space<vmem>>, %arg3: memref<1x384xf32, #tpu.memory_space<vmem>>, %arg4: memref<48x384xf32, #tpu.memory_space<vmem>>, %arg5: memref<384x128xbf16, #tpu.memory_space<vmem>>, %arg6: memref<1x128xf32, #tpu.memory_space<vmem>>, %arg7: memref<8x128xf32, #tpu.memory_space<vmem>>) attributes {dimension_semantics = [#tpu.dimension_semantics<parallel>], iteration_bounds = array<i64: 2>, scalar_prefetch = 0 : i64, scratch_operands = 0 : i64, tpu.core_type = #tpu.core_type<tc>, window_params = [{transform_indices = @transform_0, window_bounds = array<i64: 8, 56, 32>}, {pipeline_mode = #tpu.pipeline_mode<synchronous>, transform_indices = @transform_1, window_bounds = array<i64: 160, 384>}, {pipeline_mode = #tpu.pipeline_mode<synchronous>, transform_indices = @transform_2, window_bounds = array<i64: 1, 384>}, {pipeline_mode = #tpu.pipeline_mode<synchronous>, transform_indices = @transform_3, window_bounds = array<i64: 48, 384>}, {pipeline_mode = #tpu.pipeline_mode<synchronous>, transform_indices = @transform_4, window_bounds = array<i64: 384, 128>}, {pipeline_mode = #tpu.pipeline_mode<synchronous>, transform_indices = @transform_5, window_bounds = array<i64: 1, 128>}, {transform_indices = @transform_6, window_bounds = array<i64: 8, 128>}]} {
    %c0 = arith.constant 0 : index
    %c0_0 = arith.constant 0 : index
    %c0_1 = arith.constant 0 : index
    %0 = vector.load %arg1[%c0, %c0_0, %c0_1] : memref<8x56x32xbf16, #tpu.memory_space<vmem>>, vector<8x56x32xbf16>
    %1 = vector.extract_strided_slice %0 {offsets = [0, 0, 0], sizes = [8, 48, 32], strides = [1, 1, 1]} : vector<8x56x32xbf16> to vector<8x48x32xbf16>
    %2 = vector.extract_strided_slice %0 {offsets = [0, 1, 0], sizes = [8, 48, 32], strides = [1, 1, 1]} : vector<8x56x32xbf16> to vector<8x48x32xbf16>
    %3 = vector.extract_strided_slice %0 {offsets = [0, 2, 0], sizes = [8, 48, 32], strides = [1, 1, 1]} : vector<8x56x32xbf16> to vector<8x48x32xbf16>
    %4 = vector.extract_strided_slice %0 {offsets = [0, 3, 0], sizes = [8, 48, 32], strides = [1, 1, 1]} : vector<8x56x32xbf16> to vector<8x48x32xbf16>
    %5 = vector.extract_strided_slice %0 {offsets = [0, 4, 0], sizes = [8, 48, 32], strides = [1, 1, 1]} : vector<8x56x32xbf16> to vector<8x48x32xbf16>
    %6 = tpu.concatenate %1, %2, %3, %4, %5 in 2 : vector<8x48x32xbf16>, vector<8x48x32xbf16>, vector<8x48x32xbf16>, vector<8x48x32xbf16>, vector<8x48x32xbf16> -> vector<8x48x160xbf16>
    %7 = vector.shape_cast %6 : vector<8x48x160xbf16> to vector<384x160xbf16>
    %c0_2 = arith.constant 0 : index
    %c0_3 = arith.constant 0 : index
    %8 = vector.load %arg2[%c0_2, %c0_3] : memref<160x384xbf16, #tpu.memory_space<vmem>>, vector<160x384xbf16>
    %cst = arith.constant dense<0.000000e+00> : vector<384x384xf32>
    %9 = tpu.matmul %7, %8, %cst {dimension_numbers = #tpu.dot_dimension_numbers<[1], [0], [0], [1], [0, 0, 1, 1], [], []>} : vector<384x160xbf16>, vector<160x384xbf16>, vector<384x384xf32> -> vector<384x384xf32>
    %c0_4 = arith.constant 0 : index
    %c0_5 = arith.constant 0 : index
    %10 = vector.load %arg3[%c0_4, %c0_5] : memref<1x384xf32, #tpu.memory_space<vmem>>, vector<1x384xf32>
    %11 = vector.broadcast %10 : vector<1x384xf32> to vector<384x384xf32>
    %12 = arith.addf %9, %11 : vector<384x384xf32>
    %cst_6 = arith.constant 0.000000e+00 : f32
    %13 = vector.broadcast %cst_6 : f32 to vector<384x384xf32>
    %14 = arith.maximumf %12, %13 : vector<384x384xf32>
    %15 = vector.shape_cast %14 : vector<384x384xf32> to vector<8x48x384xf32>
    %c0_7 = arith.constant 0 : index
    %c0_8 = arith.constant 0 : index
    %16 = vector.load %arg4[%c0_7, %c0_8] : memref<48x384xf32, #tpu.memory_space<vmem>>, vector<48x384xf32>
    %17 = vector.shape_cast %16 : vector<48x384xf32> to vector<1x48x384xf32>
    %18 = vector.broadcast %17 : vector<1x48x384xf32> to vector<8x48x384xf32>
    %19 = arith.mulf %15, %18 : vector<8x48x384xf32>
    %cst_9 = arith.constant dense<0xFF800000> : vector<8x384xf32>
    %20 = vector.multi_reduction <maximumf>, %19, %cst_9 [1] : vector<8x48x384xf32> to vector<8x384xf32>
    %21 = arith.truncf %20 : vector<8x384xf32> to vector<8x384xbf16>
    %c0_10 = arith.constant 0 : index
    %c0_11 = arith.constant 0 : index
    %22 = vector.load %arg5[%c0_10, %c0_11] : memref<384x128xbf16, #tpu.memory_space<vmem>>, vector<384x128xbf16>
    %cst_12 = arith.constant dense<0.000000e+00> : vector<8x128xf32>
    %23 = tpu.matmul %21, %22, %cst_12 {dimension_numbers = #tpu.dot_dimension_numbers<[1], [0], [0], [1], [0, 0, 1, 1], [], []>} : vector<8x384xbf16>, vector<384x128xbf16>, vector<8x128xf32> -> vector<8x128xf32>
    %c0_13 = arith.constant 0 : index
    %c0_14 = arith.constant 0 : index
    %24 = vector.load %arg6[%c0_13, %c0_14] : memref<1x128xf32, #tpu.memory_space<vmem>>, vector<1x128xf32>
    %25 = vector.broadcast %24 : vector<1x128xf32> to vector<8x128xf32>
    %26 = arith.addf %23, %25 : vector<8x128xf32>
    %cst_15 = arith.constant dense<0xFF800000> : vector<8xf32>
    %27 = vector.multi_reduction <maximumf>, %26, %cst_15 [1] : vector<8x128xf32> to vector<8xf32>
    %28 = vector.shape_cast %27 : vector<8xf32> to vector<8x1xf32>
    %29 = vector.broadcast %28 : vector<8x1xf32> to vector<8x128xf32>
    %30 = arith.subf %26, %29 : vector<8x128xf32>
    %31 = math.exp %30 : vector<8x128xf32>
    %cst_16 = arith.constant dense<0.000000e+00> : vector<8xf32>
    %32 = vector.multi_reduction <add>, %31, %cst_16 [1] : vector<8x128xf32> to vector<8xf32>
    %33 = vector.shape_cast %32 : vector<8xf32> to vector<8x1xf32>
    %34 = vector.broadcast %33 : vector<8x1xf32> to vector<8x128xf32>
    %35 = arith.divf %31, %34 : vector<8x128xf32>
    %c0_17 = arith.constant 0 : index
    %c0_18 = arith.constant 0 : index
    %36 = vector.load %arg7[%c0_17, %c0_18] : memref<8x128xf32, #tpu.memory_space<vmem>>, vector<8x128xf32>
    tpu.vector_store %arg7[%c0_17, %c0_18], %35 {strides = array<i32>} : memref<8x128xf32, #tpu.memory_space<vmem>>, vector<8x128xf32>,
    return
  }
  func.func @transform_0(%arg0: i32) -> (i32, i32, i32) {
    %c0_i32 = arith.constant 0 : i32
    %c0_i32_0 = arith.constant 0 : i32
    %c0_i32_1 = arith.constant 0 : i32
    return %arg0, %c0_i32, %c0_i32_0 : i32, i32, i32
  }
  func.func @transform_1(%arg0: i32) -> (i32, i32) {
    %c0_i32 = arith.constant 0 : i32
    %c0_i32_0 = arith.constant 0 : i32
    %c0_i32_1 = arith.constant 0 : i32
    return %c0_i32, %c0_i32_0 : i32, i32
  }
  func.func @transform_2(%arg0: i32) -> (i32, i32) {
    %c0_i32 = arith.constant 0 : i32
    %c0_i32_0 = arith.constant 0 : i32
    %c0_i32_1 = arith.constant 0 : i32
    return %c0_i32, %c0_i32_0 : i32, i32
  }
  func.func @transform_3(%arg0: i32) -> (i32, i32) {
    %c0_i32 = arith.constant 0 : i32
    %c0_i32_0 = arith.constant 0 : i32
    %c0_i32_1 = arith.constant 0 : i32
    return %c0_i32, %c0_i32_0 : i32, i32
  }
  func.func @transform_4(%arg0: i32) -> (i32, i32) {
    %c0_i32 = arith.constant 0 : i32
    %c0_i32_0 = arith.constant 0 : i32
    %c0_i32_1 = arith.constant 0 : i32
    return %c0_i32, %c0_i32_0 : i32, i32
  }
  func.func @transform_5(%arg0: i32) -> (i32, i32) {
    %c0_i32 = arith.constant 0 : i32
    %c0_i32_0 = arith.constant 0 : i32
    %c0_i32_1 = arith.constant 0 : i32
    return %c0_i32, %c0_i32_0 : i32, i32
  }
  func.func @transform_6(%arg0: i32) -> (i32, i32) {
    %c0_i32 = arith.constant 0 : i32
    %c0_i32_0 = arith.constant 0 : i32
    return %arg0, %c0_i32 : i32, i32
  }
}

</mosaic_0001>

<bundles_post_ra>
// kernel: tpu_custom_call.1
= control target key start
LH: loop header
LB: loop body
LE: loop exit
PB: predicated region body
PF: predicated region fallthrough
CT: control target
= control target key end

     0   :  { %11 = vsyncpa [#allocation3], 0  ;;  %s6120_s0 = inlined_call_operand.vmem [shape: bf16[16,56,32], index: 0, kind: input, shape index: {}]   ;;  %s6121_s1 = inlined_call_operand.vmem [shape: bf16[160,384], index: 1, kind: input, shape index: {}]   ;;  %s6122_s2 = inlined_call_operand.vmem [shape: f32[1,384], index: 2, kind: input, shape index: {}]   ;;  %s6123_s3 = inlined_call_operand.vmem [shape: f32[48,384], index: 3, kind: input, shape index: {}]   ;;  %s6124_s4 = inlined_call_operand.vmem [shape: bf16[384,128], index: 4, kind: input, shape index: {}]   ;;  %s6125_s5 = inlined_call_operand.vmem [shape: f32[1,128], index: 5, kind: input, shape index: {}]   ;;  %s6126_s6 = inlined_call_operand.hbm [shape: f32[16,128], index: 6, kind: output, shape index: {}]  }
   0x1   :  { %13 = vsyncpa [#allocation3 + $0x1], 0  ;;  %s3970_s21 = smov 0   ;;  %s3972_s22 = smov 0  }
   0x2   :  { %s3974_s23 = smov 0   ;;  %s3976_s24 = smov 0  }
   0x3 LB: > { %s3309_s25 = sadd.s32 4294967295, %s3930_s24   ;;  %s3310_s26 = sadd.s32 4294967294, %s3930_s24   ;;  %s3930_s24 = sphi %s3976_s24, %s6369_s24   ;;  %s3926_s23 = sphi %s3974_s23, %s6368_s23   ;;  %s3922_s22 = sphi %s3972_s22, %s6367_s22   ;;  %s3918_s21 = sphi %s3970_s21, %s6366_s21  }
   0x4   : > { %s3993_s27 = sadd.s32 1, %s3930_s24   ;;  %s157_s28 = sadd.s32 1, %s3926_s23 }
   0x5   : > { %s154_s29 = ssub.s32 %s3930_s24, %s3993_s27  ;;  %p167_p0 = scmp.ne.s32.totalorder %s3926_s23, %s3922_s22 }
   0x6   : > { %p155_p1 = scmp.eq.s32.totalorder %s154_s29, 0  ;;  %p168_p2 = scmp.eq.s32.totalorder %s3309_s25, 1 }
   0x7   : > { %p173_p3 = scmp.ne.s32.totalorder %s3922_s22, %s3918_s21  ;;  %p174_p4 = scmp.eq.s32.totalorder %s3310_s26, 1 }
   0x8   : > { %s4003_s30 = scalar_select %p155_p1, %s3926_s23, %s157_s28  }
   0x9   : > { %p4005_p5 = por %p168_p2, %p167_p0  ;;  %p4009_p6 = por %p174_p4, %p173_p3 }
   0xa   : > { %p3313_p7 = scmp.ge.s32.totalorder %s3930_s24, 1  ;;  %p217_p8 = scmp.lt.s32.totalorder %s3930_s24, 3 }
   0xc   : > { %p218_p9 = pnand %p3313_p7, %p217_p8 }
   0xe   : > { %221 = sbr.rel (%p218_p9) target bundleno = 1266 (0x4f2), region = 44 }
  0x13   : > { %v3523_v0 = vld [vmem:[%s6121_s1 + $0xd8] sm:$0xf]  ;;  %v3757_v1 = vld [vmem:[%s6121_s1 + $0xe0] sm:$0xf0]  ;;  %v3756_v2 = vld [vmem:[%s6121_s1 + $0xdc] sm:$0xf] }
  0x14   : > { %v3524_v3 = vor.u32 %v3757_v1, %v3523_v0  ;;  %v3525_v4 = vld [vmem:[%s6121_s1 + $0xe4] sm:$0xf0]  ;;  %v3511_v5 = vld [vmem:[%s6121_s1 + $0xc0] sm:$0xf]  ;;  %v3754_v6 = vld [vmem:[%s6121_s1 + $0xc8] sm:$0xf0] }
  0x15   : > { %v4033_v7 = vor.u32 %v3756_v2, %v3525_v4  ;;  %v3753_v8 = vld [vmem:[%s6121_s1 + $0xc4] sm:$0xf]  ;;  %v3513_v9 = vld [vmem:[%s6121_s1 + $0xcc] sm:$0xf0]  ;;  %s4041_s10 = sshll.u32 %s3309_s25, 3  ;;  %v3512_v10 = vor.u32 %v3754_v6, %v3511_v5  ;;  %vm1019_vm0 = vcmask 1045504  }
  0x16   : > { %1662 = vmatpush.bf16.msra.mxu1 %v3524_v3  ;;  %3783 = vmatpush.bf16.msra.mxu2 %v3524_v3  ;;  %p249_p10 = scmp.lt.s32.totalorder %s4041_s10, 15  ;;  %v4045_v11 = vor.u32 %v3753_v8, %v3513_v9  ;;  %vm1076_vm1 = vcmask 261120   ;;  %vm456_vm2 = vsmask.f32 7424  ;;  %vm834_vm3 = vsmask.f32 6400  ;;  %s3246_s28 = scalar_lea.hbm %s6126_s6, %s4041_s10 }
  0x17   : > { %3785 = vmatpush.bf16.msra.mxu3 %v4033_v7  ;;  %s3932_s15 = smov 32   ;;  %s3933_s16 = smov 96   ;;  %vm729_vm4 = vcmask 1046528   ;;  %vm1125_vm5 = vcmask 523264   ;;  %vm1174_vm6 = vcmask 785408   ;;  %vm2995_vm7 = vcmask 1041409  }
  0x18   : > { %s250_s11 = scalar_select %p249_p10, %s4041_s10, 15  ;;  %vm2997_vm8 = vcmask 1042434   ;;  %vm2999_vm9 = vcmask 1043459   ;;  %vm3001_vm10 = vcmask 1044484   ;;  %vm3003_vm11 = vcmask 1045509  }
  0x19   : > { %s3934_s17 = smov 64   ;;  %vm3005_vm12 = vcmask 1046534   ;;  %vm3007_vm13 = vcmask 1047559   ;;  %s245_s18 = sand.u32 1, %s3922_s22  }
  0x1a   : > { %1663 = vmatpush.bf16.msra.mxu1 %v3512_v10  ;;  %3784 = vmatpush.bf16.msra.mxu2 %v3512_v10  ;;  %s3787_s12 = smul.u32 28, %s250_s11  ;;  %s3314_s19 = sshll.u32 %s245_s18, 3 }
  0x1b   : > { %3786 = vmatpush.bf16.msra.mxu3 %v4045_v11  ;;  %s247_s29 = scalar_lea.vmem [#allocation2], %s3314_s19  ;;  %s3250_s11 = sshll.u32 %s3246_s28, 4  ;;  %s3251_s11 = int_to_ptr.hbm [resolvable:$true] %s3250_s11 }
  0x1c   : > { %s4052_s25 = scalar_lea.vmem %s6120_s0, %s3787_s12  ;;  %s3248_s9 = sshll.u32 %s247_s29, 4  ;;  %s3249_s9 = int_to_ptr.vmem [resolvable:$true] %s3248_s9 }
  0x1d   : > { %v4055_v12 = vld [vmem:[%s4052_s25] sm:$0xff]  ;;  %v4058_v13 = vld [vmem:[%s4052_s25 + $0x8] sm:$0xff]  ;;  %v262_v44 = vld [vmem:[%s4052_s25 + $0x18] sm:$0xf]  ;;  %s3888_s13 = scalar_lea.hbm %s6126_s6, 16 }
  0x1e   : > { %v4061_v14 = vld [vmem:[%s4052_s25 + $0x5c] sm:$0xff]  ;;  %v4064_v15 = vld [vmem:[%s4052_s25 + $0x64] sm:$0xff]  ;;  %v1020_v18 = vrot.slane %v4055_v12, 2  ;;  %v1021_v19 = vrot.slane %v4058_v13, 2  ;;  %v458_v24 = vshrl.u32 %v4055_v12, 16  ;;  %v460_v25 = vshll.u32 %v4055_v12, 16 }
  0x1f   : > { %v4067_v16 = vld [vmem:[%s4052_s25 + $0x80] sm:$0xff]  ;;  %v290_v17 = vld [vmem:[%s4052_s25 + $0x88] sm:$0xf]  ;;  %v6128_v20 = vrot.slane %v4061_v14, 2  ;;  %v1044_v22 = vrot.slane %v4064_v15, 2  ;;  %v465_v28 = vshll.u32 %v4058_v13, 16  ;;  %v440_v52 = vunpack.c.l.b16 %v262_v44 }
  0x20   : > { %v444_v21 = vunpack.c.l.b16 %v290_v17  ;;  %v1051_v23 = vrot.slane %v4067_v16, 2  ;;  %v4078_v26 = vsel %vm1019_vm0, %v1020_v18, %v1021_v19  ;;  %v469_v29 = vshrl.u32 %v4058_v13, 16  ;;  %v283_v34 = vld [vmem:[%s4052_s25 + $0x6c] sm:$0xf]  ;;  %v4107_v46 = vld [vmem:[%s4052_s25 + $0x10] sm:$0xff] }
  0x21   : > { %6171 = vst [vmem:[#allocation5_spill] sm:$0xff] %v4078_v26  ;;  %3533 = vmatmul.msk.bf16.vlgmr.msra.gmra.mxu1 %vm1076_vm1, %v4078_v26  ;;  %v4091_v30 = vsel %vm1019_vm0, %v6128_v20, %v1044_v22  ;;  %v462_v31 = vrot.slane %v460_v25, 1  ;;  %v835_v32 = vrot.slane %v458_v24, 1  ;;  %v836_v33 = vrot.slane %v460_v25, 2  ;;  %v3720_v59 = vld [vmem:[%s4052_s25 + $0x8c] sm:$0xff]  ;;  %v3721_v60 = vld [vmem:[%s4052_s25 + $0x94] sm:$0xff] }
  0x22   : > { %v4080_v27 = vpack.c.b16 %v444_v21, %v444_v21  ;;  %3567 = vmatmul.msk.bf16.vlgmr.msra.gmra.mxu3 %vm1076_vm1, %v4091_v30  ;;  %v467_v36 = vrot.slane %v465_v28, 1  ;;  %v838_v37 = vrot.slane %v469_v29, 1  ;;  %v839_v38 = vrot.slane %v465_v28, 2  ;;  %v4151_v25 = vld [vmem:[%s4052_s25 + $0x24] sm:$0xff] }
  0x23   : > { %v463_v39 = vor.u32 %v462_v31, %v458_v24  ;;  %v837_v40 = vor.u32 %v836_v33, %v835_v32  ;;  %v443_v43 = vunpack.c.l.b16 %v283_v34  ;;  %v730_v48 = vrot.slane %v4055_v12, 1  ;;  %v4148_v24 = vld [vmem:[%s4052_s25 + $0x1c] sm:$0xff]  ;;  %v4161_v33 = vld [vmem:[%s4052_s25 + $0x70] sm:$0xff] }
  0x24   : > { %v1053_v35 = vrot.slane %v4080_v27, 2  ;;  %v840_v42 = vor.u32 %v839_v38, %v838_v37  ;;  %v731_v49 = vrot.slane %v4058_v13, 1  ;;  %v473_v51 = vshll.u32 %v4107_v46, 16  ;;  %v4164_v34 = vld [vmem:[%s4052_s25 + $0x78] sm:$0xff] }
  0x25   : > { %v468_v45 = vsel %vm456_vm2, %v463_v39, %v467_v36  ;;  %v4114_v50 = vpack.c.b16 %v443_v43, %v443_v43  ;;  %v471_v53 = vor.u32 %v469_v29, %v467_v36  ;;  %v733_v54 = vrot.slane %v4107_v46, 1 }
  0x26   : > { %v4100_v41 = vsel %vm1019_vm0, %v1051_v23, %v1053_v35  ;;  %681 = vrot.lane.b32.xlu0 %v468_v45, %s3932_s15  ;;  %v841_v47 = vsel %vm834_vm3, %v837_v40, %v840_v42  ;;  %v475_v55 = vrot.slane %v473_v51, 1  ;;  %v448_v56 = vpack.c.b16 %v440_v52, %v440_v52 }
  0x27   : > { %6172 = vst [vmem:[#allocation6_spill] sm:$0xff] %v4100_v41  ;;  %3547 = vmatmul.msk.bf16.vlgmr.msra.gmra.mxu2 %vm1076_vm1, %v4100_v41  ;;  %971 = vrot.lane.b32.xlu1 %v841_v47, %s3933_s16  ;;  %v477_v57 = vshrl.u32 %v4107_v46, 16  ;;  %v1023_v58 = vrot.slane %v4107_v46, 2  ;;  %v734_v61 = vsel %vm729_vm4, %v731_v49, %v733_v54  ;;  %v843_v62 = vrot.slane %v473_v51, 2 }
  0x28   : > { %v732_v63 = vsel %vm729_vm4, %v730_v48, %v731_v49  ;;  %v1046_v0 = vrot.slane %v4114_v50, 2  ;;  %788 = vrot.lane.b32.xlu2 %v734_v61, %s3934_s17  ;;  %v481_v1 = vshll.u32 %v448_v56, 16  ;;  %v476_v2 = vsel %vm456_vm2, %v471_v53, %v475_v55 }
  0x29   : > { %v842_v3 = vrot.slane %v477_v57, 1  ;;  %v4129_v4 = vsel %vm1019_vm0, %v1021_v19, %v1023_v58  ;;  %v1055_v5 = vrot.slane %v3720_v59, 2  ;;  %v1056_v6 = vrot.slane %v3721_v60, 2 }
  0x2a   : > { %6173 = vst [vmem:[#allocation7_spill] sm:$0xff] %v4129_v4  ;;  %v4134_v9 = vsel %vm1019_vm0, %v1044_v22, %v1046_v0  ;;  %v479_v10 = vor.u32 %v477_v57, %v475_v55  ;;  %v483_v17 = vrot.slane %v481_v1, 1  ;;  %v735_v18 = vrot.slane %v448_v56, 1  ;;  %v297_v57 = vld [vmem:[%s4052_s25 + $0xa4] sm:$0xf] }
  0x2b   : > { %v844_v8 = vor.u32 %v843_v62, %v842_v3  ;;  %v4143_v19 = vsel %vm1019_vm0, %v1055_v5, %v1056_v6  ;;  %v486_v29 = vshrl.u32 %v4148_v24, 16  ;;  %v488_v31 = vshll.u32 %v4148_v24, 16  ;;  %v3531_v62 = vld [vmem:[%s6121_s1 + $0xe0] sm:$0xf] }
  0x2c   : > { %6174 = vst [vmem:[#allocation8_spill] sm:$0xff] %v4143_v19  ;;  %v484_v22 = vsel %vm456_vm2, %v479_v10, %v483_v17  ;;  %v736_v28 = vsel %vm729_vm4, %v733_v54, %v735_v18  ;;  %v493_v32 = vshll.u32 %v4151_v25, 16  ;;  %v737_v37 = vrot.slane %v4148_v24, 1 }
  0x2d   : > { %v845_v21 = vsel %vm834_vm3, %v840_v42, %v844_v8  ;;  %v490_v35 = vrot.slane %v488_v31, 1  ;;  %v738_v38 = vrot.slane %v4151_v25, 1  ;;  %v1025_v40 = vrot.slane %v448_v56, 2  ;;  %v4170_v42 = vld [vmem:[%s4052_s25 + $0x9c] sm:$0xff] }
  0x2e   : > { %786 = vrot.lane.b32.xlu0 %v732_v63, %s3934_s17  ;;  %v495_v36 = vrot.slane %v493_v32, 1  ;;  %v1048_v43 = vrot.slane %v4161_v33, 2  ;;  %v1049_v44 = vrot.slane %v4164_v34, 2  ;;  %v1058_v49 = vrot.slane %v4170_v42, 2 }
  0x2f   : > { %683 = vrot.lane.b32.xlu1 %v476_v2, %s3932_s15  ;;  %v491_v39 = vor.u32 %v490_v35, %v486_v29  ;;  %v739_v47 = vsel %vm729_vm4, %v737_v37, %v738_v38  ;;  %v4177_v48 = vsel %vm1019_vm0, %v1023_v58, %v1025_v40  ;;  %v846_v52 = vshrl.u32 %v448_v56, 16  ;;  %v4194_v58 = vld [vmem:[%s4052_s25 + $0x2c] sm:$0xff] }
  0x30   : > { %973 = vrot.lane.b32.xlu2 %v845_v21, %s3933_s16  ;;  %6175 = vst [vmem:[#allocation9_spill] sm:$0xff] %v4177_v48  ;;  %v4182_v51 = vsel %vm1019_vm0, %v1048_v43, %v1049_v44  ;;  %v4190_v53 = vsel %vm1019_vm0, %v1056_v6, %v1058_v49  ;;  %v849_v55 = vrot.slane %v481_v1, 2  ;;  %v497_v56 = vshrl.u32 %v4151_v25, 16  ;;  %v3758_v1 = vld [vmem:[%s6121_s1 + $0xe8] sm:$0xf0] }
  0x31   : > { %3534 = vmatmul.msk.bf16.gmra.mxu1 %vm1076_vm1, %v4129_v4  ;;  %v496_v45 = vsel %vm456_vm2, %v491_v39, %v495_v36  ;;  %6176 = vst [vmem:[#allocation10_spill] sm:$0xff] %v4182_v51  ;;  %v848_v54 = vrot.slane %v846_v52, 1  ;;  %v501_v60 = vshll.u32 %v4194_v58, 16  ;;  %v740_v61 = vrot.slane %v4194_v58, 1  ;;  %v269_v21 = vld [vmem:[%s4052_s25 + $0x34] sm:$0xf] }
  0x32   : > { %3568 = vmatmul.msk.bf16.gmra.mxu3 %vm1076_vm1, %v4134_v9  ;;  %6177 = vst [vmem:[#allocation11_spill] sm:$0xff] %v4190_v53  ;;  %v445_v63 = vunpack.c.l.b16 %v297_v57  ;;  %v499_v2 = vor.u32 %v497_v56, %v495_v36  ;;  %v3532_v6 = vor.u32 %v3758_v1, %v3531_v62  ;;  %v1027_v17 = vrot.slane %v4148_v24, 2 }
  0x33   : > { %v850_v59 = vor.u32 %v849_v55, %v848_v54  ;;  %v503_v3 = vrot.slane %v501_v60, 1  ;;  %v741_v5 = vsel %vm729_vm4, %v738_v38, %v740_v61  ;;  %v4225_v35 = vsel %vm1019_vm0, %v1049_v44, %v1051_v23  ;;  %v3507_v23 = vld [vmem:[%s6121_s1 + $0xb0] sm:$0xf]  ;;  %v3752_v44 = vld [vmem:[%s6121_s1 + $0xb8] sm:$0xf0] }
  0x34   : > { %2178 = vmatpush.bf16.msrb.mxu3 %v3532_v6  ;;  %v4214_v18 = vpack.c.b16 %v445_v63, %v445_v63  ;;  %6179 = vst [vmem:[#allocation13_spill] sm:$0xff] %v4225_v35  ;;  %v441_v36 = vunpack.c.l.b16 %v269_v21  ;;  %v852_v38 = vrot.slane %v486_v29, 1  ;;  %v853_v39 = vrot.slane %v488_v31, 2  ;;  %v4256_v63 = vld [vmem:[%s4052_s25 + $0xa8] sm:$0xff]  ;;  %v4281_v21 = vld [vmem:[%s4052_s25 + $0x38] sm:$0xff] }
  0x35   : > { %v851_v0 = vsel %vm834_vm3, %v844_v8, %v850_v59  ;;  %v504_v10 = vsel %vm456_vm2, %v499_v2, %v503_v3  ;;  %v1028_v8 = vrot.slane %v4151_v25, 2  ;;  %v855_v40 = vrot.slane %v497_v56, 1 }
  0x36   : > { %685 = vrot.lane.b32.xlu0 %v484_v22, %s3932_s15  ;;  %v4234_v43 = vpack.c.b16 %v441_v36, %v441_v36  ;;  %v505_v31 = vshrl.u32 %v4194_v58, 16  ;;  %v1030_v62 = vrot.slane %v4194_v58, 2  ;;  %v1062_v2 = vrot.slane %v4256_v63, 2 }
  0x37   : > { %3548 = vmatmul.msk.bf16.gmra.mxu2 %vm1076_vm1, %v4143_v19  ;;  %790 = vrot.lane.b32.xlu1 %v736_v28, %s3934_s17  ;;  %v4219_v22 = vsel %vm1019_vm0, %v1027_v17, %v1028_v8  ;;  %v1060_v28 = vrot.slane %v4214_v18, 2 }
  0x38   : > { %975 = vrot.lane.b32.xlu2 %v851_v0, %s3933_s16  ;;  %6178 = vst [vmem:[#allocation12_spill] sm:$0xff] %v4219_v22  ;;  %v742_v52 = vrot.slane %v4234_v43, 1  ;;  %v507_v55 = vor.u32 %v505_v31, %v503_v3  ;;  %v4259_v0 = vld [vmem:[%s4052_s25 + $0xb0] sm:$0xff]  ;;  %v4263_v1 = vsel %vm1019_vm0, %v1028_v8, %v1030_v62  ;;  %v3499_v3 = vld [vmem:[%s6121_s1 + $0xa8] sm:$0xf]  ;;  %v859_v17 = vrot.slane %v505_v31, 1 }
  0x39   : > { %v4232_v37 = vsel %vm1019_vm0, %v1058_v49, %v1060_v28  ;;  %v509_v49 = vshll.u32 %v4234_v43, 16  ;;  %6181 = vst [vmem:[#allocation15_spill] sm:$0xff] %v4263_v1  ;;  %v860_v8 = vrot.slane %v501_v60, 2  ;;  %v4284_v28 = vld [vmem:[%s4052_s25 + $0x40] sm:$0xff]  ;;  %v3475_v60 = vld [vmem:[%s6121_s1 + $0x78] sm:$0xf] }
  0x3a   : > { %6180 = vst [vmem:[#allocation14_spill] sm:$0xff] %v4232_v37  ;;  %v743_v59 = vsel %vm729_vm4, %v740_v61, %v742_v52  ;;  %v1063_v61 = vrot.slane %v4259_v0, 2  ;;  %v521_v31 = vshll.u32 %v4284_v28, 16  ;;  %v745_v52 = vrot.slane %v4284_v28, 1 }
  0x3b   : > { %v511_v57 = vrot.slane %v509_v49, 1  ;;  %v861_v36 = vor.u32 %v860_v8, %v859_v17  ;;  %v3725_v17 = vld [vmem:[%s4052_s25 + $0xb8] sm:$0xff] }
  0x3c   : > { %v4278_v6 = vsel %vm1019_vm0, %v1062_v2, %v1063_v61  ;;  %v3463_v2 = vld [vmem:[%s6121_s1 + $0x60] sm:$0xf] }
  0x3d   : > { %v512_v56 = vsel %vm456_vm2, %v507_v55, %v511_v57  ;;  %6182 = vst [vmem:[#allocation16_spill] sm:$0xff] %v4278_v6  ;;  %v3495_v55 = vld [vmem:[%s6121_s1 + $0x98] sm:$0xf]  ;;  %v3749_v57 = vld [vmem:[%s6121_s1 + $0xa0] sm:$0xf0] }
  0x3e   : > { %687 = vrot.lane.b32.xlu0 %v496_v45, %s3932_s15  ;;  %v856_v45 = vrot.slane %v493_v32, 2  ;;  %v3508_v32 = vor.u32 %v3752_v44, %v3507_v23  ;;  %v514_v23 = vshrl.u32 %v4281_v21, 16  ;;  %v516_v44 = vshll.u32 %v4281_v21, 16 }
  0x3f   : > { %792 = vrot.lane.b32.xlu1 %v739_v47, %s3934_s17  ;;  %v854_v47 = vor.u32 %v853_v39, %v852_v38  ;;  %v3487_v38 = vld [vmem:[%s6121_s1 + $0x90] sm:$0xf]  ;;  %v3748_v39 = vld [vmem:[%s6121_s1 + $0x98] sm:$0xf0] }
  0x40   : > { %v857_v29 = vor.u32 %v856_v45, %v855_v40  ;;  %2043 = vmatpush.bf16.msrb.mxu1 %v3508_v32  ;;  %v3488_v45 = vor.u32 %v3748_v39, %v3487_v38  ;;  %v744_v32 = vrot.slane %v4281_v21, 1 }
  0x41   : > { %3535 = vmatmul.msk.bf16.gmra.mxu1 %vm1076_vm1, %v4177_v48 }
  0x42   : > { %3569 = vmatmul.msk.bf16.gmra.mxu3 %vm1076_vm1, %v4182_v51  ;;  %v858_v54 = vsel %vm834_vm3, %v854_v47, %v857_v29  ;;  %v862_v40 = vsel %vm834_vm3, %v857_v29, %v861_v36  ;;  %v3745_v47 = vld [vmem:[%s6121_s1 + $0x80] sm:$0xf0] }
  0x43   : > { %977 = vrot.lane.b32.xlu2 %v858_v54, %s3933_s16  ;;  %v3476_v29 = vor.u32 %v3745_v47, %v3475_v60  ;;  %v518_v54 = vrot.slane %v516_v44, 1  ;;  %v3451_v47 = vld [vmem:[%s6121_s1 + $0x48] sm:$0xf] }
  0x45   : > { %v519_v8 = vor.u32 %v518_v54, %v514_v23 }
  0x46   : > { %689 = vrot.lane.b32.xlu0 %v504_v10, %s3932_s15 }
  0x47   : > { %3549 = vmatmul.msk.bf16.gmra.mxu2 %vm1076_vm1, %v4190_v53  ;;  %794 = vrot.lane.b32.xlu1 %v741_v5, %s3934_s17  ;;  %v3751_v5 = vld [vmem:[%s6121_s1 + $0xb0] sm:$0xf0] }
  0x48   : > { %v3500_v10 = vor.u32 %v3751_v5, %v3499_v3  ;;  %v3742_v3 = vld [vmem:[%s6121_s1 + $0x68] sm:$0xf0]  ;;  %v3496_v5 = vor.u32 %v3749_v57, %v3495_v55  ;;  %v866_v57 = vrot.slane %v509_v49, 2  ;;  %v525_v49 = vshrl.u32 %v4284_v28, 16 }
  0x49   : > { %v3464_v39 = vor.u32 %v3742_v3, %v3463_v2  ;;  %v3439_v3 = vld [vmem:[%s6121_s1 + $0x30] sm:$0xf] }
  0x4a   : > { %1527 = vmatpush.bf16.msra.mxu0 %v3500_v10  ;;  %v1032_v10 = vrot.slane %v4234_v43, 2  ;;  %2044 = vmatpush.bf16.msrb.mxu1 %v3496_v5  ;;  %v4360_v5 = vld [vmem:[%s4052_s25 + $0x48] sm:$0xff] }
  0x4b   : > { %979 = vrot.lane.b32.xlu2 %v862_v40, %s3933_s16  ;;  %v1065_v40 = vrot.slane %v3725_v17, 2  ;;  %v529_v17 = vshll.u32 %v4360_v5, 16 }
  0x4c   : > { %v4332_v60 = vsel %vm1019_vm0, %v1030_v62, %v1032_v10 }
  0x4d   : > { %6183 = vst [vmem:[#allocation17_spill] sm:$0xff] %v4332_v60  ;;  %v4346_v62 = vsel %vm1019_vm0, %v1063_v61, %v1065_v40  ;;  %v3736_v61 = vld [vmem:[%s6121_s1 + $0x38] sm:$0xf0] }
  0x4e   : > { %691 = vrot.lane.b32.xlu0 %v512_v56, %s3932_s15  ;;  %1528 = vmatpush.bf16.msra.mxu0 %v3488_v45  ;;  %v746_v56 = vsel %vm729_vm4, %v744_v32, %v745_v52  ;;  %v863_v45 = vshrl.u32 %v4234_v43, 16  ;;  %v3739_v32 = vld [vmem:[%s6121_s1 + $0x50] sm:$0xf0]  ;;  %6184 = vst [vmem:[#allocation18_spill] sm:$0xff] %v4346_v62  ;;  %v3440_v10 = vor.u32 %v3736_v61, %v3439_v3  ;;  %v276_v61 = vld [vmem:[%s4052_s25 + $0x50] sm:$0xf] }
  0x4f   : > { %796 = vrot.lane.b32.xlu1 %v743_v59, %s3934_s17  ;;  %v523_v59 = vrot.slane %v521_v31, 1  ;;  %v3452_v54 = vor.u32 %v3739_v32, %v3451_v47  ;;  %v1035_v47 = vrot.slane %v4284_v28, 2 }
  0x50   : > { %v865_v55 = vrot.slane %v863_v45, 1  ;;  %v3733_v45 = vld [vmem:[%s6121_s1 + $0x20] sm:$0xf0] }
  0x51   : > { %3536 = vmatmul.msk.bf16.gmra.mxu1 %vm1076_vm1, %v4219_v22  ;;  %v524_v38 = vsel %vm456_vm2, %v519_v8, %v523_v59  ;;  %v1034_v8 = vrot.slane %v4281_v21, 2 }
  0x52   : > { %3570 = vmatmul.msk.bf16.gmra.mxu3 %vm1076_vm1, %v4225_v35  ;;  %1529 = vmatpush.bf16.msra.mxu0 %v3476_v29  ;;  %v304_v29 = vld [vmem:[%s4052_s25 + $0xc0] sm:$0xf]  ;;  %v867_v2 = vor.u32 %v866_v57, %v865_v55 }
  0x53   : > { %v4391_v3 = vsel %vm1019_vm0, %v1034_v8, %v1035_v47  ;;  %v870_v8 = vrot.slane %v516_v44, 2 }
  0x54   : > { %v868_v43 = vsel %vm834_vm3, %v861_v36, %v867_v2  ;;  %v747_v36 = vrot.slane %v4360_v5, 1  ;;  %v3415_v2 = vld [vmem:[%s6121_s1] sm:$0xf]  ;;  %6185 = vst [vmem:[#allocation19_spill] sm:$0xff] %v4391_v3 }
  0x55   : > { %981 = vrot.lane.b32.xlu2 %v868_v43, %s3933_s16  ;;  %v442_v43 = vunpack.c.l.b16 %v276_v61  ;;  %v1037_v61 = vrot.slane %v4360_v5, 2 }
  0x56   : > { %693 = vrot.lane.b32.xlu0 %v524_v38, %s3932_s15  ;;  %1530 = vmatpush.bf16.msra.mxu0 %v3464_v39  ;;  %v3427_v39 = vld [vmem:[%s6121_s1 + $0x18] sm:$0xf]  ;;  %v748_v55 = vsel %vm729_vm4, %v745_v52, %v747_v36 }
  0x57   : > { %3550 = vmatmul.msk.bf16.gmra.mxu2 %vm1076_vm1, %v4232_v37  ;;  %798 = vrot.lane.b32.xlu1 %v746_v56, %s3934_s17  ;;  %v446_v56 = vunpack.c.l.b16 %v304_v29  ;;  %v3428_v32 = vor.u32 %v3733_v45, %v3427_v39  ;;  %v527_v29 = vor.u32 %v525_v49, %v523_v59  ;;  %v3730_v59 = vld [vmem:[%s6121_s1 + $0x8] sm:$0xf0]  ;;  %v869_v39 = vrot.slane %v514_v23, 1 }
  0x58   : > { %v3416_v52 = vor.u32 %v3730_v59, %v3415_v2  ;;  %v872_v45 = vrot.slane %v525_v49, 1  ;;  %v4417_v44 = vpack.c.b16 %v442_v43, %v442_v43  ;;  %v3477_v2 = vld [vmem:[%s6121_s1 + $0x84] sm:$0xf0]  ;;  %v533_v59 = vshrl.u32 %v4360_v5, 16 }
  0x59   : > { %v4367_v38 = vpack.c.b16 %v446_v56, %v446_v56  ;;  %v3726_v43 = vld [vmem:[%s4052_s25 + $0xc4] sm:$0xff] }
  0x5a   : > { %1531 = vmatpush.bf16.msra.mxu0 %v3452_v54  ;;  %v531_v54 = vrot.slane %v529_v17, 1 }
  0x5b   : > { %v1067_v56 = vrot.slane %v4367_v38, 2 }
  0x5c   : > { %v532_v57 = vsel %vm456_vm2, %v527_v29, %v531_v54 }
  0x5e   : > { %1532 = vmatpush.bf16.msra.mxu0 %v3440_v10  ;;  %695 = vrot.lane.b32.xlu0 %v532_v57, %s3932_s15  ;;  %v4397_v10 = vsel %vm1019_vm0, %v1065_v40, %v1067_v56  ;;  %v3501_v40 = vld [vmem:[%s6121_s1 + $0xb4] sm:$0xf0]  ;;  %v3747_v57 = vld [vmem:[%s6121_s1 + $0x94] sm:$0xf] }
  0x5f   : > { %800 = vrot.lane.b32.xlu1 %v748_v55, %s3934_s17  ;;  %6186 = vst [vmem:[#allocation20_spill] sm:$0xff] %v4397_v10  ;;  %v871_v55 = vor.u32 %v870_v8, %v869_v39  ;;  %v4438_v39 = vld [vmem:[%s4052_s25 + $0xcc] sm:$0xff] }
  0x61   : > { %3537 = vmatmul.msk.bf16.gmra.mxu1 %vm1076_vm1, %v4263_v1 }
  0x62   : > { %3571 = vmatmul.msk.bf16.gmra.mxu3 %vm1076_vm1, %v4100_v41  ;;  %1533 = vmatpush.bf16.msra.mxu0 %v3428_v32  ;;  %v3750_v32 = vld [vmem:[%s6121_s1 + $0xac] sm:$0xf] }
  0x63   : > { %v3504_v29 = vor.u32 %v3750_v32, %v3501_v40  ;;  %v749_v40 = vrot.slane %v4417_v44, 1 }
  0x65   : > { %1785 = vmatpush.bf16.msrb.mxu2 %v3504_v29  ;;  %v3483_v29 = vld [vmem:[%s6121_s1 + $0x80] sm:$0xf] }
  0x66   : > { %1534 = vmatpush.bf16.msra.mxu0 %v3416_v52  ;;  %v6129_v52 = vshll.u32 %v4417_v44, 16 }
  0x67   : > { %3551 = vmatmul.msk.bf16.gmra.mxu2 %vm1076_vm1, %v4278_v6 }
  0x68   : > { %v539_v32 = vrot.slane %v6129_v52, 1 }
  0x6a   : > { %1920 = vmatpush.bf16.msrb.mxu0 %v4033_v7  ;;  %v873_v7 = vrot.slane %v521_v31, 2  ;;  %v3489_v31 = vld [vmem:[%s6121_s1 + $0x9c] sm:$0xf0] }
  0x6b   : > { %v3492_v56 = vor.u32 %v3747_v57, %v3489_v31  ;;  %v1069_v57 = vrot.slane %v3726_v43, 2  ;;  %v1070_v31 = vrot.slane %v4438_v39, 2  ;;  %v876_v43 = vrot.slane %v533_v59, 1 }
  0x6c   : > { %v874_v23 = vor.u32 %v873_v7, %v872_v45  ;;  %v535_v45 = vor.u32 %v533_v59, %v531_v54  ;;  %v4453_v54 = vsel %vm1019_vm0, %v1035_v47, %v1037_v61 }
  0x6d   : > { %1786 = vmatpush.bf16.msrb.mxu2 %v3492_v56  ;;  %6187 = vst [vmem:[#allocation21_spill] sm:$0xff] %v4453_v54  ;;  %v4470_v47 = vsel %vm1019_vm0, %v1069_v57, %v1070_v31 }
  0x6e   : > { %1921 = vmatpush.bf16.msrb.mxu0 %v4045_v11  ;;  %v875_v49 = vsel %vm834_vm3, %v871_v55, %v874_v23  ;;  %v3744_v11 = vld [vmem:[%s6121_s1 + $0x7c] sm:$0xf]  ;;  %v540_v7 = vsel %vm456_vm2, %v535_v45, %v539_v32  ;;  %v3746_v55 = vld [vmem:[%s6121_s1 + $0x88] sm:$0xf0]  ;;  %6188 = vst [vmem:[#allocation22_spill] sm:$0xff] %v4470_v47 }
  0x6f   : > { %983 = vrot.lane.b32.xlu2 %v875_v49, %s3933_s16  ;;  %v3480_v8 = vor.u32 %v3744_v11, %v3477_v2  ;;  %697 = vrot.lane.b32.xlu0 %v540_v7, %s3932_s15  ;;  %v750_v49 = vsel %vm729_vm4, %v747_v36, %v749_v40  ;;  %v3484_v56 = vor.u32 %v3746_v55, %v3483_v29  ;;  %v3741_v11 = vld [vmem:[%s6121_s1 + $0x64] sm:$0xf]  ;;  %v3465_v2 = vld [vmem:[%s6121_s1 + $0x6c] sm:$0xf0] }
  0x70   : > { %802 = vrot.lane.b32.xlu1 %v750_v49, %s3934_s17  ;;  %v3468_v36 = vor.u32 %v3741_v11, %v3465_v2  ;;  %v3738_v45 = vld [vmem:[%s6121_s1 + $0x4c] sm:$0xf]  ;;  %v3453_v32 = vld [vmem:[%s6121_s1 + $0x54] sm:$0xf0]  ;;  %v3735_v55 = vld [vmem:[%s6121_s1 + $0x34] sm:$0xf] }
  0x71   : > { %3538 = vmatmul.msk.bf16.gmra.mxu1 %vm1076_vm1, %v4332_v60  ;;  %1787 = vmatpush.bf16.msrb.mxu2 %v3480_v8  ;;  %v877_v8 = vrot.slane %v529_v17, 2  ;;  %v4481_v40 = vld [vmem:[%s4052_s25 + $0x54] sm:$0xff]  ;;  %v3456_v7 = vor.u32 %v3738_v45, %v3453_v32  ;;  %v3441_v49 = vld [vmem:[%s6121_s1 + $0x3c] sm:$0xf0]  ;;  %v3732_v11 = vld [vmem:[%s6121_s1 + $0x1c] sm:$0xf] }
  0x72   : > { %3572 = vmatmul.msk.bf16.gmra.mxu3 %vm1076_vm1, %v4143_v19  ;;  %2045 = vmatpush.bf16.msrb.mxu1 %v3484_v56  ;;  %v6127_v17 = vshll.u32 %v4481_v40, 16  ;;  %v3444_v56 = vor.u32 %v3735_v55, %v3441_v49  ;;  %v6131_v2 = vshrl.u32 %v4481_v40, 16  ;;  %v4506_v45 = vld [vmem:[%s4052_s25 + $0xd4] sm:$0xff]  ;;  %v751_v55 = vrot.slane %v4481_v40, 1 }
  0x73   : > { %v878_v29 = vor.u32 %v877_v8, %v876_v43  ;;  %v6130_v43 = vshll.u32 %v4061_v14, 16  ;;  %v1039_v8 = vrot.slane %v4417_v44, 2  ;;  %v752_v49 = vrot.slane %v4061_v14, 1 }
  0x75   : > { %1788 = vmatpush.bf16.msrb.mxu2 %v3468_v36  ;;  %v879_v59 = vsel %vm834_vm3, %v874_v23, %v878_v29  ;;  %v3429_v23 = vld [vmem:[%s6121_s1 + $0x24] sm:$0xf0]  ;;  %v546_v36 = vrot.slane %v6127_v17, 1  ;;  %v753_v20 = vsel %vm729_vm4, %v751_v55, %v752_v49 }
  0x76   : > { %v3432_v32 = vor.u32 %v3732_v11, %v3429_v23  ;;  %v1072_v11 = vrot.slane %v4506_v45, 2 }
  0x77   : > { %3552 = vmatmul.msk.bf16.gmra.mxu2 %vm1076_vm1, %v4346_v62  ;;  %985 = vrot.lane.b32.xlu2 %v879_v59, %s3933_s16  ;;  %v551_v59 = vrot.slane %v6130_v43, 1 }
  0x78   : > { %804 = vrot.lane.b32.xlu1 %v753_v20, %s3934_s17  ;;  %v4544_v55 = vsel %vm1019_vm0, %v1070_v31, %v1072_v11 }
  0x79   : > { %1789 = vmatpush.bf16.msrb.mxu2 %v3456_v7  ;;  %v547_v7 = vor.u32 %v546_v36, %v6131_v2  ;;  %v3729_v36 = vld [vmem:[%s6121_s1 + $0x4] sm:$0xf]  ;;  %6189 = vst [vmem:[#allocation23_spill] sm:$0xff] %v4544_v55  ;;  %v754_v2 = vrot.slane %v4064_v15, 1 }
  0x7b   : > { %v552_v17 = vsel %vm456_vm2, %v547_v7, %v551_v59  ;;  %v3417_v7 = vld [vmem:[%s6121_s1 + $0xc] sm:$0xf0] }
  0x7c   : > { %699 = vrot.lane.b32.xlu0 %v552_v17, %s3932_s15  ;;  %v3420_v45 = vor.u32 %v3729_v36, %v3417_v7  ;;  %v6190_v36 = vshll.u32 %v4417_v44, 16 }
  0x7d   : > { %1790 = vmatpush.bf16.msrb.mxu2 %v3444_v56  ;;  %v4519_v56 = vsel %vm1019_vm0, %v1037_v61, %v1039_v8 }
  0x7e   : > { %v883_v7 = vrot.slane %v6190_v36, 2 }
  0x81   : > { %3539 = vmatmul.msk.bf16.gmra.mxu1 %vm1076_vm1, %v4391_v3  ;;  %1791 = vmatpush.bf16.msrb.mxu2 %v3432_v32  ;;  %v880_v32 = vshrl.u32 %v4417_v44, 16  ;;  %v3471_v44 = vld [vmem:[%s6121_s1 + $0x68] sm:$0xf] }
  0x82   : > { %3573 = vmatmul.msk.bf16.gmra.mxu3 %vm1076_vm1, %v4190_v53 }
  0x85   : > { %1792 = vmatpush.bf16.msrb.mxu2 %v3420_v45 }
  0x87   : > { %3553 = vmatmul.msk.bf16.gmra.mxu2 %vm1076_vm1, %v4397_v10 }
  0x91   : > { %3540 = vmatmul.msk.bf16.gmra.mxu1 %vm1076_vm1, %v4453_v54 }
  0x92   : > { %3574 = vmatmul.msk.bf16.gmra.mxu3 %vm1076_vm1, %v4232_v37 }
  0x97   : > { %3554 = vmatmul.msk.bf16.gmra.mxu2 %vm1076_vm1, %v4470_v47 }
  0x98   : > { %v682_v57 = vpop.permute.xlu0 %681 }
  0x99   : > { %v972_v23 = vpop.permute.xlu1 %971  ;;  %v1078_v61 = vsel %vm1076_vm1, %v4055_v12, %v682_v57  ;;  %v311_v12 = vld [vmem:[%s4052_s25 + $0xdc] sm:$0xf]  ;;  %v882_v57 = vrot.slane %v880_v32, 1  ;;  %v3743_v32 = vld [vmem:[%s6121_s1 + $0x70] sm:$0xf0] }
  0x9e   : > { %v4516_v52 = vpop.f32.mrf.mxu1 }
  0xa0   : > { %v787_v8 = vpop.permute.xlu0 %786 }
  0xa1   : > { %v1127_v17 = vsel %vm1125_vm5, %v1078_v61, %v787_v8  ;;  %3541 = vmatmul.msk.bf16.gmra.mxu1 %vm1076_vm1, %v4519_v56  ;;  %v884_v61 = vor.u32 %v883_v7, %v882_v57  ;;  %v789_v8 = vpop.permute.xlu2 %788  ;;  %v553_v57 = vshrl.u32 %v4061_v14, 16  ;;  %v684_v36 = vpop.permute.xlu1 %683 }
  0xa2   : > { %3575 = vmatmul.msk.bf16.gmra.mxu3 %vm1076_vm1, %v4278_v6  ;;  %v4539_v20 = vsel %vm1174_vm6, %v1127_v17, %v972_v23  ;;  %v447_v17 = vunpack.c.l.b16 %v311_v12  ;;  %v557_v12 = vshll.u32 %v4064_v15, 16 }
  0xa3   : > { %1535 = vmatmul.bf16.vlgmr.msra.gmra.mxu0 %v4539_v20  ;;  %v885_v31 = vsel %vm834_vm3, %v878_v29, %v884_v61  ;;  %v3472_v29 = vor.u32 %v3743_v32, %v3471_v44  ;;  %v1041_v61 = vrot.slane %v4481_v40, 2 }
  0xa4   : > { %987 = vrot.lane.b32.xlu2 %v885_v31, %s3933_s16  ;;  %v4568_v7 = vpack.c.b16 %v447_v17, %v447_v17  ;;  %v555_v31 = vor.u32 %v553_v57, %v551_v59  ;;  %v559_v43 = vrot.slane %v557_v12, 1  ;;  %v755_v17 = vsel %vm729_vm4, %v752_v49, %v754_v2 }
  0xa5   : > { %v4552_v23 = vpop.f32.mrf.mxu3  ;;  %2046 = vmatpush.bf16.msrb.mxu1 %v3472_v29  ;;  %v6194_v59 = vrot.slane %v4061_v14, 2  ;;  %806 = vrot.lane.b32.xlu1 %v755_v17, %s3934_s17  ;;  %v6198_v17 = vshll.u32 %v4481_v40, 16 }
  0xa6   : > { %6191 = vst [vmem:[#allocation24_spill] sm:$0xff] %v4552_v23  ;;  %v4554_v39 = vpop.f32.mrf.mxu1  ;;  %v1080_v23 = vsel %vm1076_vm1, %v4058_v13, %v684_v36  ;;  %v560_v6 = vsel %vm456_vm2, %v555_v31, %v559_v43 }
  0xa7   : > { %3555 = vmatmul.msk.bf16.gmra.mxu2 %vm1076_vm1, %v4544_v55  ;;  %701 = vrot.lane.b32.xlu0 %v560_v6, %s3932_s15  ;;  %v4585_v32 = vsel %vm1019_vm0, %v1041_v61, %v6194_v59  ;;  %v1129_v36 = vsel %vm1125_vm5, %v1080_v23, %v789_v8  ;;  %v6197_v61 = vshrl.u32 %v4481_v40, 16  ;;  %v887_v8 = vrot.slane %v6198_v17, 2 }
  0xa8   : > { %v889_v23 = vrot.slane %v553_v57, 1  ;;  %v6199_v59 = vshll.u32 %v4061_v14, 16  ;;  %v561_v57 = vshrl.u32 %v4064_v15, 16  ;;  %v565_v14 = vshll.u32 %v4114_v50, 16 }
  0xa9   : > { %v974_v13 = vpop.permute.xlu2 %973  ;;  %v886_v31 = vrot.slane %v6197_v61, 1  ;;  %v791_v17 = vpop.permute.xlu1 %790 }
  0xaa   : > { %v4558_v45 = vpop.f32.mrf.mxu2  ;;  %v4599_v49 = vsel %vm1174_vm6, %v1129_v36, %v974_v13 }
  0xab   : > { %6192 = vst [vmem:[#allocation25_spill] sm:$0xff] %v4558_v45  ;;  %v1074_v45 = vrot.slane %v4568_v7, 2 }
  0xad   : > { %v4575_v37 = vpop.f32.mrf.mxu3  ;;  %v4594_v6 = vsel %vm1019_vm0, %v1072_v11, %v1074_v45  ;;  %v888_v11 = vor.u32 %v887_v8, %v886_v31  ;;  %v563_v8 = vor.u32 %v561_v57, %v559_v43  ;;  %v3519_v43 = vld [vmem:[%s6121_s1 + $0xc8] sm:$0xf] }
  0xae   : > { %6193 = vst [vmem:[#allocation26_spill] sm:$0xff] %v4575_v37  ;;  %v4580_v44 = vpop.f32.mrf.mxu1  ;;  %v890_v37 = vrot.slane %v6199_v59, 2  ;;  %v567_v59 = vrot.slane %v565_v14, 1 }
  0xaf   : > { %6196 = vst [vmem:[#allocation28_spill] sm:$0xff] %v4594_v6 }
  0xb0   : > { %v891_v13 = vor.u32 %v890_v37, %v889_v23  ;;  %v756_v37 = vrot.slane %v4114_v50, 1  ;;  %v568_v23 = vsel %vm456_vm2, %v563_v8, %v567_v59  ;;  %v894_v8 = vrot.slane %v557_v12, 2 }
  0xb1   : > { %3542 = vmatmul.msk.bf16.gmra.mxu1 %vm1076_vm1, %v4585_v32  ;;  %703 = vrot.lane.b32.xlu0 %v568_v23, %s3932_s15  ;;  %v3740_v23 = vld [vmem:[%s6121_s1 + $0x58] sm:$0xf0] }
  0xb2   : > { %v4589_v29 = vpop.f32.mrf.mxu2  ;;  %3576 = vmatmul.msk.bf16.gmra.mxu3 %vm1076_vm1, %v4346_v62  ;;  %v686_v62 = vpop.permute.xlu0 %685  ;;  %v892_v61 = vsel %vm834_vm3, %v888_v11, %v891_v13  ;;  %v757_v15 = vsel %vm729_vm4, %v754_v2, %v756_v37  ;;  %v3459_v37 = vld [vmem:[%s6121_s1 + $0x50] sm:$0xf] }
  0xb3   : > { %6195 = vst [vmem:[#allocation27_spill] sm:$0xff] %v4589_v29  ;;  %1540 = vmatmul.bf16.gmra.mxu0 %v4599_v49  ;;  %989 = vrot.lane.b32.xlu2 %v892_v61, %s3933_s16  ;;  %v1082_v31 = vsel %vm1076_vm1, %v4107_v46, %v686_v62 }
  0xb4   : > { %v1131_v11 = vsel %vm1125_vm5, %v1082_v31, %v791_v17  ;;  %808 = vrot.lane.b32.xlu1 %v757_v15, %s3934_s17  ;;  %v3755_v31 = vld [vmem:[%s6121_s1 + $0xd0] sm:$0xf0]  ;;  %v893_v17 = vrot.slane %v561_v57, 1  ;;  %v3460_v57 = vor.u32 %v3740_v23, %v3459_v37  ;;  %v6136_v15 = vshll.u32 %v4161_v33, 16  ;;  %v793_v23 = vpop.permute.xlu1 %792 }
  0xb5   : > { %v4610_v45 = vpop.f32.mrf.mxu3  ;;  %v3520_v2 = vor.u32 %v3755_v31, %v3519_v43 }
  0xb6   : > { %6200 = vst [vmem:[#allocation29_spill] sm:$0xff] %v4610_v45  ;;  %v4612_v36 = vpop.f32.mrf.mxu1  ;;  %2047 = vmatpush.bf16.msrb.mxu1 %v3460_v57  ;;  %v759_v57 = vrot.slane %v4164_v34, 1 }
  0xb7   : > { %3556 = vmatmul.msk.bf16.gmra.mxu2 %vm1076_vm1, %v4594_v6  ;;  %2179 = vmatpush.bf16.msrb.mxu3 %v3520_v2  ;;  %v6138_v2 = vshrl.u32 %v4161_v33, 16 }
  0xba   : > { %v4615_v29 = vpop.f32.mrf.mxu2  ;;  %v688_v43 = vpop.permute.xlu0 %687 }
  0xbb   : > { %6201 = vst [vmem:[#allocation30_spill] sm:$0xff] %v4615_v29  ;;  %v976_v29 = vpop.permute.xlu2 %975  ;;  %v1084_v37 = vsel %vm1076_vm1, %v4148_v24, %v688_v43 }
  0xbc   : > { %v4635_v62 = vsel %vm1174_vm6, %v1131_v11, %v976_v29  ;;  %v895_v29 = vor.u32 %v894_v8, %v893_v17  ;;  %v574_v17 = vrot.slane %v6136_v15, 1  ;;  %v6137_v8 = vshll.u32 %v4164_v34, 16 }
  0xbd   : > { %v4624_v45 = vpop.f32.mrf.mxu3  ;;  %v1133_v15 = vsel %vm1125_vm5, %v1084_v37, %v793_v23  ;;  %v900_v37 = vrot.slane %v565_v14, 2 }
  0xbe   : > { %6202 = vst [vmem:[#allocation31_spill] sm:$0xff] %v4624_v45  ;;  %v4629_v61 = vpop.f32.mrf.mxu1  ;;  %v896_v12 = vsel %vm834_vm3, %v891_v13, %v895_v29  ;;  %v575_v13 = vor.u32 %v574_v17, %v6138_v2  ;;  %v758_v45 = vrot.slane %v4161_v33, 1 }
  0xbf   : > { %991 = vrot.lane.b32.xlu2 %v896_v12, %s3933_s16  ;;  %v579_v12 = vrot.slane %v6137_v8, 1 }
  0xc0   : > { %v760_v24 = vsel %vm729_vm4, %v758_v45, %v759_v57  ;;  %v3447_v45 = vld [vmem:[%s6121_s1 + $0x38] sm:$0xf] }
  0xc1   : > { %3543 = vmatmul.msk.bf16.gmra.mxu1 %vm1076_vm1, %v4091_v30  ;;  %810 = vrot.lane.b32.xlu1 %v760_v24, %s3934_s17 }
  0xc2   : > { %v4632_v46 = vpop.f32.mrf.mxu2  ;;  %3577 = vmatmul.msk.bf16.gmra.mxu3 %vm1076_vm1, %v4397_v10  ;;  %v580_v10 = vsel %vm456_vm2, %v575_v13, %v579_v12  ;;  %v897_v13 = vshrl.u32 %v4114_v50, 16 }
  0xc3   : > { %6203 = vst [vmem:[#allocation32_spill] sm:$0xff] %v4632_v46  ;;  %1545 = vmatmul.bf16.gmra.mxu0 %v4635_v62  ;;  %v978_v46 = vpop.permute.xlu2 %977  ;;  %705 = vrot.lane.b32.xlu0 %v580_v10, %s3932_s15 }
  0xc4   : > { %v4688_v8 = vsel %vm1174_vm6, %v1133_v15, %v978_v46  ;;  %v899_v10 = vrot.slane %v897_v13, 1  ;;  %v3737_v46 = vld [vmem:[%s6121_s1 + $0x40] sm:$0xf0]  ;;  %v690_v13 = vpop.permute.xlu0 %689 }
  0xc5   : > { %v4649_v59 = vpop.f32.mrf.mxu3  ;;  %v3448_v23 = vor.u32 %v3737_v46, %v3447_v45  ;;  %v585_v45 = vshll.u32 %v4067_v16, 16 }
  0xc6   : > { %6204 = vst [vmem:[#allocation33_spill] sm:$0xff] %v4649_v59  ;;  %v4657_v11 = vpop.f32.mrf.mxu1  ;;  %v901_v15 = vor.u32 %v900_v37, %v899_v10  ;;  %v3734_v10 = vld [vmem:[%s6121_s1 + $0x28] sm:$0xf0]  ;;  %v581_v37 = vshrl.u32 %v4164_v34, 16  ;;  %v3731_v59 = vld [vmem:[%s6121_s1 + $0x10] sm:$0xf0] }
  0xc7   : > { %1793 = vmatmul.bf16.vlgmr.msrb.gmra.mxu2 %v4539_v20  ;;  %2048 = vmatpush.bf16.msrb.mxu1 %v3448_v23 }
  0xc8   : > { %v902_v14 = vsel %vm834_vm3, %v895_v29, %v901_v15  ;;  %v1086_v29 = vsel %vm1076_vm1, %v4151_v25, %v690_v13  ;;  %v795_v15 = vpop.permute.xlu1 %794  ;;  %v583_v23 = vor.u32 %v581_v37, %v579_v12 }
  0xc9   : > { %993 = vrot.lane.b32.xlu2 %v902_v14, %s3933_s16  ;;  %v587_v14 = vrot.slane %v585_v45, 1  ;;  %v1135_v25 = vsel %vm1125_vm5, %v1086_v29, %v795_v15  ;;  %v906_v29 = vrot.slane %v581_v37, 1  ;;  %v6214_v15 = vshll.u32 %v4164_v34, 16  ;;  %v4763_v37 = vld [vmem:[%s4052_s25 + $0x80] sm:$0xff] }
  0xca   : > { %v4662_v31 = vpop.f32.mrf.mxu2  ;;  %v589_v34 = vshrl.u32 %v4763_v37, 16 }
  0xcb   : > { %6205 = vst [vmem:[#allocation34_spill] sm:$0xff] %v4662_v31  ;;  %v980_v13 = vpop.permute.xlu2 %979 }
  0xcd   : > { %v4677_v31 = vpop.f32.mrf.mxu3 }
  0xce   : > { %6206 = vst [vmem:[#allocation35_spill] sm:$0xff] %v4677_v31  ;;  %v4682_v43 = vpop.f32.mrf.mxu1 }
  0xd1   : > { %3544 = vmatmul.msk.bf16.gmra.mxu1 %vm1076_vm1, %v4134_v9 }
  0xd2   : > { %v4685_v17 = vpop.f32.mrf.mxu2  ;;  %3578 = vmatmul.msk.bf16.gmra.mxu3 %vm1076_vm1, %v4470_v47  ;;  %v3435_v47 = vld [vmem:[%s6121_s1 + $0x20] sm:$0xf] }
  0xd3   : > { %6207 = vst [vmem:[#allocation36_spill] sm:$0xff] %v4685_v17  ;;  %1550 = vmatmul.bf16.gmra.mxu0 %v4688_v8  ;;  %v3436_v46 = vor.u32 %v3734_v10, %v3435_v47  ;;  %v588_v17 = vsel %vm456_vm2, %v583_v23, %v587_v14  ;;  %v4740_v23 = vsel %vm1174_vm6, %v1135_v25, %v980_v13 }
  0xd4   : > { %707 = vrot.lane.b32.xlu0 %v588_v17, %s3932_s15  ;;  %v6213_v17 = vshll.u32 %v4161_v33, 16 }
  0xd5   : > { %v4703_v50 = vpop.f32.mrf.mxu3  ;;  %2049 = vmatpush.bf16.msrb.mxu1 %v3436_v46 }
  0xd6   : > { %6208 = vst [vmem:[#allocation37_spill] sm:$0xff] %v4703_v50  ;;  %v4705_v24 = vpop.f32.mrf.mxu1  ;;  %v3423_v50 = vld [vmem:[%s6121_s1 + $0x8] sm:$0xf] }
  0xd7   : > { %1798 = vmatmul.bf16.gmra.mxu2 %v4599_v49 }
  0xda   : > { %v4709_v2 = vpop.f32.mrf.mxu2 }
  0xdb   : > { %6209 = vst [vmem:[#allocation38_spill] sm:$0xff] %v4709_v2  ;;  %v761_v2 = vrot.slane %v4067_v16, 1  ;;  %v3424_v16 = vor.u32 %v3731_v59, %v3423_v50  ;;  %v904_v50 = vrot.slane %v6213_v17, 2 }
  0xdd   : > { %v4729_v47 = vpop.f32.mrf.mxu3  ;;  %v762_v12 = vsel %vm729_vm4, %v759_v57, %v761_v2  ;;  %2050 = vmatpush.bf16.msrb.mxu1 %v3424_v16  ;;  %v6212_v57 = vshrl.u32 %v4161_v33, 16 }
  0xde   : > { %6210 = vst [vmem:[#allocation39_spill] sm:$0xff] %v4729_v47  ;;  %v4734_v10 = vpop.f32.mrf.mxu1  ;;  %812 = vrot.lane.b32.xlu1 %v762_v12, %s3934_s17  ;;  %v907_v12 = vrot.slane %v6214_v15, 2 }
  0xdf   : > { %v903_v59 = vrot.slane %v6212_v57, 1  ;;  %v692_v57 = vpop.permute.xlu0 %691 }
  0xe0   : > { %v908_v13 = vor.u32 %v907_v12, %v906_v29  ;;  %v1088_v17 = vsel %vm1076_vm1, %v4194_v58, %v692_v57  ;;  %v591_v29 = vor.u32 %v589_v34, %v587_v14  ;;  %v763_v12 = vrot.slane %v4080_v27, 1 }
  0xe1   : > { %3545 = vmatmul.msk.bf16.gmra.mxu1 %vm1076_vm1, %v4182_v51  ;;  %v905_v25 = vor.u32 %v904_v50, %v903_v59  ;;  %v593_v59 = vshll.u32 %v4080_v27, 16  ;;  %v797_v50 = vpop.permute.xlu1 %796  ;;  %v910_v57 = vrot.slane %v589_v34, 1 }
  0xe2   : > { %v4737_v46 = vpop.f32.mrf.mxu2  ;;  %3579 = vmatmul.msk.bf16.gmra.mxu3 %vm1076_vm1, %v4544_v55  ;;  %v764_v47 = vsel %vm729_vm4, %v761_v2, %v763_v12 }
  0xe3   : > { %6211 = vst [vmem:[#allocation40_spill] sm:$0xff] %v4737_v46  ;;  %1555 = vmatmul.bf16.gmra.mxu0 %v4740_v23  ;;  %v909_v55 = vsel %vm834_vm3, %v905_v25, %v908_v13  ;;  %v595_v15 = vrot.slane %v593_v59, 1 }
  0xe4   : > { %995 = vrot.lane.b32.xlu2 %v909_v55, %s3933_s16  ;;  %v1137_v55 = vsel %vm1125_vm5, %v1088_v17, %v797_v50  ;;  %v911_v17 = vrot.slane %v585_v45, 2 }
  0xe5   : > { %v4754_v16 = vpop.f32.mrf.mxu3  ;;  %v596_v25 = vsel %vm456_vm2, %v591_v29, %v595_v15  ;;  %v4796_v29 = vld [vmem:[%s4052_s25 + $0x8c] sm:$0xff] }
  0xe6   : > { %6215 = vst [vmem:[#allocation41_spill] sm:$0xff] %v4754_v16  ;;  %v4756_v46 = vpop.f32.mrf.mxu1  ;;  %709 = vrot.lane.b32.xlu0 %v596_v25, %s3932_s15  ;;  %814 = vrot.lane.b32.xlu1 %v764_v47, %s3934_s17  ;;  %v912_v2 = vor.u32 %v911_v17, %v910_v57  ;;  %v600_v15 = vshll.u32 %v4796_v29, 16  ;;  %v598_v45 = vshrl.u32 %v4796_v29, 16 }
  0xe7   : > { %1803 = vmatmul.bf16.gmra.mxu2 %v4635_v62  ;;  %v694_v12 = vpop.permute.xlu0 %693 }
  0xe8   : > { %v602_v25 = vrot.slane %v600_v15, 1  ;;  %v1090_v17 = vsel %vm1076_vm1, %v4281_v21, %v694_v12 }
  0xea   : > { %v4760_v33 = vpop.f32.mrf.mxu2 }
  0xeb   : > { %6216 = vst [vmem:[#allocation42_spill] sm:$0xff] %v4760_v33  ;;  %v982_v33 = vpop.permute.xlu2 %981 }
  0xec   : > { %v4782_v14 = vsel %vm1174_vm6, %v1137_v55, %v982_v33  ;;  %v913_v33 = vsel %vm834_vm3, %v908_v13, %v912_v2  ;;  %v4804_v55 = vld [vmem:[%s4052_s25 + $0x94] sm:$0xff]  ;;  %v799_v13 = vpop.permute.xlu1 %798 }
  0xed   : > { %v4771_v16 = vpop.f32.mrf.mxu3  ;;  %997 = vrot.lane.b32.xlu2 %v913_v33, %s3933_s16  ;;  %v605_v57 = vshll.u32 %v4804_v55, 16  ;;  %v1139_v53 = vsel %vm1125_vm5, %v1090_v17, %v799_v13  ;;  %v917_v17 = vrot.slane %v593_v59, 2  ;;  %v613_v59 = vshll.u32 %v4170_v42, 16 }
  0xee   : > { %6217 = vst [vmem:[#allocation43_spill] sm:$0xff] %v4771_v16  ;;  %v4776_v31 = vpop.f32.mrf.mxu1  ;;  %v766_v16 = vrot.slane %v4804_v55, 1 }
  0xf1   : > { %3546 = vmatmul.msk.bf16.gmra.mxu1 %vm1076_vm1, %v4225_v35 }
  0xf2   : > { %v4779_v58 = vpop.f32.mrf.mxu2  ;;  %3580 = vmatmul.msk.bf16.gmra.mxu3 %vm1076_vm1, %v4594_v6  ;;  %v603_v6 = vor.u32 %v602_v25, %v598_v45 }
  0xf3   : > { %6218 = vst [vmem:[#allocation44_spill] sm:$0xff] %v4779_v58  ;;  %1560 = vmatmul.bf16.gmra.mxu0 %v4782_v14  ;;  %v607_v58 = vrot.slane %v605_v57, 1  ;;  %v984_v19 = vpop.permute.xlu2 %983 }
  0xf4   : > { %v4823_v12 = vsel %vm1174_vm6, %v1139_v53, %v984_v19 }
  0xf5   : > { %v4790_v47 = vpop.f32.mrf.mxu3  ;;  %v608_v33 = vsel %vm456_vm2, %v603_v6, %v607_v58  ;;  %v914_v6 = vshrl.u32 %v4080_v27, 16  ;;  %v696_v27 = vpop.permute.xlu0 %695 }
  0xf6   : > { %6219 = vst [vmem:[#allocation45_spill] sm:$0xff] %v4790_v47  ;;  %v4792_v50 = vpop.f32.mrf.mxu1  ;;  %v765_v47 = vrot.slane %v4796_v29, 1  ;;  %711 = vrot.lane.b32.xlu0 %v608_v33, %s3932_s15  ;;  %v1092_v33 = vsel %vm1076_vm1, %v4284_v28, %v696_v27  ;;  %v920_v27 = vrot.slane %v598_v45, 1  ;;  %v6146_v45 = vshll.u32 %v4214_v18, 16 }
  0xf7   : > { %1808 = vmatmul.bf16.gmra.mxu2 %v4688_v8  ;;  %v916_v25 = vrot.slane %v914_v6, 1  ;;  %v801_v6 = vpop.permute.xlu1 %800 }
  0xf8   : > { %v767_v41 = vsel %vm729_vm4, %v765_v47, %v766_v16 }
  0xf9   : > { %816 = vrot.lane.b32.xlu1 %v767_v41, %s3934_s17  ;;  %v918_v47 = vor.u32 %v917_v17, %v916_v25  ;;  %v615_v17 = vrot.slane %v613_v59, 1 }
  0xfa   : > { %v4800_v34 = vpop.f32.mrf.mxu2 }
  0xfb   : > { %6220 = vst [vmem:[#allocation46_spill] sm:$0xff] %v4800_v34  ;;  %v919_v19 = vsel %vm834_vm3, %v912_v2, %v918_v47 }
  0xfc   : > { %999 = vrot.lane.b32.xlu2 %v919_v19, %s3933_s16  ;;  %v1141_v19 = vsel %vm1125_vm5, %v1092_v33, %v801_v6  ;;  %v921_v33 = vrot.slane %v600_v15, 2 }
  0xfd   : > { %v4812_v34 = vpop.f32.mrf.mxu3 }
  0xfe   : > { %6221 = vst [vmem:[#allocation47_spill] sm:$0xff] %v4812_v34  ;;  %v4817_v35 = vpop.f32.mrf.mxu1 }
 0x101   : > { %2051 = vmatmul.bf16.vlgmr.msrb.gmra.mxu1 %v4539_v20  ;;  %v609_v20 = vshrl.u32 %v4804_v55, 16 }
 0x102   : > { %v4820_v21 = vpop.f32.mrf.mxu2  ;;  %3581 = vmatmul.msk.bf16.vlgmr.msrb.gmra.mxu3 %vm1076_vm1, %v4078_v26 }
 0x103   : > { %6222 = vst [vmem:[#allocation48_spill] sm:$0xff] %v4820_v21  ;;  %1565 = vmatmul.bf16.gmra.mxu0 %v4823_v12  ;;  %v611_v25 = vor.u32 %v609_v20, %v607_v58  ;;  %v4844_v21 = vld [vmem:[%s4052_s25 + $0x9c] sm:$0xff]  ;;  %v923_v6 = vrot.slane %v609_v20, 1  ;;  %v803_v20 = vpop.permute.xlu1 %802 }
 0x104   : > { %v617_v15 = vshrl.u32 %v4844_v21, 16 }
 0x105   : > { %v4831_v41 = vpop.f32.mrf.mxu3  ;;  %v616_v2 = vsel %vm456_vm2, %v611_v25, %v615_v17  ;;  %v922_v25 = vor.u32 %v921_v33, %v920_v27  ;;  %v623_v33 = vrot.slane %v6146_v45, 1 }
 0x106   : > { %6223 = vst [vmem:[#allocation49_spill] sm:$0xff] %v4831_v41  ;;  %v4833_v13 = vpop.f32.mrf.mxu1  ;;  %v768_v41 = vrot.slane %v4844_v21, 1  ;;  %713 = vrot.lane.b32.xlu0 %v616_v2, %s3932_s15  ;;  %v619_v27 = vor.u32 %v617_v15, %v615_v17 }
 0x107   : > { %1813 = vmatmul.bf16.gmra.mxu2 %v4740_v23 }
 0x108   : > { %v769_v42 = vsel %vm729_vm4, %v766_v16, %v768_v41  ;;  %v924_v16 = vrot.slane %v605_v57, 2 }
 0x109   : > { %818 = vrot.lane.b32.xlu1 %v769_v42, %s3934_s17 }
 0x10a   : > { %v4837_v53 = vpop.f32.mrf.mxu2  ;;  %v925_v42 = vor.u32 %v924_v16, %v923_v6  ;;  %v770_v6 = vrot.slane %v4214_v18, 1  ;;  %v4884_v16 = vld [vmem:[%s6122_s2] sm:$0x7] }
 0x10b   : > { %6224 = vst [vmem:[#allocation50_spill] sm:$0xff] %v4837_v53  ;;  %v986_v53 = vpop.permute.xlu2 %985 }
 0x10c   : > { %v4859_v58 = vsel %vm1174_vm6, %v1141_v19, %v986_v53  ;;  %v698_v53 = vpop.permute.xlu0 %697 }
 0x10d   : > { %v4848_v47 = vpop.f32.mrf.mxu3  ;;  %v1094_v57 = vsel %vm1076_vm1, %v4360_v5, %v698_v53  ;;  %v771_v5 = vsel %vm729_vm4, %v768_v41, %v770_v6  ;;  %v4896_v53 = vperm.slane %v4884_v16, 0  ;;  %v928_v41 = vrot.slane %v613_v59, 2 }
 0x10e   : > { %6225 = vst [vmem:[#allocation51_spill] sm:$0xff] %v4848_v47  ;;  %v4853_v34 = vpop.f32.mrf.mxu1 }
 0x111   : > { %2056 = vmatmul.bf16.gmra.mxu1 %v4599_v49  ;;  %v926_v49 = vsel %vm834_vm3, %v922_v25, %v925_v42  ;;  %v624_v25 = vsel %vm456_vm2, %v619_v27, %v623_v33  ;;  %820 = vrot.lane.b32.xlu1 %v771_v5, %s3934_s17  ;;  %v6150_v5 = vshrl.u32 %v4256_v63, 16 }
 0x112   : > { %v4856_v28 = vpop.f32.mrf.mxu2  ;;  %3582 = vmatmul.msk.bf16.gmra.mxu3 %vm1076_vm1, %v4129_v4  ;;  %1001 = vrot.lane.b32.xlu2 %v926_v49, %s3933_s16 }
 0x113   : > { %6226 = vst [vmem:[#allocation52_spill] sm:$0xff] %v4856_v28  ;;  %1570 = vmatmul.bf16.gmra.mxu0 %v4859_v58  ;;  %715 = vrot.lane.b32.xlu0 %v624_v25, %s3932_s15 }
 0x115   : > { %v4866_v2 = vpop.f32.mrf.mxu3 }
 0x116   : > { %6227 = vst [vmem:[#allocation53_spill] sm:$0xff] %v4866_v2  ;;  %v4868_v28 = vpop.f32.mrf.mxu1  ;;  %v988_v2 = vpop.permute.xlu2 %987 }
 0x117   : > { %1818 = vmatmul.bf16.gmra.mxu2 %v4782_v14 }
 0x11a   : > { %v4871_v19 = vpop.f32.mrf.mxu2 }
 0x11b   : > { %6228 = vst [vmem:[#allocation54_spill] sm:$0xff] %v4871_v19  ;;  %v1143_v19 = vsel %vm1125_vm5, %v1094_v57, %v803_v20  ;;  %v927_v57 = vrot.slane %v617_v15, 1  ;;  %v700_v15 = vpop.permute.xlu0 %699 }
 0x11c   : > { %v4901_v27 = vsel %vm1174_vm6, %v1143_v19, %v988_v2 }
 0x11d   : > { %v4887_v49 = vpop.f32.mrf.mxu3  ;;  %v929_v33 = vor.u32 %v928_v41, %v927_v57  ;;  %v6149_v41 = vshll.u32 %v4259_v0, 16 }
 0x11e   : > { %6229 = vst [vmem:[#allocation55_spill] sm:$0xff] %v4887_v49  ;;  %v4892_v17 = vpop.f32.mrf.mxu1  ;;  %v4932_v49 = vld [vmem:[%s4052_s25 + $0xa8] sm:$0xff] }
 0x11f   : > { %v930_v2 = vsel %vm834_vm3, %v925_v42, %v929_v33  ;;  %6233 = vst [vmem:[#allocation59_spill] sm:$0xff] %v4932_v49 }
 0x120   : > { %v1536_v47 = vpop.f32.mrf.mxu0  ;;  %1003 = vrot.lane.b32.xlu2 %v930_v2, %s3933_s16  ;;  %v635_v2 = vrot.slane %v6149_v41, 1  ;;  %v990_v41 = vpop.permute.xlu2 %989 }
 0x121   : > { %2061 = vmatmul.bf16.gmra.mxu1 %v4635_v62  ;;  %v1537_v20 = vadd.f32 %v1536_v47, %v4896_v53  ;;  %v6147_v62 = vshll.u32 %v4256_v63, 16 }
 0x122   : > { %v4898_v45 = vpop.f32.mrf.mxu2  ;;  %3583 = vmatmul.msk.bf16.gmra.mxu3 %vm1076_vm1, %v4177_v48  ;;  %v4936_v48 = vld [vmem:[%s4052_s25 + $0xb0] sm:$0xff] }
 0x123   : > { %6230 = vst [vmem:[#allocation56_spill] sm:$0xff] %v4898_v45  ;;  %1575 = vmatmul.bf16.gmra.mxu0 %v4901_v27  ;;  %v1666_v19 = vadd.f32 %v4516_v52, %v1537_v20  ;;  %v630_v57 = vrot.slane %v6147_v62, 1  ;;  %v1096_v45 = vsel %vm1076_vm1, %v4481_v40, %v700_v15  ;;  %v805_v52 = vpop.permute.xlu1 %804  ;;  %v772_v62 = vrot.slane %v4932_v49, 1  ;;  %v4942_v40 = vld [vmem:[%s6123_s3] sm:$0xff]  ;;  %v4947_v15 = vld [vmem:[%s6123_s3 + $0x18] sm:$0xff] }
 0x124   : > { %6234 = vst [vmem:[#allocation60_spill] sm:$0xff] %v4936_v48 }
 0x125   : > { %v4909_v6 = vpop.f32.mrf.mxu3  ;;  %v631_v20 = vor.u32 %v630_v57, %v6150_v5 }
 0x126   : > { %6231 = vst [vmem:[#allocation57_spill] sm:$0xff] %v4909_v6  ;;  %v4911_v25 = vpop.f32.mrf.mxu1 }
 0x127   : > { %1823 = vmatmul.bf16.gmra.mxu2 %v4823_v12 }
 0x128   : > { %v1538_v47 = vpop.f32.mrf.mxu0 }
 0x129   : > { %v1539_v42 = vadd.f32 %v1538_v47, %v4896_v53  ;;  %v773_v47 = vrot.slane %v4936_v48, 1 }
 0x12a   : > { %v4917_v59 = vpop.f32.mrf.mxu2 }
 0x12b   : > { %6232 = vst [vmem:[#allocation58_spill] sm:$0xff] %v4917_v59  ;;  %v2301_v59 = vmax.f32 %v1666_v19, 0.0  ;;  %v1668_v6 = vadd.f32 %v4554_v39, %v1539_v42  ;;  %v636_v39 = vsel %vm456_vm2, %v631_v20, %v635_v2  ;;  %v1145_v42 = vsel %vm1125_vm5, %v1096_v45, %v805_v52 }
 0x12c   : > { %717 = vrot.lane.b32.xlu0 %v636_v39, %s3932_s15  ;;  %v774_v5 = vsel %vm729_vm4, %v772_v62, %v773_v47  ;;  %v4963_v20 = vsel %vm1174_vm6, %v1145_v42, %v990_v41  ;;  %v931_v45 = vshrl.u32 %v4214_v18, 16 }
 0x12d   : > { %v2304_v19 = vmax.f32 %v1668_v6, 0.0  ;;  %v4950_v57 = vpop.f32.mrf.mxu3  ;;  %822 = vrot.lane.b32.xlu1 %v774_v5, %s3934_s17  ;;  %v2463_v26 = vmul.f32 %v4942_v40, %v2301_v59  ;;  %v6237_v59 = vshll.u32 %v4214_v18, 16 }
 0x12e   : > { %6235 = vst [vmem:[#allocation61_spill] sm:$0xff] %v4950_v57  ;;  %v4955_v4 = vpop.f32.mrf.mxu1  ;;  %v933_v62 = vrot.slane %v931_v45, 1 }
 0x12f   : > { %v2466_v51 = vmul.f32 %v4947_v15, %v2304_v19  ;;  %v934_v5 = vrot.slane %v6237_v59, 2  ;;  %v4991_v59 = vld [vmem:[%s4052_s25 + $0xb8] sm:$0xff] }
 0x130   : > { %v1541_v6 = vpop.f32.mrf.mxu0  ;;  %6240 = vst [vmem:[#allocation65_spill] sm:$0xff] %v4991_v59  ;;  %v775_v57 = vrot.slane %v4991_v59, 1 }
 0x131   : > { %v2607_v52 = vmax.f32 %v2463_v26, %v2466_v51  ;;  %v1542_v39 = vadd.f32 %v1541_v6, %v4896_v53  ;;  %2066 = vmatmul.bf16.gmra.mxu1 %v4688_v8  ;;  %v4977_v26 = vld [vmem:[%s6123_s3 + $0x30] sm:$0xff]  ;;  %v935_v51 = vor.u32 %v934_v5, %v933_v62  ;;  %v702_v6 = vpop.permute.xlu0 %701  ;;  %v637_v62 = vshrl.u32 %v4936_v48, 16 }
 0x132   : > { %v4960_v49 = vpop.f32.mrf.mxu2  ;;  %3584 = vmatmul.msk.bf16.gmra.mxu3 %vm1076_vm1, %v4219_v22  ;;  %v6156_v5 = vshll.u32 %v4991_v59, 16  ;;  %v5004_v22 = vld [vmem:[%s6123_s3 + $0x48] sm:$0xff] }
 0x133   : > { %6236 = vst [vmem:[#allocation62_spill] sm:$0xff] %v4960_v49  ;;  %v1671_v19 = vadd.f32 %v4580_v44, %v1542_v39  ;;  %1580 = vmatmul.bf16.gmra.mxu0 %v4963_v20  ;;  %v936_v18 = vsel %vm834_vm3, %v929_v33, %v935_v51  ;;  %v807_v51 = vpop.permute.xlu1 %806 }
 0x134   : > { %1005 = vrot.lane.b32.xlu2 %v936_v18, %s3933_s16  ;;  %v643_v18 = vrot.slane %v6156_v5, 1 }
 0x135   : > { %v2307_v8 = vmax.f32 %v1671_v19, 0.0  ;;  %v4980_v41 = vpop.f32.mrf.mxu3 }
 0x136   : > { %6238 = vst [vmem:[#allocation63_spill] sm:$0xff] %v4980_v41  ;;  %v4982_v42 = vpop.f32.mrf.mxu1  ;;  %v3842_v41 = vld [vmem:[%s4052_s25 + $0x5c] sm:$0xff] }
 0x137   : > { %1828 = vmatmul.bf16.gmra.mxu2 %v4859_v58  ;;  %v2469_v44 = vmul.f32 %v4977_v26, %v2307_v8  ;;  %v1098_v33 = vsel %vm1076_vm1, %v3842_v41, %v702_v6  ;;  %v639_v8 = vor.u32 %v637_v62, %v635_v2  ;;  %v992_v2 = vpop.permute.xlu2 %991  ;;  %v776_v6 = vsel %vm729_vm4, %v773_v47, %v775_v57 }
 0x138   : > { %v1543_v39 = vpop.f32.mrf.mxu0  ;;  %v1147_v41 = vsel %vm1125_vm5, %v1098_v33, %v807_v51  ;;  %824 = vrot.lane.b32.xlu1 %v776_v6, %s3934_s17  ;;  %v6243_v47 = vshrl.u32 %v4256_v63, 16  ;;  %v940_v6 = vrot.slane %v637_v62, 1 }
 0x139   : > { %v2608_v19 = vmax.f32 %v2607_v52, %v2469_v44  ;;  %v1544_v49 = vadd.f32 %v1543_v39, %v4896_v53  ;;  %v644_v52 = vsel %vm456_vm2, %v639_v8, %v643_v18 }
 0x13a   : > { %v4987_v45 = vpop.f32.mrf.mxu2  ;;  %719 = vrot.lane.b32.xlu0 %v644_v52, %s3932_s15  ;;  %v937_v51 = vrot.slane %v6243_v47, 1  ;;  %v6244_v52 = vshll.u32 %v4256_v63, 16 }
 0x13b   : > { %6239 = vst [vmem:[#allocation64_spill] sm:$0xff] %v4987_v45  ;;  %v1673_v45 = vadd.f32 %v4612_v36, %v1544_v49 }
 0x13d   : > { %v2310_v44 = vmax.f32 %v1673_v45, 0.0  ;;  %v5007_v39 = vpop.f32.mrf.mxu3  ;;  %v5019_v45 = vsel %vm1174_vm6, %v1147_v41, %v992_v2 }
 0x13e   : > { %6241 = vst [vmem:[#allocation66_spill] sm:$0xff] %v5007_v39  ;;  %v5012_v36 = vpop.f32.mrf.mxu1  ;;  %v777_v39 = vrot.slane %v4367_v38, 1 }
 0x13f   : > { %v2472_v49 = vmul.f32 %v5004_v22, %v2310_v44  ;;  %v938_v44 = vrot.slane %v6244_v52, 2 }
 0x140   : > { %v1546_v48 = vpop.f32.mrf.mxu0 }
 0x141   : > { %v2609_v8 = vmax.f32 %v2608_v19, %v2472_v49  ;;  %v1547_v33 = vadd.f32 %v1546_v48, %v4896_v53  ;;  %2071 = vmatmul.bf16.gmra.mxu1 %v4740_v23  ;;  %v6245_v19 = vshll.u32 %v4259_v0, 16  ;;  %v5036_v48 = vld [vmem:[%s6123_s3 + $0x60] sm:$0xff]  ;;  %v939_v23 = vor.u32 %v938_v44, %v937_v51 }
 0x142   : > { %v5016_v5 = vpop.f32.mrf.mxu2  ;;  %3585 = vmatmul.msk.bf16.gmra.mxu3 %vm1076_vm1, %v4263_v1  ;;  %v645_v51 = vshrl.u32 %v4991_v59, 16 }
 0x143   : > { %6242 = vst [vmem:[#allocation67_spill] sm:$0xff] %v5016_v5  ;;  %v1676_v5 = vadd.f32 %v4629_v61, %v1547_v33  ;;  %1585 = vmatmul.bf16.gmra.mxu0 %v5019_v45  ;;  %v941_v41 = vrot.slane %v6245_v19, 2  ;;  %v704_v33 = vpop.permute.xlu0 %703 }
 0x145   : > { %v2313_v2 = vmax.f32 %v1676_v5, 0.0  ;;  %v5039_v63 = vpop.f32.mrf.mxu3  ;;  %v942_v62 = vor.u32 %v941_v41, %v940_v6  ;;  %v6158_v5 = vshll.u32 %v4367_v38, 16  ;;  %v3843_v6 = vld [vmem:[%s4052_s25 + $0x64] sm:$0xff] }
 0x146   : > { %6246 = vst [vmem:[#allocation68_spill] sm:$0xff] %v5039_v63  ;;  %v5041_v49 = vpop.f32.mrf.mxu1  ;;  %v1100_v41 = vsel %vm1076_vm1, %v3843_v6, %v704_v33  ;;  %v809_v63 = vpop.permute.xlu1 %808  ;;  %v778_v6 = vsel %vm729_vm4, %v775_v57, %v777_v39  ;;  %v944_v57 = vrot.slane %v645_v51, 1  ;;  %v6250_v39 = vshll.u32 %v4991_v59, 16 }
 0x147   : > { %1833 = vmatmul.bf16.gmra.mxu2 %v4901_v27  ;;  %v2475_v61 = vmul.f32 %v5036_v48, %v2313_v2  ;;  %v943_v0 = vsel %vm834_vm3, %v939_v23, %v942_v62  ;;  %v647_v2 = vor.u32 %v645_v51, %v643_v18  ;;  %v651_v23 = vrot.slane %v6158_v5, 1  ;;  %v994_v18 = vpop.permute.xlu2 %993  ;;  %826 = vrot.lane.b32.xlu1 %v778_v6, %s3934_s17 }
 0x148   : > { %v1548_v52 = vpop.f32.mrf.mxu0  ;;  %1007 = vrot.lane.b32.xlu2 %v943_v0, %s3933_s16  ;;  %v5060_v0 = vld [vmem:[%s6123_s3 + $0x78] sm:$0xff]  ;;  %v1149_v33 = vsel %vm1125_vm5, %v1100_v41, %v809_v63  ;;  %v945_v63 = vrot.slane %v6250_v39, 2 }
 0x149   : > { %v2610_v44 = vmax.f32 %v2609_v8, %v2475_v61  ;;  %v1549_v19 = vadd.f32 %v1548_v52, %v4896_v53  ;;  %v652_v8 = vsel %vm456_vm2, %v647_v2, %v651_v23 }
 0x14a   : > { %v5045_v47 = vpop.f32.mrf.mxu2  ;;  %721 = vrot.lane.b32.xlu0 %v652_v8, %s3932_s15  ;;  %v946_v8 = vor.u32 %v945_v63, %v944_v57  ;;  %v5104_v63 = vld [vmem:[%s4052_s25 + $0xcc] sm:$0xff] }
 0x14b   : > { %6247 = vst [vmem:[#allocation69_spill] sm:$0xff] %v5045_v47  ;;  %v1678_v47 = vadd.f32 %v4657_v11, %v1549_v19  ;;  %v706_v6 = vpop.permute.xlu0 %705  ;;  %v780_v1 = vrot.slane %v5104_v63, 1 }
 0x14d   : > { %v2316_v61 = vmax.f32 %v1678_v47, 0.0  ;;  %v5063_v52 = vpop.f32.mrf.mxu3  ;;  %v5075_v47 = vsel %vm1174_vm6, %v1149_v33, %v994_v18  ;;  %v5093_v33 = vld [vmem:[%s4052_s25 + $0xc4] sm:$0xff] }
 0x14e   : > { %6248 = vst [vmem:[#allocation70_spill] sm:$0xff] %v5063_v52  ;;  %v5068_v11 = vpop.f32.mrf.mxu1  ;;  %v6160_v51 = vshll.u32 %v5093_v33, 16  ;;  %v6164_v57 = vshrl.u32 %v5093_v33, 16 }
 0x14f   : > { %v2478_v19 = vmul.f32 %v5060_v0, %v2316_v61 }
 0x150   : > { %v1551_v2 = vpop.f32.mrf.mxu0  ;;  %v658_v39 = vrot.slane %v6160_v51, 1  ;;  %v779_v51 = vrot.slane %v5093_v33, 1 }
 0x151   : > { %v5077_v23 = vmax.f32 %v2610_v44, %v2478_v19  ;;  %2076 = vmatmul.bf16.gmra.mxu1 %v4782_v14  ;;  %v1552_v41 = vadd.f32 %v1551_v2, %v4896_v53  ;;  %v947_v14 = vsel %vm834_vm3, %v942_v62, %v946_v8  ;;  %v6163_v62 = vshll.u32 %v5104_v63, 16 }
 0x152   : > { %v5072_v5 = vpop.f32.mrf.mxu2  ;;  %3586 = vmatmul.msk.bf16.gmra.mxu3 %vm1076_vm1, %v4332_v60  ;;  %1009 = vrot.lane.b32.xlu2 %v947_v14, %s3933_s16  ;;  %v659_v14 = vor.u32 %v658_v39, %v6164_v57  ;;  %v781_v39 = vsel %vm729_vm4, %v779_v51, %v780_v1  ;;  %v3848_v57 = vld [vmem:[%s4052_s25 + $0x78] sm:$0xff] }
 0x153   : > { %6249 = vst [vmem:[#allocation71_spill] sm:$0xff] %v5072_v5  ;;  %1590 = vmatmul.bf16.gmra.mxu0 %v5075_v47  ;;  %v1681_v18 = vadd.f32 %v4682_v43, %v1552_v41  ;;  %v3846_v5 = vld [vmem:[%s4052_s25 + $0x70] sm:$0xff]  ;;  %v811_v41 = vpop.permute.xlu1 %810  ;;  %828 = vrot.lane.b32.xlu1 %v781_v39, %s3934_s17 }
 0x154   : > { %v1102_v43 = vsel %vm1076_vm1, %v3846_v5, %v706_v6  ;;  %v996_v6 = vpop.permute.xlu2 %995 }
 0x155   : > { %v5087_v44 = vpop.f32.mrf.mxu3  ;;  %v2319_v52 = vmax.f32 %v1681_v18, 0.0  ;;  %v1151_v5 = vsel %vm1125_vm5, %v1102_v43, %v811_v41  ;;  %v948_v43 = vshrl.u32 %v4367_v38, 16 }
 0x156   : > { %6251 = vst [vmem:[#allocation72_spill] sm:$0xff] %v5087_v44  ;;  %v5089_v61 = vpop.f32.mrf.mxu1 }
 0x157   : > { %1838 = vmatmul.bf16.gmra.mxu2 %v4963_v20  ;;  %6252 = vst [vmem:[#allocation73_spill] sm:$0xff] %v5089_v61  ;;  %v950_v51 = vrot.slane %v948_v43, 1 }
 0x158   : > { %v1553_v2 = vpop.f32.mrf.mxu0 }
 0x159   : > { %v1554_v44 = vadd.f32 %v1553_v2, %v4896_v53 }
 0x15a   : > { %v5098_v19 = vpop.f32.mrf.mxu2 }
 0x15b   : > { %6253 = vst [vmem:[#allocation74_spill] sm:$0xff] %v5098_v19  ;;  %v663_v19 = vrot.slane %v6163_v62, 1  ;;  %v1683_v60 = vadd.f32 %v4705_v24, %v1554_v44  ;;  %v2481_v24 = vmul.f32 %v4942_v40, %v2319_v52  ;;  %v6256_v52 = vshll.u32 %v4367_v38, 16  ;;  %v708_v38 = vpop.permute.xlu0 %707 }
 0x15d   : > { %v664_v61 = vsel %vm456_vm2, %v659_v14, %v663_v19  ;;  %v2322_v2 = vmax.f32 %v1683_v60, 0.0  ;;  %v5118_v59 = vpop.f32.mrf.mxu3  ;;  %v5131_v14 = vsel %vm1174_vm6, %v1151_v5, %v996_v6 }
 0x15e   : > { %6254 = vst [vmem:[#allocation75_spill] sm:$0xff] %v5118_v59  ;;  %723 = vrot.lane.b32.xlu0 %v664_v61, %s3932_s15  ;;  %v5123_v62 = vpop.f32.mrf.mxu1 }
 0x15f   : > { %v2484_v44 = vmul.f32 %v4947_v15, %v2322_v2  ;;  %v951_v2 = vrot.slane %v6256_v52, 2 }
 0x160   : > { %v1556_v60 = vpop.f32.mrf.mxu0 }
 0x161   : > { %v2640_v41 = vmax.f32 %v2481_v24, %v2484_v44  ;;  %v1557_v61 = vadd.f32 %v1556_v60, %v4896_v53  ;;  %2081 = vmatmul.bf16.gmra.mxu1 %v4823_v12  ;;  %v952_v5 = vor.u32 %v951_v2, %v950_v51  ;;  %v5154_v51 = vld [vmem:[%s4052_s25 + $0xd4] sm:$0xff]  ;;  %s3236_s25 = scalar_lea.sflag [#allocation3], %s245_s18 }
 0x162   : > { %v5128_v18 = vpop.f32.mrf.mxu2  ;;  %3587 = vmatmul.msk.bf16.gmra.mxu3 %vm1076_vm1, %v4391_v3  ;;  %v6166_v52 = vshll.u32 %v5154_v51, 16  ;;  %v782_v59 = vrot.slane %v5154_v51, 1 }
 0x163   : > { %6255 = vst [vmem:[#allocation76_spill] sm:$0xff] %v5128_v18  ;;  %v1686_v39 = vadd.f32 %v4734_v10, %v1557_v61  ;;  %1595 = vmatmul.bf16.gmra.mxu0 %v5131_v14  ;;  %v953_v44 = vsel %vm834_vm3, %v946_v8, %v952_v5  ;;  %v665_v61 = vshrl.u32 %v5104_v63, 16  ;;  %v1104_v8 = vsel %vm1076_vm1, %v3848_v57, %v708_v38  ;;  %v813_v5 = vpop.permute.xlu1 %812 }
 0x164   : > { %1011 = vrot.lane.b32.xlu2 %v953_v44, %s3933_s16  ;;  %v671_v44 = vrot.slane %v6166_v52, 1  ;;  %v783_v57 = vsel %vm729_vm4, %v780_v1, %v782_v59  ;;  %v6261_v1 = vshrl.u32 %v5093_v33, 16 }
 0x165   : > { %v2325_v6 = vmax.f32 %v1686_v39, 0.0  ;;  %v5143_v24 = vpop.f32.mrf.mxu3  ;;  %830 = vrot.lane.b32.xlu1 %v783_v57, %s3934_s17 }
 0x166   : > { %6257 = vst [vmem:[#allocation77_spill] sm:$0xff] %v5143_v24  ;;  %v5145_v12 = vpop.f32.mrf.mxu1 }
 0x167   : > { %1843 = vmatmul.bf16.gmra.mxu2 %v5019_v45  ;;  %v2487_v60 = vmul.f32 %v4977_v26, %v2325_v6  ;;  %v667_v6 = vor.u32 %v665_v61, %v663_v19 }
 0x168   : > { %v1558_v10 = vpop.f32.mrf.mxu0 }
 0x169   : > { %v2641_v2 = vmax.f32 %v2640_v41, %v2487_v60  ;;  %v1559_v39 = vadd.f32 %v1558_v10, %v4896_v53  ;;  %v1153_v41 = vsel %vm1125_vm5, %v1104_v8, %v813_v5  ;;  %v998_v60 = vpop.permute.xlu2 %997  ;;  %v6262_v5 = vshll.u32 %v5093_v33, 16 }
 0x16a   : > { %v5150_v43 = vpop.f32.mrf.mxu2 }
 0x16b   : > { %6258 = vst [vmem:[#allocation78_spill] sm:$0xff] %v5150_v43  ;;  %v1688_v24 = vadd.f32 %v4756_v46, %v1559_v39  ;;  %v672_v43 = vsel %vm456_vm2, %v667_v6, %v671_v44  ;;  %v957_v6 = vrot.slane %v665_v61, 1 }
 0x16c   : > { %725 = vrot.lane.b32.xlu0 %v672_v43, %s3932_s15  ;;  %v954_v43 = vrot.slane %v6261_v1, 1 }
 0x16d   : > { %v2328_v18 = vmax.f32 %v1688_v24, 0.0  ;;  %v5165_v3 = vpop.f32.mrf.mxu3  ;;  %v5177_v24 = vsel %vm1174_vm6, %v1153_v41, %v998_v60 }
 0x16e   : > { %6259 = vst [vmem:[#allocation79_spill] sm:$0xff] %v5165_v3  ;;  %v5170_v19 = vpop.f32.mrf.mxu1 }
 0x16f   : > { %v2490_v46 = vmul.f32 %v5004_v22, %v2328_v18  ;;  %v955_v18 = vrot.slane %v6262_v5, 2  ;;  %v710_v5 = vpop.permute.xlu0 %709 }
 0x170   : > { %v1561_v10 = vpop.f32.mrf.mxu0 }
 0x171   : > { %v2642_v39 = vmax.f32 %v2641_v2, %v2490_v46  ;;  %v1562_v8 = vadd.f32 %v1561_v10, %v4896_v53  ;;  %2086 = vmatmul.bf16.gmra.mxu1 %v4859_v58  ;;  %v6263_v2 = vshll.u32 %v5104_v63, 16  ;;  %v956_v60 = vor.u32 %v955_v18, %v954_v43 }
 0x172   : > { %v5174_v38 = vpop.f32.mrf.mxu2  ;;  %3588 = vmatmul.msk.bf16.gmra.mxu3 %vm1076_vm1, %v4453_v54  ;;  %v2612_v58 = vrot.slane %v5077_v23, 4  ;;  %v673_v43 = vshrl.u32 %v5154_v51, 16  ;;  %v6168_v18 = vshll.u32 %v4568_v7, 16 }
 0x173   : > { %6260 = vst [vmem:[#allocation80_spill] sm:$0xff] %v5174_v38  ;;  %v1691_v57 = vadd.f32 %v4776_v31, %v1562_v8  ;;  %1600 = vmatmul.bf16.gmra.mxu0 %v5177_v24  ;;  %v958_v41 = vrot.slane %v6263_v2, 2 }
 0x175   : > { %v2331_v46 = vmax.f32 %v1691_v57, 0.0  ;;  %v5193_v10 = vpop.f32.mrf.mxu3  ;;  %v959_v1 = vor.u32 %v958_v41, %v957_v6  ;;  %v2613_v57 = vmax.f32 %v5077_v23, %v2612_v58  ;;  %v1106_v41 = vsel %vm1076_vm1, %v4763_v37, %v710_v5 }
 0x176   : > { %6264 = vst [vmem:[#allocation81_spill] sm:$0xff] %v5193_v10  ;;  %v5195_v52 = vpop.f32.mrf.mxu1  ;;  %v675_v10 = vor.u32 %v673_v43, %v671_v44 }
 0x177   : > { %1848 = vmatmul.bf16.gmra.mxu2 %v5075_v47  ;;  %6265 = vst [vmem:[#allocation82_spill] sm:$0xff] %v5195_v52  ;;  %v2493_v61 = vmul.f32 %v5036_v48, %v2331_v46  ;;  %v960_v31 = vsel %vm834_vm3, %v956_v60, %v959_v1  ;;  %v815_v46 = vpop.permute.xlu1 %814  ;;  %v679_v60 = vrot.slane %v6168_v18, 1  ;;  %v2614_v54 = vrot.slane %v2613_v57, 2 }
 0x178   : > { %v1563_v3 = vpop.f32.mrf.mxu0  ;;  %1013 = vrot.lane.b32.xlu2 %v960_v31, %s3933_s16  ;;  %v784_v31 = vrot.slane %v4568_v7, 1 }
 0x179   : > { %v2643_v2 = vmax.f32 %v2642_v39, %v2493_v61  ;;  %v1564_v6 = vadd.f32 %v1563_v3, %v4896_v53  ;;  %v680_v38 = vsel %vm456_vm2, %v675_v10, %v679_v60  ;;  %v1155_v3 = vsel %vm1125_vm5, %v1106_v41, %v815_v46  ;;  %v1000_v39 = vpop.permute.xlu2 %999 }
 0x17a   : > { %v5199_v8 = vpop.f32.mrf.mxu2  ;;  %727 = vrot.lane.b32.xlu0 %v680_v38, %s3932_s15  ;;  %v785_v37 = vsel %vm729_vm4, %v782_v59, %v784_v31  ;;  %v5223_v10 = vperm.slane %v4884_v16, 2  ;;  %v5226_v5 = vsel %vm1174_vm6, %v1155_v3, %v1000_v39  ;;  %v961_v59 = vrot.slane %v673_v43, 1  ;;  %s3882_s15 = sshra.s32 %s3251_s11, 4  ;;  %s3883_s15 = int_to_ptr.hbm [resolvable:$true] %s3882_s15 }
 0x17b   : > { %6266 = vst [vmem:[#allocation83_spill] sm:$0xff] %v5199_v8  ;;  %v1693_v8 = vadd.f32 %v4792_v50, %v1564_v6  ;;  %832 = vrot.lane.b32.xlu1 %v785_v37, %s3934_s17  ;;  %v6268_v38 = vshll.u32 %v5154_v51, 16  ;;  %v712_v37 = vpop.permute.xlu0 %711  ;;  %s3884_s17 = scalar_lea.hbm %s3883_s15, 8  ;;  %p3889_p0 = scmp.lt.s32.totalorder %s3883_s15, %s6126_s6 }
 0x17c   : > { %p3885_p11 = scmp.ne.s32.totalorder %s3883_s15, %s3884_s17  ;;  %p3890_p1 = scmp.lt.s32.totalorder %s3888_s13, %s3884_s17 }
 0x17d   : > { %v2334_v52 = vmax.f32 %v1693_v8, 0.0  ;;  %v5213_v23 = vpop.f32.mrf.mxu3  ;;  %v2615_v8 = vmax.f32 %v2613_v57, %v2614_v54 }
 0x17e   : > { %6267 = vst [vmem:[#allocation84_spill] sm:$0xff] %v5213_v23  ;;  %v2052_v44 = vpop.f32.mrf.mxu1  ;;  %p3886_p12 = pnand %p3885_p11, %p4005_p5  ;;  %p3891_p2 = por %p3890_p1, %p3889_p0 }
 0x17f   : > { %v2496_v50 = vmul.f32 %v5060_v0, %v2334_v52  ;;  %v962_v52 = vrot.slane %v6268_v38, 2  ;;  %v2053_v16 = vadd.f32 %v2052_v44, %v5223_v10  ;;  %v2616_v54 = vrot.slane %v2615_v8, 1 }
 0x180   : > { %v1566_v61 = vpop.f32.mrf.mxu0  ;;  %v1108_v38 = vsel %vm1076_vm1, %v4796_v29, %v712_v37  ;;  %p3887_p13 = pneg %p3886_p12 }
 0x181   : > { %v2644_v6 = vmax.f32 %v2643_v2, %v2496_v50  ;;  %2091 = vmatmul.bf16.gmra.mxu1 %v4901_v27  ;;  %v1567_v46 = vadd.f32 %v1566_v61, %v4896_v53  ;;  %v5236_v60 = vor.u32 %v962_v52, %v961_v59  ;;  %v2617_v61 = vmax.f32 %v2615_v8, %v2616_v54  ;;  %v817_v52 = vpop.permute.xlu1 %816  ;;  %v1002_v8 = vpop.permute.xlu2 %1001 }
 0x182   : > { %v5220_v58 = vpop.f32.mrf.mxu2  ;;  %3589 = vmatmul.msk.bf16.gmra.mxu3 %vm1076_vm1, %v4519_v56  ;;  %v1157_v23 = vsel %vm1125_vm5, %v1108_v38, %v817_v52  ;;  %p3892_p3 = pnand %p3891_p2, %p3887_p13 }
 0x183   : > { %v2645_v41 = vrot.slane %v2644_v6, 4  ;;  %1605 = vmatmul.bf16.gmra.mxu0 %v5226_v5  ;;  %v964_v43 = vsel %vm834_vm3, %v959_v1, %v5236_v60  ;;  %v1696_v39 = vadd.f32 %v4817_v35, %v1567_v46  ;;  %v2871_v46 = vpack.c.bf16 %v2617_v61, %v2617_v61 }
 0x184   : > { %1015 = vrot.lane.b32.xlu2 %v964_v43, %s3933_s16  ;;  %v5266_v61 = vsel %vm1174_vm6, %v1157_v23, %v1002_v8  ;;  %v6269_v23 = vshll.u32 %v4568_v7, 16 }
 0x185   : > { %v2646_v57 = vmax.f32 %v2644_v6, %v2645_v41  ;;  %v2181_v27 = vpop.f32.mrf.mxu3 }
 0x186   : > { %v2182_v2 = vadd.f32 %v2181_v27, %v2053_v16  ;;  %v2054_v31 = vpop.f32.mrf.mxu1  ;;  %v2337_v16 = vmax.f32 %v1696_v39, 0.0  ;;  %v5255_v39 = vld [vmem:[%s6123_s3 + $0x10] sm:$0xff] }
 0x187   : > { %1853 = vmatmul.bf16.gmra.mxu2 %v5131_v14  ;;  %v2647_v3 = vrot.slane %v2646_v57, 2  ;;  %v2055_v35 = vadd.f32 %v2054_v31, %v5223_v10  ;;  %v5261_v31 = vld [vmem:[%s6123_s3 + $0x28] sm:$0xff] }
 0x188   : > { %v1568_v44 = vpop.f32.mrf.mxu0  ;;  %v2303_v54 = vmax.f32 %v2182_v2, 0.0  ;;  %v2499_v29 = vmul.f32 %v4942_v40, %v2337_v16 }
 0x189   : > { %v2648_v59 = vmax.f32 %v2646_v57, %v2647_v3  ;;  %v1569_v6 = vadd.f32 %v1568_v44, %v4896_v53 }
 0x18a   : > { %v5243_v50 = vpop.f32.mrf.mxu2  ;;  %v2465_v16 = vmul.f32 %v5255_v39, %v2303_v54 }
 0x18b   : > { %v2649_v41 = vrot.slane %v2648_v59, 1  ;;  %v1698_v1 = vadd.f32 %v4833_v13, %v1569_v6  ;;  %v2971_v6 = vunpack.c.l.b16 %v2871_v46 }
 0x18d   : > { %v2650_v27 = vmax.f32 %v2648_v59, %v2649_v41  ;;  %v2340_v43 = vmax.f32 %v1698_v1, 0.0  ;;  %v2183_v18 = vpop.f32.mrf.mxu3  ;;  %v965_v59 = vshrl.u32 %v4568_v7, 16 }
 0x18e   : > { %v2184_v57 = vadd.f32 %v2183_v18, %v2055_v35  ;;  %v2057_v3 = vpop.f32.mrf.mxu1 }
 0x18f   : > { %v2874_v44 = vpack.c.bf16 %v2650_v27, %v2650_v27  ;;  %v2502_v13 = vmul.f32 %v4947_v15, %v2340_v43  ;;  %v967_v35 = vrot.slane %v965_v59, 1  ;;  %v968_v27 = vrot.slane %v6269_v23, 2 }
 0x190   : > { %v2306_v37 = vmax.f32 %v2184_v57, 0.0  ;;  %v1571_v18 = vpop.f32.mrf.mxu0 }
 0x191   : > { %v2974_v38 = vunpack.c.l.b16 %v2874_v44  ;;  %v2673_v52 = vmax.f32 %v2499_v29, %v2502_v13  ;;  %v1572_v41 = vadd.f32 %v1571_v18, %v4896_v53  ;;  %2096 = vmatmul.bf16.gmra.mxu1 %v4963_v20  ;;  %v2058_v20 = vadd.f32 %v2057_v3, %v5223_v10  ;;  %v714_v18 = vpop.permute.xlu0 %713 }
 0x192   : > { %v5263_v2 = vpop.f32.mrf.mxu2  ;;  %v2468_v1 = vmul.f32 %v5261_v31, %v2306_v37  ;;  %3590 = vmatmul.msk.bf16.gmra.mxu3 %vm1076_vm1, %v4585_v32  ;;  %v969_v54 = vor.u32 %v968_v27, %v967_v35 }
 0x193   : > { %v5278_v43 = vsel %vm2995_vm7, %v2974_v38, %v2971_v6  ;;  %v1701_v46 = vadd.f32 %v4853_v34, %v1572_v41  ;;  %1610 = vmatmul.bf16.gmra.mxu0 %v5266_v61  ;;  %v5290_v34 = vld [vmem:[%s6123_s3 + $0x40] sm:$0xff] }
 0x194   : > { %v2629_v8 = vmax.f32 %v2465_v16, %v2468_v1  ;;  %v970_v7 = vsel %vm834_vm3, %v5236_v60, %v969_v54  ;;  %v1110_v60 = vsel %vm1076_vm1, %v4804_v55, %v714_v18  ;;  %v819_v1 = vpop.permute.xlu1 %818 }
 0x195   : > { %v2343_v57 = vmax.f32 %v1701_v46, 0.0  ;;  %v2186_v44 = vpop.f32.mrf.mxu3  ;;  %1017 = vrot.lane.b32.xlu2 %v970_v7, %s3933_s16  ;;  %v1159_v54 = vsel %vm1125_vm5, %v1110_v60, %v819_v1  ;;  %v5306_v7 = vld [vmem:[%s6123_s3 + $0x58] sm:$0xff] }
 0x196   : > { %v2187_v29 = vadd.f32 %v2186_v44, %v2058_v20  ;;  %v2059_v13 = vpop.f32.mrf.mxu1 }
 0x197   : > { %1858 = vmatmul.bf16.gmra.mxu2 %v5177_v24  ;;  %v2505_v37 = vmul.f32 %v4977_v26, %v2343_v57  ;;  %v2060_v27 = vadd.f32 %v2059_v13, %v5223_v10  ;;  %v1004_v57 = vpop.permute.xlu2 %1003 }
 0x198   : > { %v2309_v3 = vmax.f32 %v2187_v29, 0.0  ;;  %v1573_v6 = vpop.f32.mrf.mxu0 }
 0x199   : > { %v2674_v38 = vmax.f32 %v2673_v52, %v2505_v37  ;;  %v1574_v41 = vadd.f32 %v1573_v6, %v4896_v53 }
 0x19a   : > { %v5293_v59 = vpop.f32.mrf.mxu2  ;;  %v2471_v16 = vmul.f32 %v5290_v34, %v2309_v3 }
 0x19b   : > { %v1703_v35 = vadd.f32 %v4868_v28, %v1574_v41 }
 0x19c   : > { %v2630_v23 = vmax.f32 %v2629_v8, %v2471_v16  ;;  %v5311_v8 = vsel %vm1174_vm6, %v1159_v54, %v1004_v57 }
 0x19d   : > { %v2346_v46 = vmax.f32 %v1703_v35, 0.0  ;;  %v2188_v20 = vpop.f32.mrf.mxu3 }
 0x19e   : > { %v2189_v44 = vadd.f32 %v2188_v20, %v2060_v27  ;;  %v2062_v52 = vpop.f32.mrf.mxu1  ;;  %v5326_v27 = vld [vmem:[%s6123_s3 + $0x70] sm:$0xff] }
 0x19f   : > { %v2508_v29 = vmul.f32 %v5004_v22, %v2346_v46  ;;  %v2063_v16 = vadd.f32 %v2062_v52, %v5223_v10  ;;  %v821_v52 = vpop.permute.xlu1 %820 }
 0x1a0   : > { %v2312_v55 = vmax.f32 %v2189_v44, 0.0  ;;  %v1576_v28 = vpop.f32.mrf.mxu0 }
 0x1a1   : > { %v2675_v13 = vmax.f32 %v2674_v38, %v2508_v29  ;;  %v1577_v18 = vadd.f32 %v1576_v28, %v4896_v53  ;;  %2101 = vmatmul.bf16.gmra.mxu1 %v5019_v45 }
 0x1a2   : > { %v5308_v37 = vpop.f32.mrf.mxu2  ;;  %v2474_v3 = vmul.f32 %v5306_v7, %v2312_v55  ;;  %3591 = vmatmul.msk.bf16.gmra.mxu3 %vm1076_vm1, %v4091_v30  ;;  %v716_v30 = vpop.permute.xlu0 %715 }
 0x1a3   : > { %v1706_v6 = vadd.f32 %v4892_v17, %v1577_v18  ;;  %1615 = vmatmul.bf16.gmra.mxu0 %v5311_v8  ;;  %v1112_v44 = vsel %vm1076_vm1, %v4844_v21, %v716_v30 }
 0x1a4   : > { %v2631_v41 = vmax.f32 %v2630_v23, %v2474_v3 }
 0x1a5   : > { %v2349_v60 = vmax.f32 %v1706_v6, 0.0  ;;  %v2191_v38 = vpop.f32.mrf.mxu3  ;;  %v1161_v6 = vsel %vm1125_vm5, %v1112_v44, %v821_v52 }
 0x1a6   : > { %v2192_v1 = vadd.f32 %v2191_v38, %v2063_v16  ;;  %v2064_v35 = vpop.f32.mrf.mxu1  ;;  %v1006_v16 = vpop.permute.xlu2 %1005 }
 0x1a7   : > { %1863 = vmatmul.bf16.gmra.mxu2 %v5226_v5  ;;  %v2511_v45 = vmul.f32 %v5036_v48, %v2349_v60  ;;  %v2065_v28 = vadd.f32 %v2064_v35, %v5223_v10 }
 0x1a8   : > { %v2315_v17 = vmax.f32 %v2192_v1, 0.0  ;;  %v1578_v23 = vpop.f32.mrf.mxu0  ;;  %v5341_v1 = vld [vmem:[%s6123_s3 + $0x88] sm:$0xff] }
 0x1a9   : > { %v2676_v20 = vmax.f32 %v2675_v13, %v2511_v45  ;;  %v1579_v54 = vadd.f32 %v1578_v23, %v4896_v53 }
 0x1aa   : > { %v5328_v46 = vpop.f32.mrf.mxu2  ;;  %v2477_v57 = vmul.f32 %v5326_v27, %v2315_v17 }
 0x1ab   : > { %v1708_v29 = vadd.f32 %v4911_v25, %v1579_v54 }
 0x1ac   : > { %v2632_v55 = vmax.f32 %v2631_v41, %v2477_v57  ;;  %v5346_v41 = vsel %vm1174_vm6, %v1161_v6, %v1006_v16 }
 0x1ad   : > { %v2352_v18 = vmax.f32 %v1708_v29, 0.0  ;;  %v2193_v3 = vpop.f32.mrf.mxu3 }
 0x1ae   : > { %v2194_v60 = vadd.f32 %v2193_v3, %v2065_v28  ;;  %v2067_v13 = vpop.f32.mrf.mxu1 }
 0x1af   : > { %v2514_v38 = vmul.f32 %v5060_v0, %v2352_v18  ;;  %v2068_v57 = vadd.f32 %v2067_v13, %v5223_v10  ;;  %v718_v18 = vpop.permute.xlu0 %717 }
 0x1b0   : > { %v2318_v21 = vmax.f32 %v2194_v60, 0.0  ;;  %v1581_v25 = vpop.f32.mrf.mxu0  ;;  %v6271_v60 = vld [vmem:[#allocation59_spill] sm:$0xff] }
 0x1b1   : > { %v2677_v35 = vmax.f32 %v2676_v20, %v2514_v38  ;;  %2106 = vmatmul.bf16.gmra.mxu1 %v5075_v47  ;;  %v1582_v23 = vadd.f32 %v1581_v25, %v4896_v53  ;;  %v3766_v20 = vld [vmem:[%s6124_s4 + $0x38] sm:$0xff]  ;;  %v1114_v13 = vsel %vm1076_vm1, %v6271_v60, %v718_v18  ;;  %v823_v38 = vpop.permute.xlu1 %822 }
 0x1b2   : > { %v5343_v45 = vpop.f32.mrf.mxu2  ;;  %v2480_v30 = vmul.f32 %v5341_v1, %v2318_v21  ;;  %3592 = vmatmul.msk.bf16.gmra.mxu3 %vm1076_vm1, %v4134_v9  ;;  %3173 = vmatpush.bf16.msra.mxu2 %v3766_v20  ;;  %v1008_v20 = vpop.permute.xlu2 %1007 }
 0x1b3   : > { %v2678_v17 = vrot.slane %v2677_v35, 4  ;;  %1620 = vmatmul.bf16.gmra.mxu0 %v5346_v41  ;;  %v1711_v28 = vadd.f32 %v4955_v4, %v1582_v23  ;;  %v1163_v23 = vsel %vm1125_vm5, %v1114_v13, %v823_v38  ;;  %v6272_v38 = vld [vmem:[#allocation10_spill] sm:$0xff] }
 0x1b4   : > { %v5354_v54 = vmax.f32 %v2632_v55, %v2480_v30 }
 0x1b5   : > { %v2679_v44 = vmax.f32 %v2677_v35, %v2678_v17  ;;  %v2196_v47 = vpop.f32.mrf.mxu3  ;;  %v2355_v25 = vmax.f32 %v1711_v28, 0.0 }
 0x1b6   : > { %v2197_v52 = vadd.f32 %v2196_v47, %v2068_v57  ;;  %v2069_v29 = vpop.f32.mrf.mxu1 }
 0x1b7   : > { %1868 = vmatmul.bf16.gmra.mxu2 %v5266_v61  ;;  %v2680_v9 = vrot.slane %v2679_v44, 2  ;;  %v2070_v30 = vadd.f32 %v2069_v29, %v5223_v10  ;;  %v5375_v29 = vsel %vm1174_vm6, %v1163_v23, %v1008_v20 }
 0x1b8   : > { %v1583_v55 = vpop.f32.mrf.mxu0  ;;  %v2321_v47 = vmax.f32 %v2197_v52, 0.0 }
 0x1b9   : > { %v2681_v6 = vmax.f32 %v2679_v44, %v2680_v9  ;;  %v1584_v16 = vadd.f32 %v1583_v55, %v4896_v53 }
 0x1ba   : > { %v5362_v3 = vpop.f32.mrf.mxu2  ;;  %v2483_v52 = vmul.f32 %v5255_v39, %v2321_v47 }
 0x1bb   : > { %6270 = vst [vmem:[#allocation85_spill] sm:$0xff] %v5362_v3  ;;  %v2682_v21 = vrot.slane %v2681_v6, 1  ;;  %v1713_v35 = vadd.f32 %v4982_v42, %v1584_v16  ;;  %v2517_v3 = vmul.f32 %v4942_v40, %v2355_v25 }
 0x1bd   : > { %v2683_v17 = vmax.f32 %v2681_v6, %v2682_v21  ;;  %v2358_v57 = vmax.f32 %v1713_v35, 0.0  ;;  %v2198_v4 = vpop.f32.mrf.mxu3 }
 0x1be   : > { %v2199_v44 = vadd.f32 %v2198_v4, %v2070_v30  ;;  %v2072_v9 = vpop.f32.mrf.mxu1  ;;  %v720_v4 = vpop.permute.xlu0 %719 }
 0x1bf   : > { %v2877_v55 = vpack.c.bf16 %v2683_v17, %v2683_v17  ;;  %v2520_v18 = vmul.f32 %v4947_v15, %v2358_v57  ;;  %v2073_v25 = vadd.f32 %v2072_v9, %v5223_v10 }
 0x1c0   : > { %v2324_v28 = vmax.f32 %v2199_v44, 0.0  ;;  %v1586_v42 = vpop.f32.mrf.mxu0 }
 0x1c1   : > { %v2977_v6 = vunpack.c.l.b16 %v2877_v55  ;;  %v2706_v16 = vmax.f32 %v2517_v3, %v2520_v18  ;;  %v1587_v13 = vadd.f32 %v1586_v42, %v4896_v53  ;;  %2111 = vmatmul.bf16.gmra.mxu1 %v5131_v14  ;;  %v6273_v55 = vld [vmem:[#allocation60_spill] sm:$0xff]  ;;  %v825_v18 = vpop.permute.xlu1 %824 }
 0x1c2   : > { %v5372_v60 = vpop.f32.mrf.mxu2  ;;  %v2486_v40 = vmul.f32 %v5261_v31, %v2324_v28  ;;  %3593 = vmatmul.msk.bf16.gmra.mxu3 %vm1076_vm1, %v6272_v38  ;;  %v1116_v9 = vsel %vm1076_vm1, %v6273_v55, %v720_v4 }
 0x1c3   : > { %v5385_v15 = vsel %vm2997_vm8, %v2977_v6, %v5278_v43  ;;  %v1716_v21 = vadd.f32 %v5012_v36, %v1587_v13  ;;  %1625 = vmatmul.bf16.gmra.mxu0 %v5375_v29 }
 0x1c4   : > { %v2662_v3 = vmax.f32 %v2483_v52, %v2486_v40  ;;  %v1165_v52 = vsel %vm1125_vm5, %v1116_v9, %v825_v18  ;;  %v1010_v40 = vpop.permute.xlu2 %1009 }
 0x1c5   : > { %v2361_v35 = vmax.f32 %v1716_v21, 0.0  ;;  %v2201_v14 = vpop.f32.mrf.mxu3 }
 0x1c6   : > { %v2202_v30 = vadd.f32 %v2201_v14, %v2073_v25  ;;  %v2074_v17 = vpop.f32.mrf.mxu1  ;;  %v722_v9 = vpop.permute.xlu0 %721 }
 0x1c7   : > { %1873 = vmatmul.bf16.gmra.mxu2 %v5311_v8  ;;  %v2523_v57 = vmul.f32 %v4977_v26, %v2361_v35  ;;  %v2075_v6 = vadd.f32 %v2074_v17, %v5223_v10 }
 0x1c8   : > { %v2327_v23 = vmax.f32 %v2202_v30, 0.0  ;;  %v1588_v43 = vpop.f32.mrf.mxu0  ;;  %v5405_v30 = vsel %vm1174_vm6, %v1165_v52, %v1010_v40 }
 0x1c9   : > { %v2707_v47 = vmax.f32 %v2706_v16, %v2523_v57  ;;  %v1589_v36 = vadd.f32 %v1588_v43, %v4896_v53  ;;  %v6275_v57 = vld [vmem:[#allocation13_spill] sm:$0xff]  ;;  %v827_v40 = vpop.permute.xlu1 %826 }
 0x1ca   : > { %v5392_v20 = vpop.f32.mrf.mxu2  ;;  %v2489_v44 = vmul.f32 %v5290_v34, %v2327_v23 }
 0x1cb   : > { %v1718_v28 = vadd.f32 %v5041_v49, %v1589_v36 }
 0x1cc   : > { %v2663_v42 = vmax.f32 %v2662_v3, %v2489_v44 }
 0x1cd   : > { %v2364_v26 = vmax.f32 %v1718_v28, 0.0  ;;  %v2203_v13 = vpop.f32.mrf.mxu3 }
 0x1ce   : > { %v2204_v38 = vadd.f32 %v2203_v13, %v2075_v6  ;;  %v2077_v16 = vpop.f32.mrf.mxu1  ;;  %v6277_v13 = vld [vmem:[#allocation65_spill] sm:$0xff] }
 0x1cf   : > { %v2526_v21 = vmul.f32 %v5004_v22, %v2364_v26  ;;  %v2078_v23 = vadd.f32 %v2077_v16, %v5223_v10  ;;  %v1118_v52 = vsel %vm1076_vm1, %v6277_v13, %v722_v9  ;;  %v6278_v16 = vld [vmem:[#allocation73_spill] sm:$0xff] }
 0x1d0   : > { %v2330_v25 = vmax.f32 %v2204_v38, 0.0  ;;  %v1591_v14 = vpop.f32.mrf.mxu0 }
 0x1d1   : > { %v2708_v49 = vmax.f32 %v2707_v47, %v2526_v21  ;;  %v1592_v3 = vadd.f32 %v1591_v14, %v4896_v53  ;;  %2116 = vmatmul.bf16.gmra.mxu1 %v5177_v24  ;;  %v2634_v24 = vrot.slane %v5354_v54, 4 }
 0x1d2   : > { %v5402_v35 = vpop.f32.mrf.mxu2  ;;  %v2492_v17 = vmul.f32 %v5306_v7, %v2330_v25  ;;  %3594 = vmatmul.msk.bf16.gmra.mxu3 %vm1076_vm1, %v6275_v57 }
 0x1d3   : > { %6274 = vst [vmem:[#allocation59_spill] sm:$0xff] %v5402_v35  ;;  %v1721_v4 = vadd.f32 %v5068_v11, %v1592_v3  ;;  %1630 = vmatmul.bf16.gmra.mxu0 %v5405_v30  ;;  %v2635_v38 = vmax.f32 %v5354_v54, %v2634_v24  ;;  %v6280_v24 = vld [vmem:[#allocation6_spill] sm:$0xff] }
 0x1d4   : > { %v2664_v22 = vmax.f32 %v2663_v42, %v2492_v17  ;;  %v1167_v17 = vsel %vm1125_vm5, %v1118_v52, %v827_v40 }
 0x1d5   : > { %v2367_v43 = vmax.f32 %v1721_v4, 0.0  ;;  %v2206_v47 = vpop.f32.mrf.mxu3 }
 0x1d6   : > { %v2207_v36 = vadd.f32 %v2206_v47, %v2078_v23  ;;  %v2079_v44 = vpop.f32.mrf.mxu1  ;;  %v2636_v23 = vrot.slane %v2635_v38, 2 }
 0x1d7   : > { %1878 = vmatmul.bf16.gmra.mxu2 %v5346_v41  ;;  %v2529_v55 = vmul.f32 %v5036_v48, %v2367_v43  ;;  %v2080_v48 = vadd.f32 %v2079_v44, %v5223_v10 }
 0x1d8   : > { %v2333_v18 = vmax.f32 %v2207_v36, 0.0  ;;  %v1593_v11 = vpop.f32.mrf.mxu0  ;;  %v2637_v9 = vmax.f32 %v2635_v38, %v2636_v23  ;;  %v724_v38 = vpop.permute.xlu0 %723 }
 0x1d9   : > { %v2709_v6 = vmax.f32 %v2708_v49, %v2529_v55  ;;  %v1594_v42 = vadd.f32 %v1593_v11, %v4896_v53  ;;  %v1012_v49 = vpop.permute.xlu2 %1011  ;;  %v829_v23 = vpop.permute.xlu1 %828 }
 0x1da   : > { %v5418_v28 = vpop.f32.mrf.mxu2  ;;  %v2495_v26 = vmul.f32 %v5326_v27, %v2333_v18  ;;  %v5432_v54 = vsel %vm1174_vm6, %v1167_v17, %v1012_v49  ;;  %v2638_v40 = vrot.slane %v2637_v9, 1 }
 0x1db   : > { %6276 = vst [vmem:[#allocation10_spill] sm:$0xff] %v5418_v28  ;;  %v1723_v21 = vadd.f32 %v6278_v16, %v1594_v42 }
 0x1dc   : > { %v2665_v25 = vmax.f32 %v2664_v22, %v2495_v26 }
 0x1dd   : > { %v2370_v14 = vmax.f32 %v1723_v21, 0.0  ;;  %v2208_v3 = vpop.f32.mrf.mxu3 }
 0x1de   : > { %v2209_v57 = vadd.f32 %v2208_v3, %v2080_v48  ;;  %v2082_v4 = vpop.f32.mrf.mxu1  ;;  %v3765_v48 = vld [vmem:[%s6124_s4 + $0x30] sm:$0xff] }
 0x1df   : > { %v2532_v43 = vmul.f32 %v5060_v0, %v2370_v14  ;;  %v2083_v42 = vadd.f32 %v2082_v4, %v5223_v10  ;;  %3174 = vmatpush.bf16.msra.mxu2 %v3765_v48  ;;  %v1120_v4 = vsel %vm1076_vm1, %v5093_v33, %v724_v38 }
 0x1e0   : > { %v2336_v47 = vmax.f32 %v2209_v57, 0.0  ;;  %v1596_v55 = vpop.f32.mrf.mxu0 }
 0x1e1   : > { %v2710_v22 = vmax.f32 %v2709_v6, %v2532_v43  ;;  %2121 = vmatmul.bf16.gmra.mxu1 %v5226_v5  ;;  %v1597_v11 = vadd.f32 %v1596_v55, %v4896_v53  ;;  %v2639_v43 = vmax.f32 %v2637_v9, %v2638_v40  ;;  %v5457_v9 = vld [vmem:[%s6123_s3] sm:$0xff] }
 0x1e2   : > { %v5429_v36 = vpop.f32.mrf.mxu2  ;;  %v2498_v44 = vmul.f32 %v5341_v1, %v2336_v47  ;;  %3595 = vmatmul.msk.bf16.gmra.mxu3 %vm1076_vm1, %v6280_v24 }
 0x1e3   : > { %6279 = vst [vmem:[#allocation60_spill] sm:$0xff] %v5429_v36  ;;  %v2711_v18 = vrot.slane %v2710_v22, 4  ;;  %1635 = vmatmul.bf16.gmra.mxu0 %v5432_v54  ;;  %v1726_v21 = vadd.f32 %v5123_v62, %v1597_v11  ;;  %v2873_v33 = vpack.c.bf16 %v2639_v43, %v2639_v43 }
 0x1e4   : > { %v2666_v0 = vmax.f32 %v2665_v25, %v2498_v44 }
 0x1e5   : > { %v2712_v26 = vmax.f32 %v2710_v22, %v2711_v18  ;;  %v2211_v6 = vpop.f32.mrf.mxu3  ;;  %v2373_v47 = vmax.f32 %v1726_v21, 0.0 }
 0x1e6   : > { %v2667_v13 = vrot.slane %v2666_v0, 4  ;;  %v2212_v5 = vadd.f32 %v2211_v6, %v2083_v42  ;;  %v2084_v52 = vpop.f32.mrf.mxu1  ;;  %v1014_v42 = vpop.permute.xlu2 %1013 }
 0x1e7   : > { %1883 = vmatmul.bf16.gmra.mxu2 %v5375_v29  ;;  %v2713_v16 = vrot.slane %v2712_v26, 2  ;;  %v2085_v44 = vadd.f32 %v2084_v52, %v5223_v10  ;;  %v5463_v52 = vld [vmem:[%s6123_s3 + $0x18] sm:$0xff] }
 0x1e8   : > { %v2668_v14 = vmax.f32 %v2666_v0, %v2667_v13  ;;  %v1598_v3 = vpop.f32.mrf.mxu0  ;;  %v1169_v0 = vsel %vm1125_vm5, %v1120_v4, %v829_v23  ;;  %v2339_v6 = vmax.f32 %v2212_v5, 0.0 }
 0x1e9   : > { %v2714_v17 = vmax.f32 %v2712_v26, %v2713_v16  ;;  %v1599_v49 = vadd.f32 %v1598_v3, %v4896_v53  ;;  %v5469_v3 = vsel %vm1174_vm6, %v1169_v0, %v1014_v42 }
 0x1ea   : > { %v5446_v25 = vpop.f32.mrf.mxu2  ;;  %v2669_v57 = vrot.slane %v2668_v14, 2  ;;  %v2501_v23 = vmul.f32 %v5255_v39, %v2339_v6  ;;  %v726_v6 = vpop.permute.xlu0 %725 }
 0x1eb   : > { %6281 = vst [vmem:[#allocation13_spill] sm:$0xff] %v5446_v25  ;;  %v2715_v62 = vrot.slane %v2714_v17, 1  ;;  %v1728_v55 = vadd.f32 %v5145_v12, %v1599_v49  ;;  %v2535_v12 = vmul.f32 %v5457_v9, %v2373_v47 }
 0x1ec   : > { %v2670_v22 = vmax.f32 %v2668_v14, %v2669_v57 }
 0x1ed   : > { %v2716_v24 = vmax.f32 %v2714_v17, %v2715_v62  ;;  %v2376_v18 = vmax.f32 %v1728_v55, 0.0  ;;  %v2213_v11 = vpop.f32.mrf.mxu3  ;;  %v6283_v62 = vld [vmem:[#allocation8_spill] sm:$0xff] }
 0x1ee   : > { %v2671_v26 = vrot.slane %v2670_v22, 1  ;;  %v2214_v13 = vadd.f32 %v2213_v11, %v2085_v44  ;;  %v2087_v16 = vpop.f32.mrf.mxu1 }
 0x1ef   : > { %v2880_v38 = vpack.c.bf16 %v2716_v24, %v2716_v24  ;;  %v2538_v40 = vmul.f32 %v5463_v52, %v2376_v18 }
 0x1f0   : > { %v2672_v5 = vmax.f32 %v2670_v22, %v2671_v26  ;;  %v2342_v21 = vmax.f32 %v2214_v13, 0.0  ;;  %v1601_v14 = vpop.f32.mrf.mxu0  ;;  %v2973_v22 = vunpack.c.l.b16 %v2873_v33 }
 0x1f1   : > { %v2980_v17 = vunpack.c.l.b16 %v2880_v38  ;;  %v2739_v49 = vmax.f32 %v2535_v12, %v2538_v40  ;;  %v1602_v57 = vadd.f32 %v1601_v14, %v4896_v53  ;;  %2126 = vmatmul.bf16.gmra.mxu1 %v5266_v61  ;;  %v2088_v61 = vadd.f32 %v2087_v16, %v5223_v10  ;;  %v6285_v14 = vld [vmem:[#allocation82_spill] sm:$0xff] }
 0x1f2   : > { %v5466_v48 = vpop.f32.mrf.mxu2  ;;  %v2876_v4 = vpack.c.bf16 %v2672_v5, %v2672_v5  ;;  %v2504_v43 = vmul.f32 %v5261_v31, %v2342_v21  ;;  %3596 = vmatmul.msk.bf16.gmra.mxu3 %vm1076_vm1, %v6283_v62  ;;  %v1122_v5 = vsel %vm1076_vm1, %v5104_v63, %v726_v6  ;;  %v831_v21 = vpop.permute.xlu1 %830  ;;  %v6287_v6 = vld [vmem:[#allocation11_spill] sm:$0xff] }
 0x1f3   : > { %6282 = vst [vmem:[#allocation65_spill] sm:$0xff] %v5466_v48  ;;  %v5479_v47 = vsel %vm2999_vm9, %v2980_v17, %v5385_v15  ;;  %v1731_v55 = vadd.f32 %v5170_v19, %v1602_v57  ;;  %1640 = vmatmul.bf16.gmra.mxu0 %v5469_v3  ;;  %v5491_v19 = vld [vmem:[%s6123_s3 + $0x30] sm:$0xff]  ;;  %v1171_v62 = vsel %vm1125_vm5, %v1122_v5, %v831_v21 }
 0x1f4   : > { %v2976_v44 = vunpack.c.l.b16 %v2876_v4  ;;  %v2695_v24 = vmax.f32 %v2501_v23, %v2504_v43 }
 0x1f5   : > { %v2379_v18 = vmax.f32 %v1731_v55, 0.0  ;;  %v2216_v11 = vpop.f32.mrf.mxu3  ;;  %v1016_v55 = vpop.permute.xlu2 %1015 }
 0x1f6   : > { %v5486_v0 = vsel %vm2995_vm7, %v2976_v44, %v2973_v22  ;;  %v2217_v42 = vadd.f32 %v2216_v11, %v2088_v61  ;;  %v2089_v26 = vpop.f32.mrf.mxu1  ;;  %v5506_v44 = vld [vmem:[%s6123_s3 + $0x48] sm:$0xff]  ;;  %v5512_v11 = vsel %vm1174_vm6, %v1171_v62, %v1016_v55 }
 0x1f7   : > { %1888 = vmatmul.bf16.gmra.mxu2 %v5405_v30  ;;  %v2541_v15 = vmul.f32 %v5491_v19, %v2379_v18  ;;  %v2090_v4 = vadd.f32 %v2089_v26, %v5223_v10 }
 0x1f8   : > { %v2345_v13 = vmax.f32 %v2217_v42, 0.0  ;;  %v1603_v16 = vpop.f32.mrf.mxu0 }
 0x1f9   : > { %v2740_v38 = vmax.f32 %v2739_v49, %v2541_v15  ;;  %v1604_v12 = vadd.f32 %v1603_v16, %v4896_v53 }
 0x1fa   : > { %v5494_v33 = vpop.f32.mrf.mxu2  ;;  %v2507_v40 = vmul.f32 %v5290_v34, %v2345_v13  ;;  %v6288_v13 = vld [vmem:[#allocation25_spill] sm:$0xff] }
 0x1fb   : > { %6284 = vst [vmem:[#allocation73_spill] sm:$0xff] %v5494_v33  ;;  %v1733_v17 = vadd.f32 %v6285_v14, %v1604_v12 }
 0x1fc   : > { %v2696_v57 = vmax.f32 %v2695_v24, %v2507_v40 }
 0x1fd   : > { %v2382_v23 = vmax.f32 %v1733_v17, 0.0  ;;  %v2218_v43 = vpop.f32.mrf.mxu3 }
 0x1fe   : > { %v2219_v22 = vadd.f32 %v2218_v43, %v2090_v4  ;;  %v2092_v49 = vpop.f32.mrf.mxu1  ;;  %v728_v4 = vpop.permute.xlu0 %727 }
 0x1ff   : > { %v2544_v63 = vmul.f32 %v5506_v44, %v2382_v23  ;;  %v2093_v40 = vadd.f32 %v2092_v49, %v5223_v10  ;;  %v1124_v49 = vsel %vm1076_vm1, %v5154_v51, %v728_v4  ;;  %v5544_v51 = vld [vmem:[%s6123_s3 + $0x78] sm:$0xff] }
 0x200   : > { %v2348_v61 = vmax.f32 %v2219_v22, 0.0  ;;  %v1606_v24 = vpop.f32.mrf.mxu0 }
 0x201   : > { %v2741_v42 = vmax.f32 %v2740_v38, %v2544_v63  ;;  %v1607_v26 = vadd.f32 %v1606_v24, %v4896_v53  ;;  %2131 = vmatmul.bf16.gmra.mxu1 %v5311_v8  ;;  %v5526_v8 = vld [vmem:[%s6123_s3 + $0x60] sm:$0xff]  ;;  %v833_v63 = vpop.permute.xlu1 %832 }
 0x202   : > { %v5509_v18 = vpop.f32.mrf.mxu2  ;;  %v2510_v15 = vmul.f32 %v5306_v7, %v2348_v61  ;;  %3597 = vmatmul.msk.bf16.gmra.mxu3 %vm1076_vm1, %v6287_v6  ;;  %v6289_v61 = vld [vmem:[#allocation27_spill] sm:$0xff] }
 0x203   : > { %6286 = vst [vmem:[#allocation6_spill] sm:$0xff] %v5509_v18  ;;  %v1736_v16 = vadd.f32 %v6288_v13, %v1607_v26  ;;  %1645 = vmatmul.bf16.gmra.mxu0 %v5512_v11 }
 0x204   : > { %v2697_v12 = vmax.f32 %v2696_v57, %v2510_v15 }
 0x205   : > { %v2385_v5 = vmax.f32 %v1736_v16, 0.0  ;;  %v2221_v38 = vpop.f32.mrf.mxu3  ;;  %v1173_v16 = vsel %vm1125_vm5, %v1124_v49, %v833_v63 }
 0x206   : > { %v2222_v21 = vadd.f32 %v2221_v38, %v2093_v40  ;;  %v2094_v14 = vpop.f32.mrf.mxu1  ;;  %v1018_v40 = vpop.permute.xlu2 %1017  ;;  %v3854_v38 = vld [vmem:[%s6122_s2] sm:$0x7] }
 0x207   : > { %1893 = vmatmul.bf16.gmra.mxu2 %v5432_v54  ;;  %v2547_v17 = vmul.f32 %v5526_v8, %v2385_v5  ;;  %v2095_v15 = vadd.f32 %v2094_v14, %v5223_v10 }
 0x208   : > { %v2351_v23 = vmax.f32 %v2222_v21, 0.0  ;;  %v1608_v62 = vpop.f32.mrf.mxu0  ;;  %v5539_v21 = vperm.slane %v3854_v38, 1  ;;  %v6293_v38 = vld [vmem:[#allocation30_spill] sm:$0xff] }
 0x209   : > { %v2742_v57 = vmax.f32 %v2741_v42, %v2547_v17  ;;  %v1609_v55 = vadd.f32 %v1608_v62, %v4896_v53 }
 0x20a   : > { %v1854_v43 = vpop.f32.mrf.mxu2  ;;  %v2513_v22 = vmul.f32 %v5326_v27, %v2351_v23  ;;  %v5548_v23 = vsel %vm1174_vm6, %v1173_v16, %v1018_v40 }
 0x20b   : > { %v1738_v24 = vadd.f32 %v6289_v61, %v1609_v55  ;;  %v1855_v62 = vadd.f32 %v1854_v43, %v5539_v21  ;;  %v6290_v61 = vld [vmem:[#allocation14_spill] sm:$0xff] }
 0x20c   : > { %v2698_v26 = vmax.f32 %v2697_v12, %v2513_v22 }
 0x20d   : > { %v2388_v6 = vmax.f32 %v1738_v24, 0.0  ;;  %v2223_v13 = vpop.f32.mrf.mxu3 }
 0x20e   : > { %v2224_v5 = vadd.f32 %v2223_v13, %v2095_v15  ;;  %v2097_v42 = vpop.f32.mrf.mxu1  ;;  %v6291_v15 = vld [vmem:[#allocation35_spill] sm:$0xff] }
 0x20f   : > { %v2550_v12 = vmul.f32 %v5544_v51, %v2388_v6  ;;  %v2098_v43 = vadd.f32 %v2097_v42, %v5223_v10 }
 0x210   : > { %v2354_v14 = vmax.f32 %v2224_v5, 0.0  ;;  %v1611_v4 = vpop.f32.mrf.mxu0 }
 0x211   : > { %v2743_v55 = vmax.f32 %v2742_v57, %v2550_v12  ;;  %2136 = vmatmul.bf16.gmra.mxu1 %v5346_v41  ;;  %v1612_v63 = vadd.f32 %v1611_v4, %v4896_v53  ;;  %v6292_v57 = vld [vmem:[#allocation33_spill] sm:$0xff] }
 0x212   : > { %v1856_v17 = vpop.f32.mrf.mxu2  ;;  %v2516_v49 = vmul.f32 %v5341_v1, %v2354_v14  ;;  %3598 = vmatmul.msk.bf16.gmra.mxu3 %vm1076_vm1, %v6290_v61  ;;  %v1984_v16 = vadd.f32 %v6292_v57, %v1855_v62  ;;  %v6294_v57 = vld [vmem:[#allocation37_spill] sm:$0xff] }
 0x213   : > { %v1857_v22 = vadd.f32 %v1856_v17, %v5539_v21  ;;  %v2744_v24 = vrot.slane %v2743_v55, 4  ;;  %1650 = vmatmul.bf16.gmra.mxu0 %v5548_v23  ;;  %v1741_v12 = vadd.f32 %v6293_v38, %v1612_v63  ;;  %v5573_v63 = vld [vmem:[%s6123_s3 + $0x8] sm:$0xff] }
 0x214   : > { %v2699_v13 = vmax.f32 %v2698_v26, %v2516_v49  ;;  %v5566_v26 = vld [vmem:[%s6123_s3 + $0x20] sm:$0xff]  ;;  %v2374_v62 = vmax.f32 %v1984_v16, 0.0 }
 0x215   : > { %v1986_v6 = vadd.f32 %v6291_v15, %v1857_v22  ;;  %v2745_v40 = vmax.f32 %v2743_v55, %v2744_v24  ;;  %v2226_v41 = vpop.f32.mrf.mxu3 }
 0x216   : > { %v2700_v5 = vrot.slane %v2699_v13, 4  ;;  %v2227_v14 = vadd.f32 %v2226_v41, %v2098_v43  ;;  %v2099_v17 = vpop.f32.mrf.mxu1 }
 0x217   : > { %1898 = vmatmul.bf16.gmra.mxu2 %v5469_v3  ;;  %v2746_v4 = vrot.slane %v2745_v40, 2  ;;  %v2377_v61 = vmax.f32 %v1986_v6, 0.0  ;;  %v2391_v6 = vmax.f32 %v1741_v12, 0.0  ;;  %v5583_v12 = vld [vmem:[%s6123_s3 + $0x38] sm:$0xff] }
 0x218   : > { %v2701_v18 = vmax.f32 %v2699_v13, %v2700_v5  ;;  %v1613_v22 = vpop.f32.mrf.mxu0  ;;  %v6295_v5 = vld [vmem:[#allocation32_spill] sm:$0xff] }
 0x219   : > { %v2747_v55 = vmax.f32 %v2745_v40, %v2746_v4  ;;  %v1614_v24 = vadd.f32 %v1613_v22, %v4896_v53  ;;  %v2539_v43 = vmul.f32 %v5566_v26, %v2377_v61  ;;  %v2100_v40 = vadd.f32 %v2099_v17, %v5223_v10 }
 0x21a   : > { %v1859_v42 = vpop.f32.mrf.mxu2  ;;  %v2702_v15 = vrot.slane %v2701_v18, 2  ;;  %v2536_v4 = vmul.f32 %v5573_v63, %v2374_v62  ;;  %v2553_v61 = vmul.f32 %v5457_v9, %v2391_v6 }
 0x21b   : > { %v1860_v49 = vadd.f32 %v1859_v42, %v5539_v21  ;;  %v2748_v13 = vrot.slane %v2747_v55, 1  ;;  %v1743_v38 = vadd.f32 %v6295_v5, %v1614_v24 }
 0x21c   : > { %v2703_v16 = vmax.f32 %v2701_v18, %v2702_v15  ;;  %v2750_v15 = vmax.f32 %v2536_v4, %v2539_v43 }
 0x21d   : > { %v1989_v41 = vadd.f32 %v6294_v57, %v1860_v49  ;;  %v2749_v42 = vmax.f32 %v2747_v55, %v2748_v13  ;;  %v2394_v33 = vmax.f32 %v1743_v38, 0.0  ;;  %v2228_v36 = vpop.f32.mrf.mxu3  ;;  %v2357_v49 = vmax.f32 %v2227_v14, 0.0 }
 0x21e   : > { %v2704_v48 = vrot.slane %v2703_v16, 1  ;;  %v2229_v57 = vadd.f32 %v2228_v36, %v2100_v40  ;;  %v2102_v24 = vpop.f32.mrf.mxu1  ;;  %v6298_v40 = vld [vmem:[#allocation5_spill] sm:$0xff] }
 0x21f   : > { %v2380_v22 = vmax.f32 %v1989_v41, 0.0  ;;  %v2883_v18 = vpack.c.bf16 %v2749_v42, %v2749_v42  ;;  %v2556_v62 = vmul.f32 %v5463_v52, %v2394_v33  ;;  %v2519_v14 = vmul.f32 %v5255_v39, %v2357_v49  ;;  %v6296_v33 = vld [vmem:[#allocation16_spill] sm:$0xff] }
 0x220   : > { %v2705_v55 = vmax.f32 %v2703_v16, %v2704_v48  ;;  %v2360_v13 = vmax.f32 %v2229_v57, 0.0  ;;  %v1616_v5 = vpop.f32.mrf.mxu0  ;;  %v6297_v48 = vld [vmem:[#allocation39_spill] sm:$0xff]  ;;  %v2103_v39 = vadd.f32 %v2102_v24, %v5223_v10 }
 0x221   : > { %v2542_v17 = vmul.f32 %v5583_v12, %v2380_v22  ;;  %v2983_v38 = vunpack.c.l.b16 %v2883_v18  ;;  %v2772_v28 = vmax.f32 %v2553_v61, %v2556_v62  ;;  %2141 = vmatmul.bf16.gmra.mxu1 %v5375_v29  ;;  %v1617_v43 = vadd.f32 %v1616_v5, %v4896_v53  ;;  %v6299_v22 = vld [vmem:[#allocation34_spill] sm:$0xff] }
 0x222   : > { %v1861_v41 = vpop.f32.mrf.mxu2  ;;  %v2879_v36 = vpack.c.bf16 %v2705_v55, %v2705_v55  ;;  %v2522_v6 = vmul.f32 %v5261_v31, %v2360_v13  ;;  %3599 = vmatmul.msk.bf16.gmra.mxu3 %vm1076_vm1, %v6296_v33 }
 0x223   : > { %v2751_v25 = vmax.f32 %v2750_v15, %v2542_v17  ;;  %v1862_v35 = vadd.f32 %v1861_v41, %v5539_v21  ;;  %3557 = vmatmul.msk.bf16.vlgmr.msrb.gmra.mxu0 %vm1076_vm1, %v6298_v40  ;;  %v5600_v4 = vsel %vm3001_vm10, %v2983_v38, %v5479_v47  ;;  %v1746_v31 = vadd.f32 %v6299_v22, %v1617_v43  ;;  %v3764_v41 = vld [vmem:[%s6124_s4 + $0x28] sm:$0xff] }
 0x224   : > { %v2979_v29 = vunpack.c.l.b16 %v2879_v36  ;;  %v2728_v42 = vmax.f32 %v2519_v14, %v2522_v6  ;;  %v6300_v14 = vld [vmem:[#allocation41_spill] sm:$0xff]  ;;  %v6301_v43 = vld [vmem:[#allocation36_spill] sm:$0xff]  ;;  %3175 = vmatpush.bf16.msra.mxu2 %v3764_v41  ;;  %v6304_v41 = vld [vmem:[#allocation38_spill] sm:$0xff] }
 0x225   : > { %v1991_v16 = vadd.f32 %v6297_v48, %v1862_v35  ;;  %v2231_v61 = vpop.f32.mrf.mxu3  ;;  %v2397_v35 = vmax.f32 %v1746_v31, 0.0  ;;  %v5628_v22 = vld [vmem:[%s6123_s3 + $0x68] sm:$0xff] }
 0x226   : > { %v5607_v49 = vsel %vm2997_vm8, %v2979_v29, %v5486_v0  ;;  %v2232_v57 = vadd.f32 %v2231_v61, %v2103_v39  ;;  %v2104_v18 = vpop.f32.mrf.mxu1  ;;  %v5618_v0 = vld [vmem:[%s6123_s3 + $0x50] sm:$0xff] }
 0x227   : > { %1903 = vmatmul.bf16.gmra.mxu2 %v5512_v11  ;;  %v2383_v15 = vmax.f32 %v1991_v16, 0.0  ;;  %v2559_v47 = vmul.f32 %v5491_v19, %v2397_v35  ;;  %v2105_v16 = vadd.f32 %v2104_v18, %v5223_v10 }
 0x228   : > { %v2363_v17 = vmax.f32 %v2232_v57, 0.0  ;;  %v1618_v55 = vpop.f32.mrf.mxu0 }
 0x229   : > { %v1619_v13 = vadd.f32 %v1618_v55, %v4896_v53  ;;  %v2773_v5 = vmax.f32 %v2772_v28, %v2559_v47  ;;  %v2545_v36 = vmul.f32 %v5618_v0, %v2383_v15 }
 0x22a   : > { %v1864_v62 = vpop.f32.mrf.mxu2  ;;  %v2525_v38 = vmul.f32 %v5290_v34, %v2363_v17 }
 0x22b   : > { %v1865_v24 = vadd.f32 %v1864_v62, %v5539_v21  ;;  %v1748_v33 = vadd.f32 %v6301_v43, %v1619_v13  ;;  %v2752_v31 = vmax.f32 %v2751_v25, %v2545_v36  ;;  %v6303_v25 = vld [vmem:[#allocation43_spill] sm:$0xff] }
 0x22c   : > { %v2729_v48 = vmax.f32 %v2728_v42, %v2525_v38  ;;  %v6305_v36 = vld [vmem:[#allocation7_spill] sm:$0xff] }
 0x22d   : > { %v1994_v6 = vadd.f32 %v6300_v14, %v1865_v24  ;;  %v2400_v29 = vmax.f32 %v1748_v33, 0.0  ;;  %v2233_v39 = vpop.f32.mrf.mxu3  ;;  %v6302_v24 = vld [vmem:[#allocation18_spill] sm:$0xff] }
 0x22e   : > { %v2234_v28 = vadd.f32 %v2233_v39, %v2105_v16  ;;  %v2107_v34 = vpop.f32.mrf.mxu1 }
 0x22f   : > { %v2386_v40 = vmax.f32 %v1994_v6, 0.0  ;;  %v2562_v35 = vmul.f32 %v5506_v44, %v2400_v29 }
 0x230   : > { %v2366_v57 = vmax.f32 %v2234_v28, 0.0  ;;  %v1621_v42 = vpop.f32.mrf.mxu0 }
 0x231   : > { %v2548_v61 = vmul.f32 %v5628_v22, %v2386_v40  ;;  %v2774_v18 = vmax.f32 %v2773_v5, %v2562_v35  ;;  %v1622_v62 = vadd.f32 %v1621_v42, %v4896_v53  ;;  %2146 = vmatmul.bf16.gmra.mxu1 %v5405_v30  ;;  %v2108_v5 = vadd.f32 %v2107_v34, %v5223_v10 }
 0x232   : > { %v1866_v15 = vpop.f32.mrf.mxu2  ;;  %v2528_v55 = vmul.f32 %v5306_v7, %v2366_v57  ;;  %3600 = vmatmul.msk.bf16.gmra.mxu3 %vm1076_vm1, %v6302_v24  ;;  %v5647_v7 = vld [vmem:[%s6123_s3 + $0x80] sm:$0xff] }
 0x233   : > { %v2753_v47 = vmax.f32 %v2752_v31, %v2548_v61  ;;  %v1867_v17 = vadd.f32 %v1866_v15, %v5539_v21  ;;  %v1751_v38 = vadd.f32 %v6304_v41, %v1622_v62  ;;  %3558 = vmatmul.msk.bf16.gmra.mxu0 %vm1076_vm1, %v6305_v36  ;;  %v6306_v15 = vld [vmem:[#allocation40_spill] sm:$0xff]  ;;  %v6307_v41 = vld [vmem:[#allocation45_spill] sm:$0xff] }
 0x234   : > { %v2730_v14 = vmax.f32 %v2729_v48, %v2528_v55 }
 0x235   : > { %v1996_v13 = vadd.f32 %v6303_v25, %v1867_v17  ;;  %v2403_v43 = vmax.f32 %v1751_v38, 0.0  ;;  %v2236_v30 = vpop.f32.mrf.mxu3 }
 0x236   : > { %v2237_v33 = vadd.f32 %v2236_v30, %v2108_v5  ;;  %v2109_v16 = vpop.f32.mrf.mxu1 }
 0x237   : > { %v2389_v6 = vmax.f32 %v1996_v13, 0.0  ;;  %1908 = vmatmul.bf16.gmra.mxu2 %v5548_v23  ;;  %v2565_v29 = vmul.f32 %v5526_v8, %v2403_v43  ;;  %v2110_v62 = vadd.f32 %v2109_v16, %v5223_v10  ;;  %v6308_v43 = vld [vmem:[#allocation20_spill] sm:$0xff]  ;;  %v6309_v16 = vld [vmem:[#allocation47_spill] sm:$0xff] }
 0x238   : > { %v2369_v39 = vmax.f32 %v2237_v33, 0.0  ;;  %v1623_v28 = vpop.f32.mrf.mxu0 }
 0x239   : > { %v2551_v40 = vmul.f32 %v5647_v7, %v2389_v6  ;;  %v2775_v31 = vmax.f32 %v2774_v18, %v2565_v29  ;;  %v1624_v61 = vadd.f32 %v1623_v28, %v4896_v53  ;;  %v6310_v29 = vld [vmem:[#allocation9_spill] sm:$0xff] }
 0x23a   : > { %v1869_v48 = vpop.f32.mrf.mxu2  ;;  %v2531_v35 = vmul.f32 %v5326_v27, %v2369_v39 }
 0x23b   : > { %v5651_v34 = vmax.f32 %v2753_v47, %v2551_v40  ;;  %v1870_v57 = vadd.f32 %v1869_v48, %v5539_v21  ;;  %v1753_v42 = vadd.f32 %v6306_v15, %v1624_v61 }
 0x23c   : > { %v2731_v17 = vmax.f32 %v2730_v14, %v2531_v35 }
 0x23d   : > { %v2406_v55 = vmax.f32 %v1753_v42, 0.0  ;;  %v2238_v24 = vpop.f32.mrf.mxu3  ;;  %v1999_v38 = vadd.f32 %v6307_v41, %v1870_v57 }
 0x23e   : > { %v2239_v25 = vadd.f32 %v2238_v24, %v2110_v62  ;;  %v2112_v13 = vpop.f32.mrf.mxu1  ;;  %v6311_v24 = vld [vmem:[#allocation42_spill] sm:$0xff] }
 0x23f   : > { %v2568_v47 = vmul.f32 %v5544_v51, %v2406_v55  ;;  %v2392_v30 = vmax.f32 %v1999_v38, 0.0  ;;  %v2113_v48 = vadd.f32 %v2112_v13, %v5223_v10 }
 0x240   : > { %v2372_v18 = vmax.f32 %v2239_v25, 0.0  ;;  %v1626_v5 = vpop.f32.mrf.mxu0 }
 0x241   : > { %v2776_v6 = vmax.f32 %v2775_v31, %v2568_v47  ;;  %2151 = vmatmul.bf16.gmra.mxu1 %v5432_v54  ;;  %v1627_v28 = vadd.f32 %v1626_v5, %v4896_v53  ;;  %v2554_v15 = vmul.f32 %v5573_v63, %v2392_v30 }
 0x242   : > { %v1871_v36 = vpop.f32.mrf.mxu2  ;;  %v2534_v14 = vmul.f32 %v5341_v1, %v2372_v18  ;;  %3601 = vmatmul.msk.bf16.gmra.mxu3 %vm1076_vm1, %v6308_v43 }
 0x243   : > { %v1872_v27 = vadd.f32 %v1871_v36, %v5539_v21  ;;  %v2777_v33 = vrot.slane %v2776_v6, 4  ;;  %3559 = vmatmul.msk.bf16.gmra.mxu0 %vm1076_vm1, %v6310_v29  ;;  %v1756_v25 = vadd.f32 %v6311_v24, %v1627_v28 }
 0x244   : > { %v2732_v39 = vmax.f32 %v2731_v17, %v2534_v14 }
 0x245   : > { %v2001_v40 = vadd.f32 %v6309_v16, %v1872_v27  ;;  %v2778_v31 = vmax.f32 %v2776_v6, %v2777_v33  ;;  %v2241_v54 = vpop.f32.mrf.mxu3  ;;  %v6312_v6 = vld [vmem:[#allocation49_spill] sm:$0xff]  ;;  %v2409_v43 = vmax.f32 %v1756_v25, 0.0  ;;  %v6313_v33 = vld [vmem:[#allocation44_spill] sm:$0xff] }
 0x246   : > { %v2733_v35 = vrot.slane %v2732_v39, 4  ;;  %v2242_v1 = vadd.f32 %v2241_v54, %v2113_v48  ;;  %v2114_v57 = vpop.f32.mrf.mxu1 }
 0x247   : > { %v2395_v61 = vmax.f32 %v2001_v40, 0.0  ;;  %v2779_v42 = vrot.slane %v2778_v31, 2  ;;  %v2115_v30 = vadd.f32 %v2114_v57, %v5223_v10 }
 0x248   : > { %v2734_v55 = vmax.f32 %v2732_v39, %v2733_v35  ;;  %v1628_v17 = vpop.f32.mrf.mxu0  ;;  %v2375_v28 = vmax.f32 %v2242_v1, 0.0 }
 0x249   : > { %v2557_v62 = vmul.f32 %v5566_v26, %v2395_v61  ;;  %v2780_v38 = vmax.f32 %v2778_v31, %v2779_v42  ;;  %v1629_v36 = vadd.f32 %v1628_v17, %v4896_v53 }
 0x24a   : > { %v1874_v41 = vpop.f32.mrf.mxu2  ;;  %v2735_v18 = vrot.slane %v2734_v55, 2 }
 0x24b   : > { %v2783_v13 = vmax.f32 %v2554_v15, %v2557_v62  ;;  %v1875_v47 = vadd.f32 %v1874_v41, %v5539_v21  ;;  %v2781_v5 = vrot.slane %v2780_v38, 1  ;;  %v1758_v16 = vadd.f32 %v6313_v33, %v1629_v36  ;;  %v6317_v33 = vld [vmem:[#allocation12_spill] sm:$0xff] }
 0x24c   : > { %v2736_v14 = vmax.f32 %v2734_v55, %v2735_v18  ;;  %v2571_v62 = vmul.f32 %v5457_v9, %v2409_v43  ;;  %v5687_v18 = vld [vmem:[%s6123_s3 + $0x10] sm:$0xff]  ;;  %v6316_v43 = vld [vmem:[#allocation46_spill] sm:$0xff] }
 0x24d   : > { %v2004_v27 = vadd.f32 %v6312_v6, %v1875_v47  ;;  %v2782_v40 = vmax.f32 %v2780_v38, %v2781_v5  ;;  %v2243_v39 = vpop.f32.mrf.mxu3  ;;  %v2412_v31 = vmax.f32 %v1758_v16, 0.0  ;;  %v2537_v36 = vmul.f32 %v5687_v18, %v2375_v28  ;;  %v5693_v6 = vld [vmem:[%s6123_s3 + $0x28] sm:$0xff] }
 0x24e   : > { %v2737_v48 = vrot.slane %v2736_v14, 1  ;;  %v2244_v61 = vadd.f32 %v2243_v39, %v2115_v30  ;;  %v2117_v54 = vpop.f32.mrf.mxu1 }
 0x24f   : > { %v2398_v29 = vmax.f32 %v2004_v27, 0.0  ;;  %v2886_v35 = vpack.c.bf16 %v2782_v40, %v2782_v40  ;;  %v2574_v55 = vmul.f32 %v5463_v52, %v2412_v31  ;;  %v6314_v27 = vld [vmem:[#allocation22_spill] sm:$0xff]  ;;  %v2118_v39 = vadd.f32 %v2117_v54, %v5223_v10 }
 0x250   : > { %v2738_v42 = vmax.f32 %v2736_v14, %v2737_v48  ;;  %v2378_v57 = vmax.f32 %v2244_v61, 0.0  ;;  %v1631_v25 = vpop.f32.mrf.mxu0 }
 0x251   : > { %v2560_v15 = vmul.f32 %v5583_v12, %v2398_v29  ;;  %v2986_v41 = vunpack.c.l.b16 %v2886_v35  ;;  %v1632_v1 = vadd.f32 %v1631_v25, %v4896_v53  ;;  %2156 = vmatmul.bf16.gmra.mxu1 %v5469_v3  ;;  %v2805_v5 = vmax.f32 %v2571_v62, %v2574_v55  ;;  %v6315_v3 = vld [vmem:[#allocation51_spill] sm:$0xff] }
 0x252   : > { %v1876_v24 = vpop.f32.mrf.mxu2  ;;  %v2882_v47 = vpack.c.bf16 %v2738_v42, %v2738_v42  ;;  %3602 = vmatmul.msk.bf16.gmra.mxu3 %vm1076_vm1, %v6314_v27 }
 0x253   : > { %v2784_v17 = vmax.f32 %v2783_v13, %v2560_v15  ;;  %v1877_v38 = vadd.f32 %v1876_v24, %v5539_v21  ;;  %v2540_v13 = vmul.f32 %v5693_v6, %v2378_v57  ;;  %v1761_v30 = vadd.f32 %v6316_v43, %v1632_v1  ;;  %3560 = vmatmul.msk.bf16.gmra.mxu0 %vm1076_vm1, %v6317_v33  ;;  %v6318_v1 = vld [vmem:[#allocation53_spill] sm:$0xff] }
 0x254   : > { %v5704_v16 = vsel %vm3003_vm11, %v2986_v41, %v5600_v4  ;;  %v2982_v40 = vunpack.c.l.b16 %v2882_v47  ;;  %v3763_v41 = vld [vmem:[%s6124_s4 + $0x20] sm:$0xff] }
 0x255   : > { %v2006_v14 = vadd.f32 %v6315_v3, %v1877_v38  ;;  %v2761_v29 = vmax.f32 %v2537_v36, %v2540_v13  ;;  %v2415_v28 = vmax.f32 %v1761_v30, 0.0  ;;  %v2246_v31 = vpop.f32.mrf.mxu3  ;;  %3176 = vmatpush.bf16.msra.mxu2 %v3763_v41 }
 0x256   : > { %v5709_v61 = vsel %vm2999_vm9, %v2982_v40, %v5607_v49  ;;  %v2247_v35 = vadd.f32 %v2246_v31, %v2118_v39  ;;  %v2119_v15 = vpop.f32.mrf.mxu1  ;;  %v5720_v49 = vld [vmem:[%s6123_s3 + $0x40] sm:$0xff] }
 0x257   : > { %v2401_v48 = vmax.f32 %v2006_v14, 0.0  ;;  %v2577_v62 = vmul.f32 %v5491_v19, %v2415_v28 }
 0x258   : > { %v2381_v55 = vmax.f32 %v2247_v35, 0.0  ;;  %v1633_v57 = vpop.f32.mrf.mxu0  ;;  %v5734_v35 = vld [vmem:[%s6123_s3 + $0x58] sm:$0xff] }
 0x259   : > { %v2563_v42 = vmul.f32 %v5618_v0, %v2401_v48  ;;  %v2806_v25 = vmax.f32 %v2805_v5, %v2577_v62  ;;  %v1634_v13 = vadd.f32 %v1633_v57, %v4896_v53  ;;  %v6319_v48 = vld [vmem:[#allocation48_spill] sm:$0xff]  ;;  %v6321_v62 = vld [vmem:[#allocation55_spill] sm:$0xff] }
 0x25a   : > { %v1879_v4 = vpop.f32.mrf.mxu2  ;;  %v2543_v38 = vmul.f32 %v5720_v49, %v2381_v55 }
 0x25b   : > { %v2785_v24 = vmax.f32 %v2784_v17, %v2563_v42  ;;  %v1880_v54 = vadd.f32 %v1879_v4, %v5539_v21  ;;  %v2120_v17 = vadd.f32 %v2119_v15, %v5223_v10  ;;  %v1763_v28 = vadd.f32 %v6319_v48, %v1634_v13  ;;  %v6320_v42 = vld [vmem:[#allocation23_spill] sm:$0xff]  ;;  %v6322_v4 = vld [vmem:[#allocation50_spill] sm:$0xff] }
 0x25c   : > { %v2762_v36 = vmax.f32 %v2761_v29, %v2543_v38 }
 0x25d   : > { %v2009_v47 = vadd.f32 %v6318_v1, %v1880_v54  ;;  %v2248_v27 = vpop.f32.mrf.mxu3  ;;  %v2418_v41 = vmax.f32 %v1763_v28, 0.0 }
 0x25e   : > { %v2249_v3 = vadd.f32 %v2248_v27, %v2120_v17  ;;  %v2122_v14 = vpop.f32.mrf.mxu1 }
 0x25f   : > { %v2404_v5 = vmax.f32 %v2009_v47, 0.0 }
 0x260   : > { %v2384_v30 = vmax.f32 %v2249_v3, 0.0  ;;  %v1636_v40 = vpop.f32.mrf.mxu0 }
 0x261   : > { %v2566_v43 = vmul.f32 %v5628_v22, %v2404_v5  ;;  %v1637_v29 = vadd.f32 %v1636_v40, %v4896_v53  ;;  %2161 = vmatmul.bf16.gmra.mxu1 %v5512_v11  ;;  %v2123_v11 = vadd.f32 %v2122_v14, %v5223_v10 }
 0x262   : > { %v1881_v33 = vpop.f32.mrf.mxu2  ;;  %v2546_v15 = vmul.f32 %v5734_v35, %v2384_v30  ;;  %3603 = vmatmul.msk.bf16.gmra.mxu3 %vm1076_vm1, %v6320_v42  ;;  %v2580_v30 = vmul.f32 %v5506_v44, %v2418_v41 }
 0x263   : > { %v2786_v39 = vmax.f32 %v2785_v24, %v2566_v43  ;;  %v1882_v31 = vadd.f32 %v1881_v33, %v5539_v21  ;;  %v1766_v57 = vadd.f32 %v6322_v4, %v1637_v29  ;;  %v6323_v24 = vld [vmem:[#allocation15_spill] sm:$0xff] }
 0x264   : > { %3561 = vmatmul.msk.bf16.gmra.mxu0 %vm1076_vm1, %v6323_v24  ;;  %v2763_v54 = vmax.f32 %v2762_v36, %v2546_v15  ;;  %v5752_v36 = vld [vmem:[%s6123_s3 + $0x70] sm:$0xff] }
 0x265   : > { %v2011_v55 = vadd.f32 %v6321_v62, %v1882_v31  ;;  %v2251_v1 = vpop.f32.mrf.mxu3  ;;  %v2421_v13 = vmax.f32 %v1766_v57, 0.0  ;;  %v6324_v31 = vld [vmem:[#allocation52_spill] sm:$0xff] }
 0x266   : > { %v2252_v47 = vadd.f32 %v2251_v1, %v2123_v11  ;;  %v2124_v17 = vpop.f32.mrf.mxu1  ;;  %v6325_v11 = vld [vmem:[#allocation57_spill] sm:$0xff] }
 0x267   : > { %v2407_v38 = vmax.f32 %v2011_v55, 0.0  ;;  %v2583_v48 = vmul.f32 %v5526_v8, %v2421_v13  ;;  %v2125_v42 = vadd.f32 %v2124_v17, %v5223_v10  ;;  %v6326_v17 = vld [vmem:[#allocation28_spill] sm:$0xff] }
 0x268   : > { %v2387_v27 = vmax.f32 %v2252_v47, 0.0  ;;  %v1638_v43 = vpop.f32.mrf.mxu0 }
 0x269   : > { %v2569_v5 = vmul.f32 %v5647_v7, %v2407_v38  ;;  %v1639_v40 = vadd.f32 %v1638_v43, %v4896_v53 }
 0x26a   : > { %v1884_v3 = vpop.f32.mrf.mxu2  ;;  %v2549_v14 = vmul.f32 %v5752_v36, %v2387_v27 }
 0x26b   : > { %v5746_v33 = vmax.f32 %v2786_v39, %v2569_v5  ;;  %v1885_v28 = vadd.f32 %v1884_v3, %v5539_v21  ;;  %v1768_v29 = vadd.f32 %v6324_v31, %v1639_v40  ;;  %v2807_v39 = vmax.f32 %v2806_v25, %v2580_v30  ;;  %v5768_v25 = vld [vmem:[%s6123_s3 + $0x88] sm:$0xff]  ;;  %v6327_v30 = vld [vmem:[#allocation61_spill] sm:$0xff] }
 0x26c   : > { %v2764_v15 = vmax.f32 %v2763_v54, %v2549_v14  ;;  %v6328_v14 = vld [vmem:[#allocation17_spill] sm:$0xff] }
 0x26d   : > { %v2424_v62 = vmax.f32 %v1768_v29, 0.0  ;;  %v2253_v55 = vpop.f32.mrf.mxu3  ;;  %v2808_v24 = vmax.f32 %v2807_v39, %v2583_v48  ;;  %v2014_v41 = vadd.f32 %v6325_v11, %v1885_v28 }
 0x26e   : > { %v2254_v4 = vadd.f32 %v2253_v55, %v2125_v42  ;;  %v2127_v57 = vpop.f32.mrf.mxu1 }
 0x26f   : > { %v2586_v38 = vmul.f32 %v5544_v51, %v2424_v62  ;;  %v2410_v3 = vmax.f32 %v2014_v41, 0.0 }
 0x270   : > { %v2390_v1 = vmax.f32 %v2254_v4, 0.0  ;;  %v5761_v5 = vpop.f32.mrf.mxu0 }
 0x271   : > { %v2809_v13 = vmax.f32 %v2808_v24, %v2586_v38  ;;  %2166 = vmatmul.bf16.gmra.mxu1 %v5548_v23  ;;  %v2128_v23 = vadd.f32 %v2127_v57, %v5223_v10  ;;  %v2572_v55 = vmul.f32 %v5573_v63, %v2410_v3 }
 0x272   : > { %v1886_v47 = vpop.f32.mrf.mxu2  ;;  %v2552_v54 = vmul.f32 %v5768_v25, %v2390_v1  ;;  %3604 = vmatmul.msk.bf16.gmra.mxu3 %vm1076_vm1, %v6326_v17 }
 0x273   : > { %v1887_v27 = vadd.f32 %v1886_v47, %v5539_v21  ;;  %v2810_v43 = vrot.slane %v2809_v13, 4 }
 0x274   : > { %3562 = vmatmul.msk.bf16.gmra.mxu0 %vm1076_vm1, %v6328_v14  ;;  %v2765_v48 = vmax.f32 %v2764_v15, %v2552_v54 }
 0x275   : > { %v2016_v40 = vadd.f32 %v6327_v30, %v1887_v27  ;;  %v2811_v28 = vmax.f32 %v2809_v13, %v2810_v43  ;;  %v2256_v29 = vpop.f32.mrf.mxu3  ;;  %v6329_v13 = vld [vmem:[#allocation63_spill] sm:$0xff] }
 0x276   : > { %v2766_v42 = vrot.slane %v2765_v48, 4  ;;  %v2257_v39 = vadd.f32 %v2256_v29, %v2128_v23  ;;  %v2129_v62 = vpop.f32.mrf.mxu1 }
 0x277   : > { %v2413_v31 = vmax.f32 %v2016_v40, 0.0  ;;  %v2812_v4 = vrot.slane %v2811_v28, 2  ;;  %v2130_v43 = vadd.f32 %v2129_v62, %v5223_v10 }
 0x278   : > { %v2767_v11 = vmax.f32 %v2765_v48, %v2766_v42  ;;  %v1643_v38 = vpop.f32.mrf.mxu0  ;;  %v2393_v23 = vmax.f32 %v2257_v39, 0.0  ;;  %v6330_v39 = vld [vmem:[#allocation66_spill] sm:$0xff] }
 0x279   : > { %v2575_v24 = vmul.f32 %v5566_v26, %v2413_v31  ;;  %v2813_v1 = vmax.f32 %v2811_v28, %v2812_v4 }
 0x27a   : > { %v1889_v41 = vpop.f32.mrf.mxu2  ;;  %v2768_v27 = vrot.slane %v2767_v11, 2 }
 0x27b   : > { %v2816_v47 = vmax.f32 %v2572_v55, %v2575_v24  ;;  %v1890_v15 = vadd.f32 %v1889_v41, %v5539_v21  ;;  %v2814_v57 = vrot.slane %v2813_v1, 1 }
 0x27c   : > { %v2769_v17 = vmax.f32 %v2767_v11, %v2768_v27 }
 0x27d   : > { %v2019_v54 = vadd.f32 %v6329_v13, %v1890_v15  ;;  %v2815_v30 = vmax.f32 %v2813_v1, %v2814_v57  ;;  %v2258_v3 = vpop.f32.mrf.mxu3  ;;  %v2555_v1 = vmul.f32 %v5687_v18, %v2393_v23  ;;  %v6331_v13 = vld [vmem:[#allocation19_spill] sm:$0xff] }
 0x27e   : > { %v2770_v14 = vrot.slane %v2769_v17, 1  ;;  %v2259_v31 = vadd.f32 %v2258_v3, %v2130_v43  ;;  %v2132_v48 = vpop.f32.mrf.mxu1 }
 0x27f   : > { %v2416_v40 = vmax.f32 %v2019_v54, 0.0  ;;  %v2889_v29 = vpack.c.bf16 %v2815_v30, %v2815_v30 }
 0x280   : > { %v2771_v42 = vmax.f32 %v2769_v17, %v2770_v14  ;;  %v2396_v55 = vmax.f32 %v2259_v31, 0.0  ;;  %v1646_v24 = vpop.f32.mrf.mxu0  ;;  %v3762_v31 = vld [vmem:[%s6124_s4 + $0x18] sm:$0xff] }
 0x281   : > { %v2578_v28 = vmul.f32 %v5583_v12, %v2416_v40  ;;  %v2989_v41 = vunpack.c.l.b16 %v2889_v29  ;;  %3177 = vmatpush.bf16.msra.mxu2 %v3762_v31  ;;  %v6335_v31 = vld [vmem:[#allocation58_spill] sm:$0xff] }
 0x282   : > { %v1891_v4 = vpop.f32.mrf.mxu2  ;;  %v2885_v62 = vpack.c.bf16 %v2771_v42, %v2771_v42  ;;  %v2558_v27 = vmul.f32 %v5693_v6, %v2396_v55 }
 0x283   : > { %v2817_v15 = vmax.f32 %v2816_v47, %v2578_v28  ;;  %v1892_v11 = vadd.f32 %v1891_v4, %v5539_v21  ;;  %v5791_v54 = vsel %vm3005_vm12, %v2989_v41, %v5704_v16  ;;  %v2133_v47 = vadd.f32 %v2132_v48, %v5223_v10  ;;  %v3761_v41 = vld [vmem:[%s6124_s4 + $0x10] sm:$0xff] }
 0x284   : > { %3563 = vmatmul.msk.bf16.gmra.mxu0 %vm1076_vm1, %v6331_v13  ;;  %v2985_v17 = vunpack.c.l.b16 %v2885_v62  ;;  %v2794_v43 = vmax.f32 %v2555_v1, %v2558_v27  ;;  %v1644_v16 = vadd.f32 %v1643_v38, %v4896_v53  ;;  %v1647_v62 = vadd.f32 %v1646_v24, %v4896_v53  ;;  %v6332_v1 = vld [vmem:[#allocation68_spill] sm:$0xff] }
 0x285   : > { %v2021_v57 = vadd.f32 %v6330_v39, %v1892_v11  ;;  %v2261_v40 = vpop.f32.mrf.mxu3  ;;  %v1642_v11 = vadd.f32 %v5761_v5, %v4896_v53  ;;  %v6333_v27 = vld [vmem:[#allocation56_spill] sm:$0xff]  ;;  %3178 = vmatpush.bf16.msra.mxu2 %v3761_v41 }
 0x286   : > { %v5796_v3 = vsel %vm3001_vm10, %v2985_v17, %v5709_v61  ;;  %v2262_v14 = vadd.f32 %v2261_v40, %v2133_v47  ;;  %v2134_v23 = vpop.f32.mrf.mxu1  ;;  %v1773_v39 = vadd.f32 %v6333_v27, %v1644_v16  ;;  %v3760_v5 = vld [vmem:[%s6124_s4 + $0x8] sm:$0xff] }
 0x287   : > { %v2419_v30 = vmax.f32 %v2021_v57, 0.0 }
 0x288   : > { %v2399_v28 = vmax.f32 %v2262_v14, 0.0  ;;  %v1648_v55 = vpop.f32.mrf.mxu0  ;;  %v6334_v14 = vld [vmem:[#allocation54_spill] sm:$0xff] }
 0x289   : > { %v2581_v29 = vmul.f32 %v5618_v0, %v2419_v30  ;;  %v1649_v17 = vadd.f32 %v1648_v55, %v4896_v53  ;;  %v1771_v24 = vadd.f32 %v6334_v14, %v1642_v11  ;;  %3179 = vmatpush.bf16.msra.mxu2 %v3760_v5  ;;  %v6336_v55 = vld [vmem:[#allocation62_spill] sm:$0xff]  ;;  %v3759_v11 = vld [vmem:[%s6124_s4] sm:$0xff] }
 0x28a   : > { %v1894_v42 = vpop.f32.mrf.mxu2  ;;  %v2561_v61 = vmul.f32 %v5720_v49, %v2399_v28 }
 0x28b   : > { %v2818_v48 = vmax.f32 %v2817_v15, %v2581_v29  ;;  %v1895_v4 = vadd.f32 %v1894_v42, %v5539_v21  ;;  %v2135_v15 = vadd.f32 %v2134_v23, %v5223_v10  ;;  %v1776_v29 = vadd.f32 %v6335_v31, %v1647_v62 }
 0x28c   : > { %v2795_v57 = vmax.f32 %v2794_v43, %v2561_v61  ;;  %v2430_v43 = vmax.f32 %v1773_v39, 0.0  ;;  %v1778_v61 = vadd.f32 %v6336_v55, %v1649_v17  ;;  %v2427_v62 = vmax.f32 %v1771_v24, 0.0  ;;  %v6337_v39 = vld [vmem:[#allocation70_spill] sm:$0xff] }
 0x28d   : > { %v2024_v38 = vadd.f32 %v6332_v1, %v1895_v4  ;;  %v2263_v47 = vpop.f32.mrf.mxu3  ;;  %v2433_v27 = vmax.f32 %v1776_v29, 0.0  ;;  %3180 = vmatpush.bf16.msra.mxu2 %v3759_v11 }
 0x28e   : > { %v2264_v30 = vadd.f32 %v2263_v47, %v2135_v15  ;;  %v2137_v40 = vpop.f32.mrf.mxu1  ;;  %v2592_v5 = vmul.f32 %v5463_v52, %v2430_v43  ;;  %v2436_v14 = vmax.f32 %v1778_v61, 0.0  ;;  %v2589_v24 = vmul.f32 %v5457_v9, %v2427_v62  ;;  %v6340_v9 = vld [vmem:[#allocation67_spill] sm:$0xff] }
 0x28f   : > { %v2422_v13 = vmax.f32 %v2024_v38, 0.0  ;;  %v2138_v17 = vadd.f32 %v2137_v40, %v5223_v10  ;;  %v2595_v29 = vmul.f32 %v5491_v19, %v2433_v27 }
 0x290   : > { %v2402_v28 = vmax.f32 %v2264_v30, 0.0  ;;  %v1651_v42 = vpop.f32.mrf.mxu0  ;;  %v6339_v30 = vld [vmem:[#allocation21_spill] sm:$0xff]  ;;  %v2598_v40 = vmul.f32 %v5506_v44, %v2436_v14 }
 0x291   : > { %v2584_v16 = vmul.f32 %v5628_v22, %v2422_v13  ;;  %v1652_v1 = vadd.f32 %v1651_v42, %v4896_v53  ;;  %v6338_v13 = vld [vmem:[#allocation64_spill] sm:$0xff]  ;;  %v6341_v44 = vld [vmem:[#allocation69_spill] sm:$0xff] }
 0x292   : > { %v1896_v23 = vpop.f32.mrf.mxu2  ;;  %v2564_v38 = vmul.f32 %v5734_v35, %v2402_v28 }
 0x293   : > { %v2819_v4 = vmax.f32 %v2818_v48, %v2584_v16  ;;  %v1897_v41 = vadd.f32 %v1896_v23, %v5539_v21  ;;  %v1781_v47 = vadd.f32 %v6338_v13, %v1652_v1 }
 0x294   : > { %3564 = vmatmul.msk.bf16.gmra.mxu0 %vm1076_vm1, %v6339_v30  ;;  %v2796_v48 = vmax.f32 %v2795_v57, %v2564_v38  ;;  %v2838_v57 = vmax.f32 %v2589_v24, %v2592_v5 }
 0x295   : > { %v2026_v15 = vadd.f32 %v6337_v39, %v1897_v41  ;;  %v2266_v16 = vpop.f32.mrf.mxu3  ;;  %v2439_v55 = vmax.f32 %v1781_v47, 0.0 }
 0x296   : > { %v2267_v28 = vadd.f32 %v2266_v16, %v2138_v17  ;;  %v2139_v23 = vpop.f32.mrf.mxu1  ;;  %v2839_v61 = vmax.f32 %v2838_v57, %v2595_v29 }
 0x297   : > { %v2425_v31 = vmax.f32 %v2026_v15, 0.0  ;;  %v2601_v11 = vmul.f32 %v5526_v8, %v2439_v55  ;;  %v2140_v27 = vadd.f32 %v2139_v23, %v5223_v10 }
 0x298   : > { %v2405_v41 = vmax.f32 %v2267_v28, 0.0  ;;  %v1653_v1 = vpop.f32.mrf.mxu0  ;;  %v2840_v39 = vmax.f32 %v2839_v61, %v2598_v40 }
 0x299   : > { %v2587_v42 = vmul.f32 %v5647_v7, %v2425_v31  ;;  %v1654_v52 = vadd.f32 %v1653_v1, %v4896_v53 }
 0x29a   : > { %v2567_v43 = vmul.f32 %v5752_v36, %v2405_v41  ;;  %v2841_v17 = vmax.f32 %v2840_v39, %v2601_v11 }
 0x29b   : > { %v5838_v38 = vmax.f32 %v2819_v4, %v2587_v42  ;;  %v1783_v62 = vadd.f32 %v6340_v9, %v1654_v52  ;;  %v1795_v4 = vadd.f32 %v6341_v44, %v5539_v21 }
 0x29c   : > { %v2797_v19 = vmax.f32 %v2796_v48, %v2567_v43 }
 0x29d   : > { %v2442_v15 = vmax.f32 %v1783_v62, 0.0  ;;  %v2268_v13 = vpop.f32.mrf.mxu3 }
 0x29e   : > { %v2269_v47 = vadd.f32 %v2268_v13, %v2140_v27  ;;  %v2142_v30 = vpop.f32.mrf.mxu1 }
 0x29f   : > { %v2604_v53 = vmul.f32 %v5544_v51, %v2442_v15  ;;  %v2143_v23 = vadd.f32 %v2142_v30, %v5223_v10  ;;  %v6342_v51 = vld [vmem:[#allocation71_spill] sm:$0xff] }
 0x2a0   : > { %v2408_v5 = vmax.f32 %v2269_v47, 0.0  ;;  %v1923_v14 = vpop.f32.mrf.mxu0  ;;  %v1797_v57 = vadd.f32 %v6342_v51, %v5539_v21 }
 0x2a1   : > { %v2842_v31 = vmax.f32 %v2841_v17, %v2604_v53  ;;  %v1924_v8 = vadd.f32 %v1923_v14, %v1795_v4  ;;  %v6343_v53 = vld [vmem:[#allocation74_spill] sm:$0xff] }
 0x2a2   : > { %v2570_v16 = vmul.f32 %v5768_v25, %v2408_v5  ;;  %v1800_v5 = vadd.f32 %v6343_v53, %v5539_v21 }
 0x2a3   : > { %v2843_v48 = vrot.slane %v2842_v31, 4  ;;  %v2302_v61 = vmax.f32 %v1924_v8, 0.0 }
 0x2a4   : > { %3565 = vmatmul.msk.bf16.gmra.mxu0 %vm1076_vm1, %v4519_v56  ;;  %v2798_v28 = vmax.f32 %v2797_v19, %v2570_v16 }
 0x2a5   : > { %v2844_v24 = vmax.f32 %v2842_v31, %v2843_v48  ;;  %v2271_v29 = vpop.f32.mrf.mxu3  ;;  %v2464_v15 = vmul.f32 %v5573_v63, %v2302_v61 }
 0x2a6   : > { %v2799_v42 = vrot.slane %v2798_v28, 4  ;;  %v2272_v55 = vadd.f32 %v2271_v29, %v2143_v23  ;;  %v2144_v41 = vpop.f32.mrf.mxu1 }
 0x2a7   : > { %v2845_v1 = vrot.slane %v2844_v24, 2  ;;  %v2145_v19 = vadd.f32 %v2144_v41, %v5223_v10 }
 0x2a8   : > { %v2800_v40 = vmax.f32 %v2798_v28, %v2799_v42  ;;  %v1925_v52 = vpop.f32.mrf.mxu0  ;;  %v2411_v30 = vmax.f32 %v2272_v55, 0.0 }
 0x2a9   : > { %v2846_v43 = vmax.f32 %v2844_v24, %v2845_v1  ;;  %v1926_v9 = vadd.f32 %v1925_v52, %v1797_v57 }
 0x2aa   : > { %v2801_v11 = vrot.slane %v2800_v40, 2  ;;  %v2573_v63 = vmul.f32 %v5687_v18, %v2411_v30 }
 0x2ab   : > { %v2847_v62 = vrot.slane %v2846_v43, 1  ;;  %v2305_v27 = vmax.f32 %v1926_v9, 0.0 }
 0x2ac   : > { %v2802_v56 = vmax.f32 %v2800_v40, %v2801_v11 }
 0x2ad   : > { %v2848_v39 = vmax.f32 %v2846_v43, %v2847_v62  ;;  %v2273_v13 = vpop.f32.mrf.mxu3  ;;  %v2467_v44 = vmul.f32 %v5566_v26, %v2305_v27 }
 0x2ae   : > { %v2803_v47 = vrot.slane %v2802_v56, 1  ;;  %v2274_v4 = vadd.f32 %v2273_v13, %v2145_v19  ;;  %v2147_v17 = vpop.f32.mrf.mxu1 }
 0x2af   : > { %v2892_v14 = vpack.c.bf16 %v2848_v39, %v2848_v39  ;;  %v2618_v8 = vmax.f32 %v2464_v15, %v2467_v44  ;;  %v2148_v1 = vadd.f32 %v2147_v17, %v5223_v10  ;;  %v3782_v44 = vld [vmem:[%s6124_s4 + $0xb8] sm:$0xff] }
 0x2b0   : > { %v2804_v31 = vmax.f32 %v2802_v56, %v2803_v47  ;;  %v2414_v16 = vmax.f32 %v2274_v4, 0.0  ;;  %v1928_v48 = vpop.f32.mrf.mxu0  ;;  %3199 = vmatpush.bf16.msra.mxu0 %v3782_v44 }
 0x2b1   : > { %v2992_v28 = vunpack.c.l.b16 %v2892_v14  ;;  %v1929_v23 = vadd.f32 %v1928_v48, %v1800_v5 }
 0x2b2   : > { %v2888_v24 = vpack.c.bf16 %v2804_v31, %v2804_v31  ;;  %v2576_v29 = vmul.f32 %v5693_v6, %v2414_v16 }
 0x2b3   : > { %v2308_v42 = vmax.f32 %v1929_v23, 0.0  ;;  %v3008_v26 = vsel %vm3007_vm13, %v2992_v28, %v5791_v54 }
 0x2b4   : > { %3566 = vmatmul.msk.bf16.gmra.mxu0 %vm1076_vm1, %v4585_v32  ;;  %v2988_v55 = vunpack.c.l.b16 %v2888_v24  ;;  %v2827_v41 = vmax.f32 %v2573_v63, %v2576_v29  ;;  %v3023_v51 = vpack.c.b16 %v3008_v26, %v3008_v26  ;;  %v6344_v32 = vld [vmem:[#allocation76_spill] sm:$0xff] }
 0x2b5   : > { %v2470_v57 = vmul.f32 %v5583_v12, %v2308_v42  ;;  %v2276_v40 = vpop.f32.mrf.mxu3  ;;  %v1802_v11 = vadd.f32 %v6344_v32, %v5539_v21  ;;  %v6346_v24 = vld [vmem:[#allocation80_spill] sm:$0xff] }
 0x2b6   : > { %v5869_v52 = vsel %vm3003_vm11, %v2988_v55, %v5796_v3  ;;  %v2277_v43 = vadd.f32 %v2276_v40, %v2148_v1  ;;  %3181 = vmatmul.bf16.vlgmr.msra.gmra.mxu2 %v3023_v51  ;;  %v2149_v61 = vpop.f32.mrf.mxu1  ;;  %v6345_v3 = vld [vmem:[#allocation78_spill] sm:$0xff]  ;;  %v1807_v63 = vadd.f32 %v6346_v24, %v5539_v21 }
 0x2b7   : > { %v2619_v9 = vmax.f32 %v2618_v8, %v2470_v57  ;;  %v1805_v47 = vadd.f32 %v6345_v3, %v5539_v21  ;;  %v2150_v53 = vadd.f32 %v2149_v61, %v5223_v10  ;;  %v3781_v8 = vld [vmem:[%s6124_s4 + $0xb0] sm:$0xff] }
 0x2b8   : > { %v2417_v54 = vmax.f32 %v2277_v43, 0.0  ;;  %v1930_v62 = vpop.f32.mrf.mxu0  ;;  %3200 = vmatpush.bf16.msra.mxu0 %v3781_v8 }
 0x2b9   : > { %v1931_v56 = vadd.f32 %v1930_v62, %v1802_v11 }
 0x2ba   : > { %v2579_v19 = vmul.f32 %v5720_v49, %v2417_v54 }
 0x2bb   : > { %v2311_v27 = vmax.f32 %v1931_v56, 0.0 }
 0x2bc   : > { %v2828_v39 = vmax.f32 %v2827_v41, %v2579_v19 }
 0x2bd   : > { %v2473_v12 = vmul.f32 %v5618_v0, %v2311_v27  ;;  %v2278_v15 = vpop.f32.mrf.mxu3 }
 0x2be   : > { %v2152_v13 = vpop.f32.mrf.mxu1  ;;  %v2279_v14 = vadd.f32 %v2278_v15, %v2150_v53 }
 0x2bf   : > { %v2620_v30 = vmax.f32 %v2619_v9, %v2473_v12  ;;  %v2153_v31 = vadd.f32 %v2152_v13, %v5223_v10  ;;  %v6347_v9 = vld [vmem:[#allocation83_spill] sm:$0xff] }
 0x2c0   : > { %v1933_v4 = vpop.f32.mrf.mxu0  ;;  %v2420_v42 = vmax.f32 %v2279_v14, 0.0  ;;  %v1810_v54 = vadd.f32 %v6347_v9, %v5539_v21  ;;  %v3779_v9 = vld [vmem:[%s6124_s4 + $0xa0] sm:$0xff] }
 0x2c1   : > { %v1934_v17 = vadd.f32 %v1933_v4, %v1805_v47  ;;  %v1812_v4 = vadd.f32 %v5220_v58, %v5539_v21  ;;  %v5911_v58 = vld [vmem:[%s6123_s3 + $0x20] sm:$0xff] }
 0x2c2   : > { %v2582_v51 = vmul.f32 %v5734_v35, %v2420_v42  ;;  %v1815_v42 = vadd.f32 %v5243_v50, %v5539_v21 }
 0x2c3   : > { %v2314_v5 = vmax.f32 %v1934_v17, 0.0  ;;  %v3780_v17 = vld [vmem:[%s6124_s4 + $0xa8] sm:$0xff] }
 0x2c4   : > { %v2829_v56 = vmax.f32 %v2828_v39, %v2582_v51  ;;  %3201 = vmatpush.bf16.msra.mxu0 %v3780_v17 }
 0x2c5   : > { %v2476_v16 = vmul.f32 %v5628_v22, %v2314_v5  ;;  %v2281_v48 = vpop.f32.mrf.mxu3 }
 0x2c6   : > { %v2282_v28 = vadd.f32 %v2281_v48, %v2153_v31  ;;  %v2154_v23 = vpop.f32.mrf.mxu1  ;;  %v5905_v48 = vld [vmem:[%s6123_s3 + $0x8] sm:$0xff] }
 0x2c7   : > { %v2621_v29 = vmax.f32 %v2620_v30, %v2476_v16  ;;  %v2155_v57 = vadd.f32 %v2154_v23, %v5223_v10 }
 0x2c8   : > { %v1935_v26 = vpop.f32.mrf.mxu0  ;;  %v2423_v41 = vmax.f32 %v2282_v28, 0.0  ;;  %3202 = vmatpush.bf16.msra.mxu0 %v3779_v9 }
 0x2c9   : > { %v1936_v55 = vadd.f32 %v1935_v26, %v1807_v63 }
 0x2ca   : > { %v2585_v61 = vmul.f32 %v5752_v36, %v2423_v41 }
 0x2cb   : > { %v2317_v1 = vmax.f32 %v1936_v55, 0.0 }
 0x2cc   : > { %v2830_v15 = vmax.f32 %v2829_v56, %v2585_v61  ;;  %v1817_v56 = vadd.f32 %v5263_v2, %v5539_v21  ;;  %v1820_v2 = vadd.f32 %v5293_v59, %v5539_v21 }
 0x2cd   : > { %v2479_v40 = vmul.f32 %v5647_v7, %v2317_v1  ;;  %v2283_v43 = vpop.f32.mrf.mxu3 }
 0x2ce   : > { %v2284_v32 = vadd.f32 %v2283_v43, %v2155_v57  ;;  %v2157_v11 = vpop.f32.mrf.mxu1  ;;  %v5919_v43 = vld [vmem:[%s6123_s3 + $0x38] sm:$0xff] }
 0x2cf   : > { %v5894_v62 = vmax.f32 %v2621_v29, %v2479_v40 }
 0x2d0   : > { %v2426_v19 = vmax.f32 %v2284_v32, 0.0  ;;  %v1938_v27 = vpop.f32.mrf.mxu0 }
 0x2d1   : > { %v1939_v12 = vadd.f32 %v1938_v27, %v1810_v54  ;;  %v2623_v59 = vrot.slane %v5894_v62, 4 }
 0x2d2   : > { %v2588_v13 = vmul.f32 %v5768_v25, %v2426_v19 }
 0x2d3   : > { %v2320_v39 = vmax.f32 %v1939_v12, 0.0 }
 0x2d4   : > { %v2831_v3 = vmax.f32 %v2830_v15, %v2588_v13  ;;  %v3778_v15 = vld [vmem:[%s6124_s4 + $0x98] sm:$0xff] }
 0x2d5   : > { %v2286_v47 = vpop.f32.mrf.mxu3  ;;  %v2482_v28 = vmul.f32 %v5905_v48, %v2320_v39  ;;  %3203 = vmatpush.bf16.msra.mxu0 %v3778_v15 }
 0x2d6   : > { %v2832_v30 = vrot.slane %v2831_v3, 4  ;;  %v2159_v44 = vpop.f32.mrf.mxu1 }
 0x2d8   : > { %v2833_v53 = vmax.f32 %v2831_v3, %v2832_v30  ;;  %v1940_v5 = vpop.f32.mrf.mxu0 }
 0x2d9   : > { %v1941_v14 = vadd.f32 %v1940_v5, %v1812_v4  ;;  %v2160_v4 = vadd.f32 %v2159_v44, %v5223_v10  ;;  %v2158_v5 = vadd.f32 %v2157_v11, %v5223_v10 }
 0x2da   : > { %v2834_v31 = vrot.slane %v2833_v53, 2 }
 0x2db   : > { %v2323_v8 = vmax.f32 %v1941_v14, 0.0 }
 0x2dc   : > { %v2835_v16 = vmax.f32 %v2833_v53, %v2834_v31 }
 0x2dd   : > { %v2485_v23 = vmul.f32 %v5911_v58, %v2323_v8  ;;  %v2288_v24 = vpop.f32.mrf.mxu3  ;;  %v3776_v8 = vld [vmem:[%s6124_s4 + $0x88] sm:$0xff] }
 0x2de   : > { %v2836_v63 = vrot.slane %v2835_v16, 1  ;;  %v2162_v29 = vpop.f32.mrf.mxu1  ;;  %v2289_v39 = vadd.f32 %v2288_v24, %v2160_v4 }
 0x2df   : > { %v2651_v26 = vmax.f32 %v2482_v28, %v2485_v23  ;;  %v2163_v14 = vadd.f32 %v2162_v29, %v5223_v10 }
 0x2e0   : > { %v2837_v55 = vmax.f32 %v2835_v16, %v2836_v63  ;;  %v2287_v16 = vadd.f32 %v2286_v47, %v2158_v5  ;;  %v2432_v63 = vmax.f32 %v2289_v39, 0.0 }
 0x2e1   : > { %v1943_v41 = vpop.f32.mrf.mxu0 }
 0x2e2   : > { %v1944_v1 = vadd.f32 %v1943_v41, %v1815_v42  ;;  %v2891_v51 = vpack.c.bf16 %v2837_v55, %v2837_v55  ;;  %v5953_v55 = vpop.f32.mrf.mxu2  ;;  %v2429_v47 = vmax.f32 %v2287_v16, 0.0 }
 0x2e4   : > { %v2326_v57 = vmax.f32 %v1944_v1, 0.0  ;;  %v2991_v40 = vunpack.c.l.b16 %v2891_v51  ;;  %v1822_v51 = vadd.f32 %v5308_v37, %v5539_v21 }
 0x2e5   : > { %v2291_v32 = vpop.f32.mrf.mxu3 }
 0x2e6   : > { %v2488_v61 = vmul.f32 %v5919_v43, %v2326_v57  ;;  %v2164_v50 = vpop.f32.mrf.mxu1  ;;  %v5927_v54 = vsel %vm3005_vm12, %v2991_v40, %v5869_v52  ;;  %v3777_v52 = vld [vmem:[%s6124_s4 + $0x90] sm:$0xff]  ;;  %v2292_v28 = vadd.f32 %v2291_v32, %v2163_v14  ;;  %v2624_v57 = vmax.f32 %v5894_v62, %v2623_v59 }
 0x2e7   : > { %3204 = vmatpush.bf16.msra.mxu0 %v3777_v52  ;;  %v2165_v44 = vadd.f32 %v2164_v50, %v5223_v10 }
 0x2e8   : > { %v2652_v19 = vmax.f32 %v2651_v26, %v2488_v61  ;;  %v3775_v26 = vld [vmem:[%s6124_s4 + $0x80] sm:$0xff]  ;;  %v2435_v41 = vmax.f32 %v2292_v28, 0.0  ;;  %v2594_v61 = vmul.f32 %v5693_v6, %v2432_v63  ;;  %v1827_v28 = vadd.f32 %v5343_v45, %v5539_v21  ;;  %v6348_v45 = vld [vmem:[#allocation85_spill] sm:$0xff] }
 0x2e9   : > { %v1945_v27 = vpop.f32.mrf.mxu0 }
 0x2ea   : > { %v1946_v12 = vadd.f32 %v1945_v27, %v1817_v56  ;;  %v2591_v56 = vmul.f32 %v5687_v18, %v2429_v47  ;;  %v1901_v18 = vpop.f32.mrf.mxu2 }
 0x2eb   : > { %3205 = vmatpush.bf16.msra.mxu0 %v3776_v8 }
 0x2ec   : > { %v2329_v13 = vmax.f32 %v1946_v12, 0.0  ;;  %v2625_v12 = vrot.slane %v2624_v57, 2 }
 0x2ed   : > { %v2293_v30 = vpop.f32.mrf.mxu3 }
 0x2ee   : > { %v2491_v3 = vmul.f32 %v5618_v0, %v2329_v13  ;;  %v2167_v53 = vpop.f32.mrf.mxu1  ;;  %v2294_v42 = vadd.f32 %v2293_v30, %v2165_v44  ;;  %v2860_v13 = vmax.f32 %v2591_v56, %v2594_v61  ;;  %v1830_v61 = vadd.f32 %v6348_v45, %v5539_v21 }
 0x2ef   : > { %v2168_v11 = vadd.f32 %v2167_v53, %v5223_v10  ;;  %3206 = vmatpush.bf16.msra.mxu0 %v3775_v26 }
 0x2f0   : > { %v2653_v17 = vmax.f32 %v2652_v19, %v2491_v3  ;;  %v2597_v19 = vmul.f32 %v5720_v49, %v2435_v41 }
 0x2f1   : > { %v1948_v31 = vpop.f32.mrf.mxu0 }
 0x2f2   : > { %v1949_v0 = vadd.f32 %v1948_v31, %v1820_v2  ;;  %v2861_v6 = vmax.f32 %v2860_v13, %v2597_v19  ;;  %v2626_v2 = vmax.f32 %v2624_v57, %v2625_v12 }
 0x2f4   : > { %v2332_v23 = vmax.f32 %v1949_v0, 0.0 }
 0x2f5   : > { %v2296_v29 = vpop.f32.mrf.mxu3 }
 0x2f6   : > { %v2494_v24 = vmul.f32 %v5628_v22, %v2332_v23  ;;  %v2297_v1 = vadd.f32 %v2296_v29, %v2168_v11  ;;  %v2438_v22 = vmax.f32 %v2294_v42, 0.0  ;;  %v2169_v9 = vpop.f32.mrf.mxu1 }
 0x2f7   : > { %v2170_v62 = vadd.f32 %v2169_v9, %v5223_v10  ;;  %v1825_v10 = vadd.f32 %v5328_v46, %v5539_v21 }
 0x2f8   : > { %v2654_v40 = vmax.f32 %v2653_v17, %v2494_v24  ;;  %v2441_v27 = vmax.f32 %v2297_v1, 0.0  ;;  %v2600_v37 = vmul.f32 %v5734_v35, %v2438_v22  ;;  %v2627_v35 = vrot.slane %v2626_v2, 1 }
 0x2f9   : > { %v1950_v32 = vpop.f32.mrf.mxu0 }
 0x2fa   : > { %v1951_v50 = vadd.f32 %v1950_v32, %v1822_v51  ;;  %v2603_v52 = vmul.f32 %v5752_v36, %v2441_v27  ;;  %v2862_v53 = vmax.f32 %v2861_v6, %v2600_v37  ;;  %v2628_v44 = vmax.f32 %v2626_v2, %v2627_v35 }
 0x2fc   : > { %v2335_v15 = vmax.f32 %v1951_v50, 0.0  ;;  %v2863_v14 = vmax.f32 %v2862_v53, %v2603_v52  ;;  %v2872_v26 = vpack.c.bf16 %v2628_v44, %v2628_v44  ;;  %v5985_v53 = vld [vmem:[%s6123_s3 + $0x50] sm:$0xff] }
 0x2fd   : > { %v2298_v30 = vpop.f32.mrf.mxu3 }
 0x2fe   : > { %v2497_v3 = vmul.f32 %v5647_v7, %v2335_v15  ;;  %v2299_v4 = vadd.f32 %v2298_v30, %v2170_v62  ;;  %v2972_v22 = vunpack.c.l.b16 %v2872_v26  ;;  %v1832_v30 = vadd.f32 %v5372_v60, %v5539_v21  ;;  %v3774_v60 = vld [vmem:[%s6124_s4 + $0x78] sm:$0xff] }
 0x2ff   : > { %3186 = vmatpush.bf16.msrb.mxu2 %v3774_v60  ;;  %v6358_v60 = vld [vmem:[#allocation65_spill] sm:$0xff] }
 0x300   : > { %v2655_v17 = vmax.f32 %v2654_v40, %v2497_v3  ;;  %v2444_v49 = vmax.f32 %v2299_v4, 0.0 }
 0x301   : > { %v1953_v5 = vpop.f32.mrf.mxu0 }
 0x302   : > { %v2656_v39 = vrot.slane %v2655_v17, 4  ;;  %v2606_v31 = vmul.f32 %v5768_v25, %v2444_v49  ;;  %v1954_v16 = vadd.f32 %v1953_v5, %v1825_v10  ;;  %v1904_v25 = vpop.f32.mrf.mxu2  ;;  %v1902_v10 = vadd.f32 %v1901_v18, %v5539_v21  ;;  %v6349_v18 = vld [vmem:[#allocation59_spill] sm:$0xff] }
 0x304   : > { %v2657_v7 = vmax.f32 %v2655_v17, %v2656_v39  ;;  %v2864_v0 = vmax.f32 %v2863_v14, %v2606_v31  ;;  %v2338_v11 = vmax.f32 %v1954_v16, 0.0 }
 0x306   : > { %v2658_v8 = vrot.slane %v2657_v7, 2  ;;  %v2865_v36 = vrot.slane %v2864_v0, 4  ;;  %v2500_v51 = vmul.f32 %v5905_v48, %v2338_v11  ;;  %v6351_v11 = vld [vmem:[#allocation72_spill] sm:$0xff] }
 0x308   : > { %v2659_v59 = vmax.f32 %v2657_v7, %v2658_v8  ;;  %v2866_v23 = vmax.f32 %v2864_v0, %v2865_v36  ;;  %v3773_v7 = vld [vmem:[%s6124_s4 + $0x70] sm:$0xff]  ;;  %v1900_v0 = vadd.f32 %v5953_v55, %v5539_v21  ;;  %v6003_v8 = vld [vmem:[%s6123_s3 + $0x68] sm:$0xff]  ;;  %v1837_v36 = vadd.f32 %v6349_v18, %v5539_v21 }
 0x309   : > { %v1955_v63 = vpop.f32.mrf.mxu0  ;;  %3187 = vmatpush.bf16.msrb.mxu2 %v3773_v7 }
 0x30a   : > { %v2660_v42 = vrot.slane %v2659_v59, 1  ;;  %v1956_v24 = vadd.f32 %v1955_v63, %v1827_v28  ;;  %v2867_v29 = vrot.slane %v2866_v23, 2  ;;  %v1906_v13 = vpop.f32.mrf.mxu2  ;;  %v6350_v28 = vld [vmem:[#allocation75_spill] sm:$0xff] }
 0x30b   : > { %v2031_v44 = vadd.f32 %v6350_v28, %v1902_v10  ;;  %v3769_v10 = vld [vmem:[%s6124_s4 + $0x50] sm:$0xff] }
 0x30c   : > { %v2661_v46 = vmax.f32 %v2659_v59, %v2660_v42  ;;  %v2341_v47 = vmax.f32 %v1956_v24, 0.0  ;;  %v2868_v41 = vmax.f32 %v2866_v23, %v2867_v29  ;;  %v1907_v59 = vadd.f32 %v1906_v13, %v5539_v21  ;;  %v3772_v42 = vld [vmem:[%s6124_s4 + $0x68] sm:$0xff] }
 0x30d   : > { %v2029_v24 = vadd.f32 %v6351_v11, %v1900_v0  ;;  %3188 = vmatpush.bf16.msrb.mxu2 %v3772_v42  ;;  %v3768_v42 = vld [vmem:[%s6124_s4 + $0x48] sm:$0xff]  ;;  %v6362_v11 = vld [vmem:[#allocation26_spill] sm:$0xff] }
 0x30e   : > { %v2875_v1 = vpack.c.bf16 %v2661_v46, %v2661_v46  ;;  %v2503_v57 = vmul.f32 %v5911_v58, %v2341_v47  ;;  %v2869_v40 = vrot.slane %v2868_v41, 1  ;;  %v2431_v47 = vmax.f32 %v2031_v44, 0.0  ;;  %v6361_v44 = vld [vmem:[#allocation73_spill] sm:$0xff] }
 0x30f   : > { %v2428_v45 = vmax.f32 %v2029_v24, 0.0 }
 0x310   : > { %v2975_v32 = vunpack.c.l.b16 %v2875_v1  ;;  %v2684_v9 = vmax.f32 %v2500_v51, %v2503_v57  ;;  %v2870_v50 = vmax.f32 %v2868_v41, %v2869_v40  ;;  %v6353_v41 = vld [vmem:[#allocation79_spill] sm:$0xff] }
 0x311   : > { %v1958_v56 = vpop.f32.mrf.mxu0  ;;  %v2036_v1 = vadd.f32 %v6353_v41, %v1907_v59  ;;  %v3771_v40 = vld [vmem:[%s6124_s4 + $0x60] sm:$0xff]  ;;  %v1850_v59 = vadd.f32 %v6361_v44, %v5539_v21 }
 0x312   : > { %v5975_v19 = vsel %vm2995_vm7, %v2975_v32, %v2972_v22  ;;  %v1959_v27 = vadd.f32 %v1958_v56, %v1830_v61  ;;  %v2894_v12 = vpack.c.bf16 %v2870_v50, %v2870_v50  ;;  %v1909_v5 = vpop.f32.mrf.mxu2  ;;  %v6354_v22 = vld [vmem:[#allocation81_spill] sm:$0xff]  ;;  %3189 = vmatpush.bf16.msrb.mxu2 %v3771_v40  ;;  %v2593_v56 = vmul.f32 %v5911_v58, %v2431_v47  ;;  %v3767_v40 = vld [vmem:[%s6124_s4 + $0x40] sm:$0xff] }
 0x313   : > { %v1910_v26 = vadd.f32 %v1909_v5, %v5539_v21 }
 0x314   : > { %v2344_v15 = vmax.f32 %v1959_v27, 0.0  ;;  %v2994_v37 = vunpack.c.l.b16 %v2894_v12  ;;  %v2437_v27 = vmax.f32 %v2036_v1, 0.0  ;;  %v6355_v12 = vld [vmem:[#allocation84_spill] sm:$0xff] }
 0x315   : > { %v2039_v32 = vadd.f32 %v6354_v22, %v1910_v26 }
 0x316   : > { %v2506_v62 = vmul.f32 %v5919_v43, %v2344_v15  ;;  %v3022_v3 = vsel %vm3007_vm13, %v2994_v37, %v5927_v54  ;;  %v1835_v54 = vadd.f32 %v5392_v20, %v5539_v21  ;;  %v1905_v20 = vadd.f32 %v1904_v25, %v5539_v21  ;;  %v6352_v25 = vld [vmem:[#allocation77_spill] sm:$0xff] }
 0x317   : > { %v3025_v52 = vpack.c.b16 %v3022_v3, %v3022_v3  ;;  %v2590_v3 = vmul.f32 %v5905_v48, %v2428_v45  ;;  %v6364_v45 = vld [vmem:[#allocation29_spill] sm:$0xff] }
 0x318   : > { %v2685_v6 = vmax.f32 %v2684_v9, %v2506_v62  ;;  %v2034_v29 = vadd.f32 %v6352_v25, %v1905_v20  ;;  %v6025_v9 = vld [vmem:[%s6123_s3 + $0x80] sm:$0xff]  ;;  %v3770_v62 = vld [vmem:[%s6124_s4 + $0x58] sm:$0xff] }
 0x319   : > { %v1960_v4 = vpop.f32.mrf.mxu0  ;;  %3207 = vmatmul.bf16.vlgmr.msra.gmra.mxu0 %v3025_v52  ;;  %3190 = vmatpush.bf16.msrb.mxu2 %v3770_v62  ;;  %v2849_v5 = vmax.f32 %v2590_v3, %v2593_v56  ;;  %v6363_v25 = vld [vmem:[#allocation6_spill] sm:$0xff] }
 0x31a   : > { %v1961_v2 = vadd.f32 %v1960_v4, %v1832_v30  ;;  %v1911_v63 = vpop.f32.mrf.mxu2  ;;  %v2434_v61 = vmax.f32 %v2034_v29, 0.0  ;;  %v6356_v4 = vld [vmem:[#allocation10_spill] sm:$0xff]  ;;  %v1852_v29 = vadd.f32 %v6363_v25, %v5539_v21 }
 0x31b   : > { %v1912_v51 = vadd.f32 %v1911_v63, %v5539_v21 }
 0x31c   : > { %v2347_v17 = vmax.f32 %v1961_v2, 0.0  ;;  %v2596_v30 = vmul.f32 %v5919_v43, %v2434_v61  ;;  %v1840_v2 = vadd.f32 %v6356_v4, %v5539_v21  ;;  %v1979_v61 = vadd.f32 %v6364_v45, %v1850_v59 }
 0x31d   : > { %v2041_v15 = vadd.f32 %v6355_v12, %v1912_v51  ;;  %3191 = vmatpush.bf16.msrb.mxu2 %v3769_v10  ;;  %v2755_v12 = vrot.slane %v5651_v34, 4 }
 0x31e   : > { %v2509_v49 = vmul.f32 %v5985_v53, %v2347_v17  ;;  %v6357_v17 = vld [vmem:[#allocation13_spill] sm:$0xff] }
 0x320   : > { %v2686_v39 = vmax.f32 %v2685_v6, %v2509_v49  ;;  %v2440_v6 = vmax.f32 %v2039_v32, 0.0  ;;  %v1845_v49 = vadd.f32 %v6357_v17, %v5539_v21 }
 0x321   : > { %v1963_v14 = vpop.f32.mrf.mxu0  ;;  %3192 = vmatpush.bf16.msrb.mxu2 %v3768_v42 }
 0x322   : > { %v1964_v31 = vadd.f32 %v1963_v14, %v1835_v54  ;;  %v2599_v54 = vmul.f32 %v5985_v53, %v2437_v27  ;;  %v2602_v7 = vmul.f32 %v6003_v8, %v2440_v6  ;;  %v2368_v6 = vmax.f32 %v1979_v61, 0.0 }
 0x324   : > { %v2350_v35 = vmax.f32 %v1964_v31, 0.0  ;;  %v1847_v31 = vadd.f32 %v6358_v60, %v5539_v21 }
 0x325   : > { %3193 = vmatpush.bf16.msrb.mxu2 %v3767_v40 }
 0x326   : > { %v2512_v16 = vmul.f32 %v6003_v8, %v2350_v35  ;;  %v2850_v35 = vmax.f32 %v2849_v5, %v2596_v30  ;;  %v1976_v24 = vadd.f32 %v6362_v11, %v1847_v31  ;;  %v2821_v30 = vrot.slane %v5838_v38, 4 }
 0x328   : > { %v2687_v23 = vmax.f32 %v2686_v39, %v2512_v16  ;;  %v2443_v39 = vmax.f32 %v2041_v15, 0.0  ;;  %v6359_v16 = vld [vmem:[#allocation60_spill] sm:$0xff]  ;;  %v2365_v56 = vmax.f32 %v1976_v24, 0.0  ;;  %v2788_v15 = vrot.slane %v5746_v33, 4 }
 0x329   : > { %v1965_v55 = vpop.f32.mrf.mxu0  ;;  %v1842_v18 = vadd.f32 %v6359_v16, %v5539_v21  ;;  %v6365_v21 = vld [vmem:[#allocation31_spill] sm:$0xff] }
 0x32a   : > { %v1966_v46 = vadd.f32 %v1965_v55, %v1837_v36  ;;  %v6360_v36 = vld [vmem:[#allocation24_spill] sm:$0xff]  ;;  %v2605_v63 = vmul.f32 %v6025_v9, %v2443_v39  ;;  %v1981_v27 = vadd.f32 %v6365_v21, %v1852_v29  ;;  %v2527_v17 = vmul.f32 %v5985_v53, %v2365_v56 }
 0x32b   : > { %v1974_v28 = vadd.f32 %v6360_v36, %v1845_v49  ;;  %v2756_v49 = vmax.f32 %v5651_v34, %v2755_v12 }
 0x32c   : > { %v2353_v57 = vmax.f32 %v1966_v46, 0.0  ;;  %v2371_v5 = vmax.f32 %v1981_v27, 0.0 }
 0x32d   : > { %v2757_v10 = vrot.slane %v2756_v49, 2 }
 0x32e   : > { %v2515_v50 = vmul.f32 %v6025_v9, %v2353_v57  ;;  %v2362_v57 = vmax.f32 %v1974_v28, 0.0 }
 0x330   : > { %v2688_v13 = vmax.f32 %v2687_v23, %v2515_v50  ;;  %v2851_v23 = vmax.f32 %v2850_v35, %v2599_v54  ;;  %v2524_v3 = vmul.f32 %v5919_v43, %v2362_v57  ;;  %v2789_v54 = vmax.f32 %v5746_v33, %v2788_v15 }
 0x331   : > { %v1968_v37 = vpop.f32.mrf.mxu0  ;;  %v2822_v43 = vmax.f32 %v5838_v38, %v2821_v30  ;;  %v2533_v35 = vmul.f32 %v6025_v9, %v2371_v5  ;;  %v2758_v33 = vmax.f32 %v2756_v49, %v2757_v10 }
 0x332   : > { %v2689_v52 = vrot.slane %v2688_v13, 4  ;;  %v1969_v20 = vadd.f32 %v1968_v37, %v1840_v2  ;;  %v2852_v46 = vmax.f32 %v2851_v23, %v2602_v7  ;;  %v2790_v53 = vrot.slane %v2789_v54, 2 }
 0x333   : > { %v2823_v34 = vrot.slane %v2822_v43, 2  ;;  %v2759_v44 = vrot.slane %v2758_v33, 1 }
 0x334   : > { %v2690_v14 = vmax.f32 %v2688_v13, %v2689_v52  ;;  %v2356_v41 = vmax.f32 %v1969_v20, 0.0  ;;  %v2853_v22 = vmax.f32 %v2852_v46, %v2605_v63  ;;  %v2791_v16 = vmax.f32 %v2789_v54, %v2790_v53 }
 0x336   : > { %v2691_v0 = vrot.slane %v2690_v14, 2  ;;  %v2518_v37 = vmul.f32 %v5905_v48, %v2356_v41  ;;  %v2854_v52 = vrot.slane %v2853_v22, 4  ;;  %v2792_v38 = vrot.slane %v2791_v16, 1 }
 0x338   : > { %v2692_v55 = vmax.f32 %v2690_v14, %v2691_v0  ;;  %v2530_v14 = vmul.f32 %v6003_v8, %v2368_v6  ;;  %v2855_v60 = vmax.f32 %v2853_v22, %v2854_v52  ;;  %v2793_v42 = vmax.f32 %v2791_v16, %v2792_v38 }
 0x339   : > { %v1970_v26 = vpop.f32.mrf.mxu0  ;;  %v6058_v51 = vpop.f32.mrf.mxu2 }
 0x33a   : > { %v2693_v47 = vrot.slane %v2692_v55, 1  ;;  %v1971_v1 = vadd.f32 %v1970_v26, %v1842_v18  ;;  %v2856_v0 = vrot.slane %v2855_v60, 2  ;;  %v2887_v26 = vpack.c.bf16 %v2793_v42, %v2793_v42 }
 0x33c   : > { %v2694_v32 = vmax.f32 %v2692_v55, %v2693_v47  ;;  %v2359_v50 = vmax.f32 %v1971_v1, 0.0  ;;  %v2857_v36 = vmax.f32 %v2855_v60, %v2856_v0  ;;  %v2760_v55 = vmax.f32 %v2758_v33, %v2759_v44 }
 0x33d   : > { %v2987_v40 = vunpack.c.l.b16 %v2887_v26 }
 0x33e   : > { %v2878_v13 = vpack.c.bf16 %v2694_v32, %v2694_v32  ;;  %v2521_v62 = vmul.f32 %v5911_v58, %v2359_v50  ;;  %v2858_v23 = vrot.slane %v2857_v36, 1  ;;  %v2884_v29 = vpack.c.bf16 %v2760_v55, %v2760_v55 }
 0x340   : > { %v2978_v4 = vunpack.c.l.b16 %v2878_v13  ;;  %v2717_v2 = vmax.f32 %v2518_v37, %v2521_v62  ;;  %v2859_v24 = vmax.f32 %v2857_v36, %v2858_v23  ;;  %v2984_v57 = vunpack.c.l.b16 %v2884_v29  ;;  %v3830_v13 = vld [vmem:[%s6125_s5] ss:$0 sm:$0xff] }
 0x341   : > { %v3184_v39 = vpop.f32.mrf.mxu2  ;;  %v3183_v37 = vadd.f32 %v3830_v13, %v6058_v51 }
 0x342   : > { %v3010_v48 = vsel %vm2997_vm8, %v2978_v4, %v5975_v19  ;;  %v2718_v58 = vmax.f32 %v2717_v2, %v2524_v3  ;;  %v2824_v19 = vmax.f32 %v2822_v43, %v2823_v34  ;;  %v2893_v41 = vpack.c.bf16 %v2859_v24, %v2859_v24 }
 0x344   : > { %v2719_v31 = vmax.f32 %v2718_v58, %v2527_v17  ;;  %v2825_v8 = vrot.slane %v2824_v19, 1  ;;  %v2993_v32 = vunpack.c.l.b16 %v2893_v41 }
 0x346   : > { %v2720_v7 = vmax.f32 %v2719_v31, %v2530_v14  ;;  %v2826_v11 = vmax.f32 %v2824_v19, %v2825_v8 }
 0x348   : > { %v2721_v20 = vmax.f32 %v2720_v7, %v2533_v35  ;;  %v2890_v47 = vpack.c.bf16 %v2826_v11, %v2826_v11 }
 0x34a   : > { %v2722_v18 = vrot.slane %v2721_v20, 4  ;;  %v2990_v61 = vunpack.c.l.b16 %v2890_v47 }
 0x34c   : > { %v2723_v28 = vmax.f32 %v2721_v20, %v2722_v18 }
 0x34e   : > { %v2724_v59 = vrot.slane %v2723_v28, 2 }
 0x350   : > { %v2725_v63 = vmax.f32 %v2723_v28, %v2724_v59 }
 0x352   : > { %v2726_v9 = vrot.slane %v2725_v63, 1 }
 0x354   : > { %v2727_v25 = vmax.f32 %v2725_v63, %v2726_v9 }
 0x356   : > { %v2881_v46 = vpack.c.bf16 %v2727_v25, %v2727_v25 }
 0x358   : > { %v2981_v1 = vunpack.c.l.b16 %v2881_v46 }
 0x35a   : > { %v3011_v45 = vsel %vm2999_vm9, %v2981_v1, %v3010_v48 }
 0x35b   : > { %v3012_v22 = vsel %vm3001_vm10, %v2984_v57, %v3011_v45 }
 0x35c   : > { %v3013_v50 = vsel %vm3003_vm11, %v2987_v40, %v3012_v22 }
 0x35d   : > { %v3014_v56 = vsel %vm3005_vm12, %v2990_v61, %v3013_v50 }
 0x35e   : > { %v3015_v21 = vsel %vm3007_vm13, %v2993_v32, %v3014_v56 }
 0x35f   : > { %v3024_v27 = vpack.c.b16 %v3015_v21, %v3015_v21 }
 0x361   : > { %3194 = vmatmul.bf16.vlgmr.msrb.gmra.mxu2 %v3024_v27 }
 0x396   : > { %v3208_v12 = vpop.f32.mrf.mxu0 }
 0x39e   : > { %v3210_v15 = vpop.f32.mrf.mxu0 }
 0x3e4   : > { %v3195_v62 = vpop.f32.mrf.mxu2 }
 0x3e5   : > { %v3196_v3 = vadd.f32 %v3195_v62, %v3183_v37 }
 0x3e7   : > { %v3209_v30 = vadd.f32 %v3208_v12, %v3196_v3 }
 0x3e9   : > { %3212 = vmax.xlane.f32.xlu0 %v3209_v30 }
 0x3ec   : > { %v3197_v6 = vpop.f32.mrf.mxu2 }
 0x45c   : > { %v3213_v52 = vpop.xlane.xlu0 %3212 }
 0x45d   : > { %v3214_v4 = vsub.f32 %v3209_v30, %v3213_v52 }
 0x45f   : > { %v3215_v2 = vmul.f32 1.442695, %v3214_v4 }
 0x461   : > { %3831 = vpow2.f32 %v3215_v2 }
 0x467   : > { %v3832_v17 = vpop.eup %3831 }
 0x468   : > { %3217 = vadd.xlane.f32.xlu1 %v3832_v17 }
 0x4db   : > { %v3218_v49 = vpop.xlane.xlu1 %3217 }
 0x4dc   : > { %3833 = vrcp.f32 %v3218_v49  ;;  %v3230_v51 = vand.u32 2147483648, %v3218_v49  ;;  %v3228_v39 = vand.u32 2147483647, %v3218_v49  ;;  %vm3224_vm15 = vweird.f32 %v3218_v49 }
 0x4de   : > { %v3231_v14 = vor.u32 1.1754944e-38, %v3230_v51  ;;  %vm3229_vm1 = vcmp.eq.f32.partialorder %v3228_v39, 8.507059e+37 }
 0x4e2   : > { %v3834_v5 = vpop.eup %3833 }
 0x4e3   : > { %v3220_v54 = vmul.f32 %v3834_v5, %v3218_v49  ;;  %vm3225_vm14 = vweird.f32 %v3834_v5 }
 0x4e4   : > { %vm3226_vm0 = vmor %vm3224_vm15, %vm3225_vm14 }
 0x4e5   : > { %v3221_v48 = vsub.f32 1.0, %v3220_v54 }
 0x4e7   : > { %v3222_v58 = vmul.f32 %v3834_v5, %v3221_v48 }
 0x4e9   : > { %v3223_v43 = vadd.f32 %v3834_v5, %v3222_v58 }
 0x4eb   : > { %v3227_v60 = vsel %vm3226_vm0, %v3834_v5, %v3223_v43 }
 0x4ec   : > { %v3232_v31 = vsel %vm3229_vm1, %v3231_v14, %v3227_v60 }
 0x4ed   : > { %v3233_v10 = vmul.f32 %v3832_v17, %v3232_v31 }
 0x4ef   : > { %3234 = vst [vmem:[%s247_s29] sm:$0xff] %v3233_v10 }
 0x4f0   : > { %3895 = shalt.err (!%p3892_p3)
}
 0x4f1   : > { %3788 = dma.vmem_to_hbm [thread:$0]  (%p4005_p5), %s3249_s9, 128, %s3251_s11, %s3236_s25  }
 0x4f2 PF: > { %p3794_p4 = scmp.ge.s32.totalorder %s3930_s24, 2  ;;  %s3262_s18 = sand.u32 1, %s3918_s21  }
 0x4f3   : > { %s3263_s19 = scalar_lea.sflag [#allocation3], %s3262_s18 }
 0x4f4   : > { %p3791_p7 = pnand %p3794_p4, %p4009_p6 }
 0x4f6   : > { %p3792_p8 = pneg %p3791_p7 }
 0x4f8   : > { %3913 = dma.done.wait (%p3792_p8), %s3263_s19, 128  }
 0x4f9   : > { %3915 = vsyncadd (%p3792_p8), %s3263_s19, 4294967168  ;;  %p16_p9 = scmp.ge.s32.totalorder %s3993_s27, 4   ;;  %s6366_s21 = smov %s3922_s22 }
 0x4fa   : > { %s6367_s22 = smov %s3926_s23  ;;  %s6368_s23 = smov %s4003_s30 }
 0x4fb   : > { %s6369_s24 = smov %s3993_s27  ;;  %18 = sbr.rel (!%p16_p9) target bundleno = 3 (0x3), region = 79 }
 0x500   :  { %3269 = vsyncpa [#allocation3], 1 }
 0x501   :  { %3271 = vsyncpa [#allocation3 + $0x1], 1 }

</bundles_post_ra>
